<compile_context>
chip_gen: v5e
topology: v5e:2x2
jax: 0.10.0
libtpu: 0.0.40
codegen_flags: <defaults>
</compile_context>

<pallas_src>
import functools

import jax
import jax.numpy as jnp
from jax.experimental import pallas as pl
from jax.experimental.pallas import tpu as pltpu


# ----------------------------------------------------------------------------
# Fused kernel: (1x1 conv + BN + ReLU) -> (3x3 conv + BN + ReLU) -> 1x1 conv
# One grid step = one batch element. Internal layout: rows = flattened H*W pixels
# (sublanes), channels on lanes.
# ----------------------------------------------------------------------------
def _proj_fused_kernel(x_ref, w1_ref, b1_ref, w3_ref, b2_ref, w2_ref, o_ref, ybuf,
                       *, H, W):
    HW = H * W
    B = W + 1                       # flat-buffer offset of image pixel (0, 0)

    # ---- stage 1: 1x1 conv (BN scale folded into w1) + shift + ReLU ----------
    y = jnp.dot(x_ref[0], w1_ref[...], preferred_element_type=jnp.float32)
    y = jnp.maximum(y + b1_ref[...], 0.0).astype(ybuf.dtype)        # (H*W, Cmid) bf16

    # Flat buffer with one zero image-row (+1 pixel) of halo above and below.  The
    # interior is fully overwritten every step, so only the halo is re-zeroed
    # (scratch persists across per-core grid steps).
    zero_halo = jnp.zeros((B, ybuf.shape[1]), ybuf.dtype)
    ybuf[pl.ds(0, B), :] = zero_halo
    ybuf[pl.ds(B + HW, B), :] = zero_halo
    ybuf[pl.ds(B, HW), :] = y                                        # one big store

    # ---- stage 2: 3x3 conv (BN scale folded into w3) + shift + ReLU ----------
    # Tap (ky, kx) of output pixel q reads flat row  B + q + (ky-1)*W + (kx-1)
    # = q + ky*W + kx, i.e. one contiguous slice per tap -> one MXU matmul per tap.
    # Left/right taps wrap across image rows at c==0 / c==W-1; those contributions
    # are zeroed after the matmul (exactly what SAME zero-padding would give).
    acc_l = acc_m = acc_r = None
    for t in range(9):
        ky, kx = divmod(t, 3)
        tap = jnp.dot(ybuf[pl.ds(ky * W + kx, HW), :], w3_ref[t],
                      preferred_element_type=jnp.float32)
        if kx == 0:
            acc_l = tap if acc_l is None else acc_l + tap
        elif kx == 1:
            acc_m = tap if acc_m is None else acc_m + tap
        else:
            acc_r = tap if acc_r is None else acc_r + tap

    col = jax.lax.broadcasted_iota(jnp.int32, (HW, 1), 0) % W
    acc = (acc_m
           + jnp.where(col != 0, acc_l, 0.0)
           + jnp.where(col != W - 1, acc_r, 0.0))
    z = jnp.maximum(acc + b2_ref[...], 0.0).astype(w2_ref.dtype)     # (H*W, Cmid) bf16

    # ---- stage 3: final 1x1 conv on the in-VMEM activation --------------------
    o_ref[0] = jnp.dot(z, w2_ref[...],
                       preferred_element_type=jnp.float32).astype(o_ref.dtype)


def proj_forward(x_nchw, params):
    """NCHW in / NCHW out, matching the PyTorch module (eval-mode BatchNorm)."""
    N, Cin, H, W = x_nchw.shape
    Cmid = params["w1"].shape[1]
    Ct = params["w2"].shape[1]
    HW = H * W
    buf_rows = HW + 2 * (W + 1)     # flat activation buffer incl. top/bottom halo

    # Fold BN scales into the conv weights; keep shifts as f32 row vectors.
    w1 = (params["w1"] * params["scale1"][None, :]).astype(jnp.bfloat16)
    w3 = (params["w3"] * params["scale2"][None, None, None, :]) \
        .reshape(9, Cmid, Cmid).astype(jnp.bfloat16)
    w2 = params["w2"].astype(jnp.bfloat16)
    b1 = params["shift1"].reshape(1, Cmid).astype(jnp.float32)
    b2 = params["shift2"].reshape(1, Cmid).astype(jnp.float32)

    # NCHW -> NHWC -> (N, H*W, Cin), bf16 for the MXU.
    x = jnp.transpose(x_nchw, (0, 2, 3, 1)).reshape(N, HW, Cin).astype(jnp.bfloat16)

    out = pl.pallas_call(
        functools.partial(_proj_fused_kernel, H=H, W=W),
        out_shape=jax.ShapeDtypeStruct((N, HW, Ct), jnp.float32),
        grid=(N,),
        in_specs=[
            pl.BlockSpec((1, HW, Cin), lambda n: (n, 0, 0)),
            pl.BlockSpec((Cin, Cmid), lambda n: (0, 0)),
            pl.BlockSpec((1, Cmid), lambda n: (0, 0)),
            pl.BlockSpec((9, Cmid, Cmid), lambda n: (0, 0, 0)),
            pl.BlockSpec((1, Cmid), lambda n: (0, 0)),
            pl.BlockSpec((Cmid, Ct), lambda n: (0, 0)),
        ],
        out_specs=pl.BlockSpec((1, HW, Ct), lambda n: (n, 0, 0)),
        scratch_shapes=[pltpu.VMEM((buf_rows, Cmid), jnp.bfloat16)],
        compiler_params=pltpu.CompilerParams(dimension_semantics=("parallel",)),
    )(x, w1, b1, w3, b2, w2)

    out = out.reshape(N, H, W, Ct)
    return jnp.transpose(out, (0, 3, 1, 2))        # back to NCHW


# ----------------------------------------------------------------------------
# Pure-JAX reference with identical numerics (bf16 operands, f32 accumulation)
# ----------------------------------------------------------------------------
def proj_reference(x_nchw, params):
    N, Cin, H, W = x_nchw.shape
    Cmid = params["w1"].shape[1]
    w1 = (params["w1"] * params["scale1"][None, :]).astype(jnp.bfloat16)
    w3 = (params["w3"] * params["scale2"][None, None, None, :]).astype(jnp.bfloat16)
    w2 = params["w2"].astype(jnp.bfloat16)

    x = jnp.transpose(x_nchw, (0, 2, 3, 1)).astype(jnp.bfloat16)
    y = jax.lax.dot_general(x.reshape(-1, Cin), w1, (((1,), (0,)), ((), ())),
                            preferred_element_type=jnp.float32)
    y = jnp.maximum(y + params["shift1"], 0.0)
    y = y.reshape(N, H, W, Cmid).astype(jnp.bfloat16)
    z = jax.lax.conv_general_dilated(
        y, w3, window_strides=(1, 1), padding="SAME",
        dimension_numbers=("NHWC", "HWIO", "NHWC"),
        preferred_element_type=jnp.float32)
    z = jnp.maximum(z + params["shift2"], 0.0).astype(jnp.bfloat16)
    o = jax.lax.dot_general(z.reshape(-1, Cmid), w2, (((1,), (0,)), ((), ())),
                            preferred_element_type=jnp.float32)
    o = o.reshape(N, H, W, -1)
    return jnp.transpose(o, (0, 3, 1, 2))


def make_params(key, num_input_channels, num_target_channels):
    cmid = 2 * num_target_channels
    ks = jax.random.split(key, 11)
    eps = 1e-5
    w1 = jax.random.normal(ks[0], (num_input_channels, cmid), jnp.float32) * 0.05
    w3 = jax.random.normal(ks[1], (3, 3, cmid, cmid), jnp.float32) * 0.05
    w2 = jax.random.normal(ks[2], (cmid, num_target_channels), jnp.float32) * 0.05

    def bn_fold(kg, kb, km, kv, c):
        gamma = 1.0 + 0.1 * jax.random.normal(kg, (c,), jnp.float32)
        beta = 0.1 * jax.random.normal(kb, (c,), jnp.float32)
        mean = 0.1 * jax.random.normal(km, (c,), jnp.float32)
        var = jnp.abs(jax.random.normal(kv, (c,), jnp.float32)) + 0.5
        scale = gamma / jnp.sqrt(var + eps)
        shift = beta - mean * scale
        return scale, shift

    scale1, shift1 = bn_fold(ks[3], ks[4], ks[5], ks[6], cmid)
    scale2, shift2 = bn_fold(ks[7], ks[8], ks[9], ks[10], cmid)
    return dict(w1=w1, scale1=scale1, shift1=shift1,
                w3=w3, scale2=scale2, shift2=shift2, w2=w2)


if __name__ == "__main__":
    key = jax.random.PRNGKey(0)
    k_x, k_p = jax.random.split(key)

    # Small shapes consistent with the module (channels scaled down): Cmid = 32.
    N, Cin, H, W = 2, 32, 16, 16
    num_target_channels = 16

    x = jax.random.normal(k_x, (N, Cin, H, W), jnp.float32)
    params = make_params(k_p, Cin, num_target_channels)

    out = jax.block_until_ready(jax.jit(proj_forward)(x, params))
    ref = jax.block_until_ready(proj_reference(x, params))

    assert out.shape == (N, num_target_channels, H, W), out.shape
    max_err = float(jnp.max(jnp.abs(out - ref)))
    assert jnp.allclose(out, ref, rtol=1e-2, atol=1e-2), max_err
    print("KERNEL_OK")
</pallas_src>

<mosaic_0001>
module attributes {stable_mosaic.version = 11 : i64} {
  func.func @_proj_fused_kernel(%arg0: i32, %arg1: memref<1x256x32xbf16, #tpu.memory_space<vmem>>, %arg2: memref<32x32xbf16, #tpu.memory_space<vmem>>, %arg3: memref<1x32xf32, #tpu.memory_space<vmem>>, %arg4: memref<9x32x32xbf16, #tpu.memory_space<vmem>>, %arg5: memref<1x32xf32, #tpu.memory_space<vmem>>, %arg6: memref<32x16xbf16, #tpu.memory_space<vmem>>, %arg7: memref<1x256x16xf32, #tpu.memory_space<vmem>>, %arg8: memref<290x32xbf16, #tpu.memory_space<vmem>>) attributes {dimension_semantics = [#tpu.dimension_semantics<parallel>], iteration_bounds = array<i64: 2>, scalar_prefetch = 0 : i64, scratch_operands = 1 : i64, tpu.core_type = #tpu.core_type<tc>, window_params = [{transform_indices = @transform_0, window_bounds = array<i64: 1, 256, 32>}, {pipeline_mode = #tpu.pipeline_mode<synchronous>, transform_indices = @transform_1, window_bounds = array<i64: 32, 32>}, {pipeline_mode = #tpu.pipeline_mode<synchronous>, transform_indices = @transform_2, window_bounds = array<i64: 1, 32>}, {pipeline_mode = #tpu.pipeline_mode<synchronous>, transform_indices = @transform_3, window_bounds = array<i64: 9, 32, 32>}, {pipeline_mode = #tpu.pipeline_mode<synchronous>, transform_indices = @transform_4, window_bounds = array<i64: 1, 32>}, {pipeline_mode = #tpu.pipeline_mode<synchronous>, transform_indices = @transform_5, window_bounds = array<i64: 32, 16>}, {transform_indices = @transform_6, window_bounds = array<i64: 1, 256, 16>}]} {
    %c0 = arith.constant 0 : index
    %c0_0 = arith.constant 0 : index
    %c0_1 = arith.constant 0 : index
    %0 = vector.load %arg1[%c0, %c0_0, %c0_1] : memref<1x256x32xbf16, #tpu.memory_space<vmem>>, vector<1x256x32xbf16>
    %1 = vector.shape_cast %0 : vector<1x256x32xbf16> to vector<256x32xbf16>
    %c0_2 = arith.constant 0 : index
    %c0_3 = arith.constant 0 : index
    %2 = vector.load %arg2[%c0_2, %c0_3] : memref<32x32xbf16, #tpu.memory_space<vmem>>, vector<32x32xbf16>
    %cst = arith.constant dense<0.000000e+00> : vector<256x32xf32>
    %3 = tpu.matmul %1, %2, %cst {dimension_numbers = #tpu.dot_dimension_numbers<[1], [0], [0], [1], [0, 0, 1, 1], [], []>} : vector<256x32xbf16>, vector<32x32xbf16>, vector<256x32xf32> -> vector<256x32xf32>
    %c0_4 = arith.constant 0 : index
    %c0_5 = arith.constant 0 : index
    %4 = vector.load %arg3[%c0_4, %c0_5] : memref<1x32xf32, #tpu.memory_space<vmem>>, vector<1x32xf32>
    %5 = vector.broadcast %4 : vector<1x32xf32> to vector<256x32xf32>
    %6 = arith.addf %3, %5 : vector<256x32xf32>
    %cst_6 = arith.constant 0.000000e+00 : f32
    %7 = vector.broadcast %cst_6 : f32 to vector<256x32xf32>
    %8 = arith.maximumf %6, %7 : vector<256x32xf32>
    %9 = arith.truncf %8 : vector<256x32xf32> to vector<256x32xbf16>
    %cst_7 = arith.constant 0.000000e+00 : bf16
    %10 = vector.broadcast %cst_7 : bf16 to vector<17x32xbf16>
    %c0_8 = arith.constant 0 : index
    %c0_9 = arith.constant 0 : index
    %11 = vector.load %arg8[%c0_8, %c0_9] : memref<290x32xbf16, #tpu.memory_space<vmem>>, vector<17x32xbf16>
    tpu.vector_store %arg8[%c0_8, %c0_9], %10 {strides = array<i32>} : memref<290x32xbf16, #tpu.memory_space<vmem>>, vector<17x32xbf16>,
    %c273 = arith.constant 273 : index
    %c0_10 = arith.constant 0 : index
    %12 = vector.load %arg8[%c273, %c0_10] : memref<290x32xbf16, #tpu.memory_space<vmem>>, vector<17x32xbf16>
    tpu.vector_store %arg8[%c273, %c0_10], %10 {strides = array<i32>} : memref<290x32xbf16, #tpu.memory_space<vmem>>, vector<17x32xbf16>,
    %c17 = arith.constant 17 : index
    %c0_11 = arith.constant 0 : index
    %13 = vector.load %arg8[%c17, %c0_11] : memref<290x32xbf16, #tpu.memory_space<vmem>>, vector<256x32xbf16>
    tpu.vector_store %arg8[%c17, %c0_11], %9 {strides = array<i32>} : memref<290x32xbf16, #tpu.memory_space<vmem>>, vector<256x32xbf16>,
    %c0_12 = arith.constant 0 : index
    %c0_13 = arith.constant 0 : index
    %14 = vector.load %arg8[%c0_12, %c0_13] : memref<290x32xbf16, #tpu.memory_space<vmem>>, vector<256x32xbf16>
    %c0_14 = arith.constant 0 : index
    %c0_15 = arith.constant 0 : index
    %c0_16 = arith.constant 0 : index
    %15 = vector.load %arg4[%c0_14, %c0_15, %c0_16] : memref<9x32x32xbf16, #tpu.memory_space<vmem>>, vector<1x32x32xbf16>
    %16 = vector.shape_cast %15 : vector<1x32x32xbf16> to vector<32x32xbf16>
    %cst_17 = arith.constant dense<0.000000e+00> : vector<256x32xf32>
    %17 = tpu.matmul %14, %16, %cst_17 {dimension_numbers = #tpu.dot_dimension_numbers<[1], [0], [0], [1], [0, 0, 1, 1], [], []>} : vector<256x32xbf16>, vector<32x32xbf16>, vector<256x32xf32> -> vector<256x32xf32>
    %c1 = arith.constant 1 : index
    %c0_18 = arith.constant 0 : index
    %18 = vector.load %arg8[%c1, %c0_18] : memref<290x32xbf16, #tpu.memory_space<vmem>>, vector<256x32xbf16>
    %c1_19 = arith.constant 1 : index
    %c0_20 = arith.constant 0 : index
    %c0_21 = arith.constant 0 : index
    %19 = vector.load %arg4[%c1_19, %c0_20, %c0_21] : memref<9x32x32xbf16, #tpu.memory_space<vmem>>, vector<1x32x32xbf16>
    %20 = vector.shape_cast %19 : vector<1x32x32xbf16> to vector<32x32xbf16>
    %cst_22 = arith.constant dense<0.000000e+00> : vector<256x32xf32>
    %21 = tpu.matmul %18, %20, %cst_22 {dimension_numbers = #tpu.dot_dimension_numbers<[1], [0], [0], [1], [0, 0, 1, 1], [], []>} : vector<256x32xbf16>, vector<32x32xbf16>, vector<256x32xf32> -> vector<256x32xf32>
    %c2 = arith.constant 2 : index
    %c0_23 = arith.constant 0 : index
    %22 = vector.load %arg8[%c2, %c0_23] : memref<290x32xbf16, #tpu.memory_space<vmem>>, vector<256x32xbf16>
    %c2_24 = arith.constant 2 : index
    %c0_25 = arith.constant 0 : index
    %c0_26 = arith.constant 0 : index
    %23 = vector.load %arg4[%c2_24, %c0_25, %c0_26] : memref<9x32x32xbf16, #tpu.memory_space<vmem>>, vector<1x32x32xbf16>
    %24 = vector.shape_cast %23 : vector<1x32x32xbf16> to vector<32x32xbf16>
    %cst_27 = arith.constant dense<0.000000e+00> : vector<256x32xf32>
    %25 = tpu.matmul %22, %24, %cst_27 {dimension_numbers = #tpu.dot_dimension_numbers<[1], [0], [0], [1], [0, 0, 1, 1], [], []>} : vector<256x32xbf16>, vector<32x32xbf16>, vector<256x32xf32> -> vector<256x32xf32>
    %c16 = arith.constant 16 : index
    %c0_28 = arith.constant 0 : index
    %26 = vector.load %arg8[%c16, %c0_28] : memref<290x32xbf16, #tpu.memory_space<vmem>>, vector<256x32xbf16>
    %c3 = arith.constant 3 : index
    %c0_29 = arith.constant 0 : index
    %c0_30 = arith.constant 0 : index
    %27 = vector.load %arg4[%c3, %c0_29, %c0_30] : memref<9x32x32xbf16, #tpu.memory_space<vmem>>, vector<1x32x32xbf16>
    %28 = vector.shape_cast %27 : vector<1x32x32xbf16> to vector<32x32xbf16>
    %cst_31 = arith.constant dense<0.000000e+00> : vector<256x32xf32>
    %29 = tpu.matmul %26, %28, %cst_31 {dimension_numbers = #tpu.dot_dimension_numbers<[1], [0], [0], [1], [0, 0, 1, 1], [], []>} : vector<256x32xbf16>, vector<32x32xbf16>, vector<256x32xf32> -> vector<256x32xf32>
    %30 = arith.addf %17, %29 : vector<256x32xf32>
    %c17_32 = arith.constant 17 : index
    %c0_33 = arith.constant 0 : index
    %31 = vector.load %arg8[%c17_32, %c0_33] : memref<290x32xbf16, #tpu.memory_space<vmem>>, vector<256x32xbf16>
    %c4 = arith.constant 4 : index
    %c0_34 = arith.constant 0 : index
    %c0_35 = arith.constant 0 : index
    %32 = vector.load %arg4[%c4, %c0_34, %c0_35] : memref<9x32x32xbf16, #tpu.memory_space<vmem>>, vector<1x32x32xbf16>
    %33 = vector.shape_cast %32 : vector<1x32x32xbf16> to vector<32x32xbf16>
    %cst_36 = arith.constant dense<0.000000e+00> : vector<256x32xf32>
    %34 = tpu.matmul %31, %33, %cst_36 {dimension_numbers = #tpu.dot_dimension_numbers<[1], [0], [0], [1], [0, 0, 1, 1], [], []>} : vector<256x32xbf16>, vector<32x32xbf16>, vector<256x32xf32> -> vector<256x32xf32>
    %35 = arith.addf %21, %34 : vector<256x32xf32>
    %c18 = arith.constant 18 : index
    %c0_37 = arith.constant 0 : index
    %36 = vector.load %arg8[%c18, %c0_37] : memref<290x32xbf16, #tpu.memory_space<vmem>>, vector<256x32xbf16>
    %c5 = arith.constant 5 : index
    %c0_38 = arith.constant 0 : index
    %c0_39 = arith.constant 0 : index
    %37 = vector.load %arg4[%c5, %c0_38, %c0_39] : memref<9x32x32xbf16, #tpu.memory_space<vmem>>, vector<1x32x32xbf16>
    %38 = vector.shape_cast %37 : vector<1x32x32xbf16> to vector<32x32xbf16>
    %cst_40 = arith.constant dense<0.000000e+00> : vector<256x32xf32>
    %39 = tpu.matmul %36, %38, %cst_40 {dimension_numbers = #tpu.dot_dimension_numbers<[1], [0], [0], [1], [0, 0, 1, 1], [], []>} : vector<256x32xbf16>, vector<32x32xbf16>, vector<256x32xf32> -> vector<256x32xf32>
    %40 = arith.addf %25, %39 : vector<256x32xf32>
    %c32 = arith.constant 32 : index
    %c0_41 = arith.constant 0 : index
    %41 = vector.load %arg8[%c32, %c0_41] : memref<290x32xbf16, #tpu.memory_space<vmem>>, vector<256x32xbf16>
    %c6 = arith.constant 6 : index
    %c0_42 = arith.constant 0 : index
    %c0_43 = arith.constant 0 : index
    %42 = vector.load %arg4[%c6, %c0_42, %c0_43] : memref<9x32x32xbf16, #tpu.memory_space<vmem>>, vector<1x32x32xbf16>
    %43 = vector.shape_cast %42 : vector<1x32x32xbf16> to vector<32x32xbf16>
    %cst_44 = arith.constant dense<0.000000e+00> : vector<256x32xf32>
    %44 = tpu.matmul %41, %43, %cst_44 {dimension_numbers = #tpu.dot_dimension_numbers<[1], [0], [0], [1], [0, 0, 1, 1], [], []>} : vector<256x32xbf16>, vector<32x32xbf16>, vector<256x32xf32> -> vector<256x32xf32>
    %45 = arith.addf %30, %44 : vector<256x32xf32>
    %c33 = arith.constant 33 : index
    %c0_45 = arith.constant 0 : index
    %46 = vector.load %arg8[%c33, %c0_45] : memref<290x32xbf16, #tpu.memory_space<vmem>>, vector<256x32xbf16>
    %c7 = arith.constant 7 : index
    %c0_46 = arith.constant 0 : index
    %c0_47 = arith.constant 0 : index
    %47 = vector.load %arg4[%c7, %c0_46, %c0_47] : memref<9x32x32xbf16, #tpu.memory_space<vmem>>, vector<1x32x32xbf16>
    %48 = vector.shape_cast %47 : vector<1x32x32xbf16> to vector<32x32xbf16>
    %cst_48 = arith.constant dense<0.000000e+00> : vector<256x32xf32>
    %49 = tpu.matmul %46, %48, %cst_48 {dimension_numbers = #tpu.dot_dimension_numbers<[1], [0], [0], [1], [0, 0, 1, 1], [], []>} : vector<256x32xbf16>, vector<32x32xbf16>, vector<256x32xf32> -> vector<256x32xf32>
    %50 = arith.addf %35, %49 : vector<256x32xf32>
    %c34 = arith.constant 34 : index
    %c0_49 = arith.constant 0 : index
    %51 = vector.load %arg8[%c34, %c0_49] : memref<290x32xbf16, #tpu.memory_space<vmem>>, vector<256x32xbf16>
    %c8 = arith.constant 8 : index
    %c0_50 = arith.constant 0 : index
    %c0_51 = arith.constant 0 : index
    %52 = vector.load %arg4[%c8, %c0_50, %c0_51] : memref<9x32x32xbf16, #tpu.memory_space<vmem>>, vector<1x32x32xbf16>
    %53 = vector.shape_cast %52 : vector<1x32x32xbf16> to vector<32x32xbf16>
    %cst_52 = arith.constant dense<0.000000e+00> : vector<256x32xf32>
    %54 = tpu.matmul %51, %53, %cst_52 {dimension_numbers = #tpu.dot_dimension_numbers<[1], [0], [0], [1], [0, 0, 1, 1], [], []>} : vector<256x32xbf16>, vector<32x32xbf16>, vector<256x32xf32> -> vector<256x32xf32>
    %55 = arith.addf %40, %54 : vector<256x32xf32>
    %56 = tpu.iota {dimensions = array<i32: 0>} : vector<256x1xi32>
    %c16_i32 = arith.constant 16 : i32
    %c0_i32 = arith.constant 0 : i32
    %57 = arith.cmpi eq, %c16_i32, %c0_i32 : i32
    %c1_i32 = arith.constant 1 : i32
    %58 = arith.select %57, %c1_i32, %c16_i32 : i32
    %59 = vector.broadcast %58 : i32 to vector<256x1xi32>
    %60 = arith.remsi %56, %59 : vector<256x1xi32>
    %c0_i32_53 = arith.constant 0 : i32
    %61 = vector.broadcast %c0_i32_53 : i32 to vector<256x1xi32>
    %62 = arith.cmpi ne, %60, %61 : vector<256x1xi32>
    %c0_i32_54 = arith.constant 0 : i32
    %63 = vector.broadcast %c0_i32_54 : i32 to vector<256x1xi32>
    %64 = arith.cmpi slt, %60, %63 : vector<256x1xi32>
    %c0_i32_55 = arith.constant 0 : i32
    %65 = arith.cmpi slt, %58, %c0_i32_55 : i32
    %66 = vector.broadcast %65 : i1 to vector<256x1xi1>
    %67 = vector.broadcast %66 : vector<256x1xi1> to vector<256x1xi1>
    %68 = arith.xori %64, %67 : vector<256x1xi1>
    %69 = arith.andi %68, %62 : vector<256x1xi1>
    %70 = vector.broadcast %58 : i32 to vector<256x1xi32>
    %71 = arith.addi %60, %70 : vector<256x1xi32>
    %72 = arith.select %69, %71, %60 : vector<256x1xi1>, vector<256x1xi32>
    %c0_i32_56 = arith.constant 0 : i32
    %73 = vector.broadcast %c0_i32_56 : i32 to vector<256x1xi32>
    %74 = arith.cmpi ne, %72, %73 : vector<256x1xi32>
    %cst_57 = arith.constant 0.000000e+00 : f32
    %75 = vector.shape_cast %74 : vector<256x1xi1> to vector<256x1xi1>
    %76 = vector.broadcast %75 : vector<256x1xi1> to vector<256x32xi1>
    %77 = vector.broadcast %cst_57 : f32 to vector<256x32xf32>
    %78 = arith.select %76, %45, %77 : vector<256x32xi1>, vector<256x32xf32>
    %79 = arith.addf %50, %78 : vector<256x32xf32>
    %c15_i32 = arith.constant 15 : i32
    %80 = vector.broadcast %c15_i32 : i32 to vector<256x1xi32>
    %81 = arith.cmpi ne, %72, %80 : vector<256x1xi32>
    %cst_58 = arith.constant 0.000000e+00 : f32
    %82 = vector.shape_cast %81 : vector<256x1xi1> to vector<256x1xi1>
    %83 = vector.broadcast %82 : vector<256x1xi1> to vector<256x32xi1>
    %84 = vector.broadcast %cst_58 : f32 to vector<256x32xf32>
    %85 = arith.select %83, %55, %84 : vector<256x32xi1>, vector<256x32xf32>
    %86 = arith.addf %79, %85 : vector<256x32xf32>
    %c0_59 = arith.constant 0 : index
    %c0_60 = arith.constant 0 : index
    %87 = vector.load %arg5[%c0_59, %c0_60] : memref<1x32xf32, #tpu.memory_space<vmem>>, vector<1x32xf32>
    %88 = vector.broadcast %87 : vector<1x32xf32> to vector<256x32xf32>
    %89 = arith.addf %86, %88 : vector<256x32xf32>
    %cst_61 = arith.constant 0.000000e+00 : f32
    %90 = vector.broadcast %cst_61 : f32 to vector<256x32xf32>
    %91 = arith.maximumf %89, %90 : vector<256x32xf32>
    %92 = arith.truncf %91 : vector<256x32xf32> to vector<256x32xbf16>
    %c0_62 = arith.constant 0 : index
    %c0_63 = arith.constant 0 : index
    %93 = vector.load %arg6[%c0_62, %c0_63] : memref<32x16xbf16, #tpu.memory_space<vmem>>, vector<32x16xbf16>
    %cst_64 = arith.constant dense<0.000000e+00> : vector<256x16xf32>
    %94 = tpu.matmul %92, %93, %cst_64 {dimension_numbers = #tpu.dot_dimension_numbers<[1], [0], [0], [1], [0, 0, 1, 1], [], []>} : vector<256x32xbf16>, vector<32x16xbf16>, vector<256x16xf32> -> vector<256x16xf32>
    %c0_65 = arith.constant 0 : index
    %c0_66 = arith.constant 0 : index
    %c0_67 = arith.constant 0 : index
    %95 = vector.load %arg7[%c0_65, %c0_66, %c0_67] : memref<1x256x16xf32, #tpu.memory_space<vmem>>, vector<1x256x16xf32>
    %96 = vector.shape_cast %95 : vector<1x256x16xf32> to vector<256x16xf32>
    %97 = vector.shape_cast %94 : vector<256x16xf32> to vector<1x256x16xf32>
    tpu.vector_store %arg7[%c0_65, %c0_66, %c0_67], %97 {strides = array<i32>} : memref<1x256x16xf32, #tpu.memory_space<vmem>>, vector<1x256x16xf32>,
    return
  }
  func.func @transform_0(%arg0: i32) -> (i32, i32, i32) {
    %c0_i32 = arith.constant 0 : i32
    %c0_i32_0 = arith.constant 0 : i32
    %c0_i32_1 = arith.constant 0 : i32
    return %arg0, %c0_i32, %c0_i32_0 : i32, i32, i32
  }
  func.func @transform_1(%arg0: i32) -> (i32, i32) {
    %c0_i32 = arith.constant 0 : i32
    %c0_i32_0 = arith.constant 0 : i32
    %c0_i32_1 = arith.constant 0 : i32
    return %c0_i32, %c0_i32_0 : i32, i32
  }
  func.func @transform_2(%arg0: i32) -> (i32, i32) {
    %c0_i32 = arith.constant 0 : i32
    %c0_i32_0 = arith.constant 0 : i32
    %c0_i32_1 = arith.constant 0 : i32
    return %c0_i32, %c0_i32_0 : i32, i32
  }
  func.func @transform_3(%arg0: i32) -> (i32, i32, i32) {
    %c0_i32 = arith.constant 0 : i32
    %c0_i32_0 = arith.constant 0 : i32
    %c0_i32_1 = arith.constant 0 : i32
    %c0_i32_2 = arith.constant 0 : i32
    return %c0_i32, %c0_i32_0, %c0_i32_1 : i32, i32, i32
  }
  func.func @transform_4(%arg0: i32) -> (i32, i32) {
    %c0_i32 = arith.constant 0 : i32
    %c0_i32_0 = arith.constant 0 : i32
    %c0_i32_1 = arith.constant 0 : i32
    return %c0_i32, %c0_i32_0 : i32, i32
  }
  func.func @transform_5(%arg0: i32) -> (i32, i32) {
    %c0_i32 = arith.constant 0 : i32
    %c0_i32_0 = arith.constant 0 : i32
    %c0_i32_1 = arith.constant 0 : i32
    return %c0_i32, %c0_i32_0 : i32, i32
  }
  func.func @transform_6(%arg0: i32) -> (i32, i32, i32) {
    %c0_i32 = arith.constant 0 : i32
    %c0_i32_0 = arith.constant 0 : i32
    %c0_i32_1 = arith.constant 0 : i32
    return %arg0, %c0_i32, %c0_i32_0 : i32, i32, i32
  }
}

</mosaic_0001>

<bundles_post_ra>
// kernel: proj_forward.1
= control target key start
LH: loop header
LB: loop body
LE: loop exit
PB: predicated region body
PF: predicated region fallthrough
CT: control target
= control target key end

     0   :  { %s5239_s21 = smov 0   ;;  %s6906_s0 = inlined_call_operand.vmem [shape: bf16[2,256,32], index: 0, kind: input, shape index: {}]   ;;  %s6907_s1 = inlined_call_operand.vmem [shape: bf16[32,32], index: 1, kind: input, shape index: {}]   ;;  %s6908_s2 = inlined_call_operand.vmem [shape: f32[1,32], index: 2, kind: input, shape index: {}]   ;;  %s6909_s3 = inlined_call_operand.vmem [shape: bf16[9,32,32], index: 3, kind: input, shape index: {}]   ;;  %s6910_s4 = inlined_call_operand.vmem [shape: f32[1,32], index: 4, kind: input, shape index: {}]   ;;  %s6911_s5 = inlined_call_operand.vmem [shape: bf16[32,16], index: 5, kind: input, shape index: {}]   ;;  %s6912_s6 = inlined_call_operand.vmem [shape: f32[2,256,16], index: 6, kind: output, shape index: {}]  }
   0x1 LB: > { %s4422_s22 = sadd.s32 4294967295, %s5201_s21   ;;  %p4426_p0 = scmp.ge.s32.totalorder %s5201_s21, 1  ;;  %s5201_s21 = sphi %s5239_s21, %s16_s21  }
   0x2   : > { %p212_p1 = scmp.lt.s32.totalorder %s5201_s21, 3 }
   0x4   : > { %p213_p2 = pnand %p4426_p0, %p212_p1 }
   0x6   : > { %216 = sbr.rel (%p213_p2) target bundleno = 1269 (0x4f5), region = 44 }
   0xb   : > { %v5060_v0 = vld [vmem:[%s6907_s1 + $0x8] sm:$0xff]  ;;  %p242_p3 = scmp.lt.s32.totalorder %s4422_s22, 1  ;;  %v5059_v1 = vld [vmem:[%s6907_s1] sm:$0xff]  ;;  %vm385_vm0 = vcmask 261120   ;;  %vm590_vm1 = vcmask 253952   ;;  %vm587_vm4 = vcmask 257024  }
   0xc   : > { %440 = vmatpush.bf16.msra.mxu0 %v5060_v0  ;;  %5166 = vmatpush.bf16.msra.mxu3 %v5060_v0  ;;  %vm591_vm2 = vsmask.f32 256  ;;  %v593_v10 = vld [vmem:[#allocation2 + $0x8] sm:$0x1]  ;;  %vm597_vm5 = vsmask.f32 7938 }
   0xd   : > { %s7165_s22 = smov (!%p242_p3, %s4422_s22), 1  ;;  %vm5277_vm3 = vmand %vm590_vm1, %vm591_vm2  ;;  %v5203_v13 = vmov 0   ;;  %v599_v15 = vld [vmem:[#allocation2 + $0x88] sm:$0xf]  ;;  %v5076_v18 = vld [vmem:[%s6909_s3] sm:$0xff]  ;;  %vm2037_vm9 = vcmask 1046528  }
   0xe   : > { %s5041_s27 = sshll.u32 %s7165_s22, 7  ;;  %v594_v12 = vsel %vm5277_vm3, 0, %v593_v10  ;;  %588 = vst.msk [vmem:[#allocation2] sm:$0xf] %vm587_vm4, %v5203_v13  ;;  %vm5287_vm6 = vmand %vm587_vm4, %vm597_vm5  ;;  %v5077_v17 = vld [vmem:[%s6909_s3 + $0x8] sm:$0xff]  ;;  %v5084_v22 = vld [vmem:[%s6909_s3 + $0x38] sm:$0xff] }
   0xf   : > { %s5259_s30 = scalar_lea.vmem %s6906_s0, %s5041_s27  ;;  %595 = vst [vmem:[#allocation2 + $0x8] sm:$0x1] %v594_v12  ;;  %v600_v16 = vsel %vm5287_vm6, 0, %v599_v15  ;;  %1274 = vmatpush.bf16.msra.mxu2 %v5077_v17  ;;  %1165 = vmatpush.bf16.msra.mxu1 %v5084_v22  ;;  %v5083_v23 = vld [vmem:[%s6909_s3 + $0x30] sm:$0xff]  ;;  %v5319_v24 = vld [vmem:[%s6908_s2] ss:$0 sm:$0xff] }
  0x10   : > { %441 = vmatpush.bf16.msra.mxu0 %v5059_v1  ;;  %v5043_v2 = vld [vmem:[%s5259_s30] sm:$0xff]  ;;  %5167 = vmatpush.bf16.msra.mxu3 %v5059_v1  ;;  %v5044_v3 = vld [vmem:[%s5259_s30 + $0x8] sm:$0xff]  ;;  %v5045_v4 = vld [vmem:[%s5259_s30 + $0x10] sm:$0xff]  ;;  %589 = vst.msk [vmem:[#allocation2 + $0x4] sm:$0xf] %vm587_vm4, %v5203_v13  ;;  %s5042_s9 = sshll.u32 %s7165_s22, 8 }
  0x11   : > { %v5046_v5 = vld [vmem:[%s5259_s30 + $0x18] sm:$0xff]  ;;  %v5047_v6 = vld [vmem:[%s5259_s30 + $0x20] sm:$0xff]  ;;  %v5048_v7 = vld [vmem:[%s5259_s30 + $0x28] sm:$0xff]  ;;  %601 = vst [vmem:[#allocation2 + $0x88] sm:$0xf] %v600_v16  ;;  %s6747_s12 = scalar_lea.vmem %s6912_s6, %s5042_s9 }
  0x12   : > { %v5049_v8 = vld [vmem:[%s5259_s30 + $0x30] sm:$0xff]  ;;  %v5055_v11 = vld [vmem:[%s5259_s30 + $0x60] sm:$0xff]  ;;  %602 = vst.msk [vmem:[#allocation2 + $0x8c] sm:$0xf] %vm587_vm4, %v5203_v13  ;;  %v5050_v20 = vld [vmem:[%s5259_s30 + $0x38] sm:$0xff] }
  0x13   : > { %4503 = vmatmul.msk.bf16.vlgmr.msra.gmra.mxu0 %vm385_vm0, %v5043_v2  ;;  %4515 = vmatmul.msk.bf16.vlgmr.msra.gmra.mxu3 %vm385_vm0, %v5055_v11  ;;  %604 = vst.msk [vmem:[#allocation2 + $0x90] sm:$0x1] %vm590_vm1, %v5203_v13  ;;  %v5056_v21 = vld [vmem:[%s5259_s30 + $0x68] sm:$0xff]  ;;  %v5051_v25 = vld [vmem:[%s5259_s30 + $0x40] sm:$0xff]  ;;  %v5057_v29 = vld [vmem:[%s5259_s30 + $0x70] sm:$0xff] }
  0x14   : > { %1275 = vmatpush.bf16.msra.mxu2 %v5076_v18  ;;  %5168 = vmatpush.bf16.msrb.mxu3 %v5084_v22  ;;  %vm605_vm7 = vsmask.f32 4368  ;;  %v5052_v42 = vld [vmem:[%s5259_s30 + $0x48] sm:$0xff]  ;;  %v5058_v51 = vld [vmem:[%s5259_s30 + $0x78] sm:$0xff]  ;;  %v5078_v2 = vld [vmem:[%s6909_s3 + $0x10] sm:$0xff] }
  0x15   : > { %1166 = vmatpush.bf16.msra.mxu1 %v5083_v23  ;;  %vm5332_vm8 = vmor %vm591_vm2, %vm605_vm7  ;;  %v5079_v59 = vld [vmem:[%s6909_s3 + $0x18] sm:$0xff]  ;;  %vm1478_vm10 = vsmask.f32 7424 }
  0x16   : > { %v927_v36 = vld [vmem:[#allocation2 + $0x8] sm:$0xf]  ;;  %1945 = vmatpush.bf16.msrb.mxu0 %v5079_v59 }
  0x17   : > { %v5302_v19 = vld [vmem:[#allocation2] sm:$0xff]  }
  0x18   : > { %4627 = vmatmul.msk.bf16.vlgmr.msra.gmra.mxu2 %vm385_vm0, %v5302_v19  ;;  %5169 = vmatpush.bf16.msrb.mxu3 %v5083_v23 }
  0x1a   : > { %1946 = vmatpush.bf16.msrb.mxu0 %v5078_v2 }
  0x1c   : > { %5170 = vmatpush.bf16.msra.mxu3 %v5077_v17 }
  0x20   : > { %5171 = vmatpush.bf16.msra.mxu3 %v5076_v18 }
  0x23   : > { %4504 = vmatmul.msk.bf16.gmra.mxu0 %vm385_vm0, %v5044_v3  ;;  %4516 = vmatmul.msk.bf16.gmra.mxu3 %vm385_vm0, %v5056_v21 }
  0x33   : > { %4505 = vmatmul.msk.bf16.gmra.mxu0 %vm385_vm0, %v5045_v4  ;;  %4517 = vmatmul.msk.bf16.gmra.mxu3 %vm385_vm0, %v5057_v29  ;;  %v5053_v4 = vld [vmem:[%s5259_s30 + $0x50] sm:$0xff]  ;;  %v5054_v29 = vld [vmem:[%s5259_s30 + $0x58] sm:$0xff] }
  0x43   : > { %4506 = vmatmul.msk.bf16.gmra.mxu0 %vm385_vm0, %v5046_v5  ;;  %4518 = vmatmul.msk.bf16.gmra.mxu3 %vm385_vm0, %v5058_v51 }
  0x53   : > { %4507 = vmatmul.msk.bf16.gmra.mxu0 %vm385_vm0, %v5047_v6 }
  0x63   : > { %4508 = vmatmul.msk.bf16.gmra.mxu0 %vm385_vm0, %v5048_v7 }
  0x73   : > { %4509 = vmatmul.msk.bf16.gmra.mxu0 %vm385_vm0, %v5049_v8 }
  0x83   : > { %4510 = vmatmul.msk.bf16.gmra.mxu0 %vm385_vm0, %v5050_v20 }
  0x90   : > { %v443_v26 = vpop.f32.mrf.mxu0 }
  0x91   : > { %v444_v27 = vadd.f32 %v5319_v24, %v443_v26 }
  0x93   : > { %v523_v28 = vmax.f32 %v444_v27, 0.0  ;;  %4511 = vmatmul.msk.bf16.gmra.mxu0 %vm385_vm0, %v5051_v25 }
  0x95   : > { %v555_v30 = vpack.c.bf16 %v523_v28, %v523_v28 }
  0x97   : > { %v608_v31 = vshrl.u32 %v555_v30, 16  ;;  %v611_v34 = vshll.u32 %v555_v30, 16 }
  0x98   : > { %v445_v32 = vpop.f32.mrf.mxu0 }
  0x99   : > { %v610_v33 = vrot.slane %v608_v31, 7  ;;  %v446_v35 = vadd.f32 %v5319_v24, %v445_v32 }
  0x9b   : > { %v613_v37 = vor.u32 %v611_v34, %v610_v33  ;;  %v524_v38 = vmax.f32 %v446_v35, 0.0  ;;  %v614_v48 = vrot.slane %v610_v33, 4 }
  0x9d   : > { %v928_v39 = vsel %vm5287_vm6, %v613_v37, %v927_v36  ;;  %v556_v40 = vpack.c.bf16 %v524_v38, %v524_v38 }
  0x9e   : > { %929 = vst [vmem:[#allocation2 + $0x8] sm:$0xf] %v928_v39 }
  0x9f   : > { %v616_v41 = vshrl.u32 %v556_v40, 16  ;;  %v619_v45 = vshll.u32 %v556_v40, 16 }
  0xa0   : > { %v448_v43 = vpop.f32.mrf.mxu0 }
  0xa1   : > { %v618_v44 = vrot.slane %v616_v41, 7  ;;  %v449_v46 = vadd.f32 %v5319_v24, %v448_v43 }
  0xa3   : > { %v621_v49 = vor.u32 %v619_v45, %v618_v44  ;;  %v525_v50 = vmax.f32 %v449_v46, 0.0  ;;  %4512 = vmatmul.msk.bf16.gmra.mxu0 %vm385_vm0, %v5052_v42  ;;  %v623_v60 = vrot.slane %v618_v44, 4  ;;  %v1765_v42 = vshll.u32 %v5302_v19, 16 }
  0xa5   : > { %v622_v52 = vsel %vm5332_vm8, %v614_v48, %v621_v49  ;;  %v557_v53 = vpack.c.bf16 %v525_v50, %v525_v50  ;;  %v1763_v50 = vshrl.u32 %v5302_v19, 16  ;;  %v1767_v51 = vrot.slane %v1765_v42, 1 }
  0xa6   : > { %930 = vst.msk [vmem:[#allocation2 + $0xc] sm:$0xf] %vm587_vm4, %v622_v52 }
  0xa7   : > { %v625_v54 = vshrl.u32 %v557_v53, 16  ;;  %v628_v57 = vshll.u32 %v557_v53, 16 }
  0xa8   : > { %v450_v55 = vpop.f32.mrf.mxu0 }
  0xa9   : > { %v627_v56 = vrot.slane %v625_v54, 7  ;;  %v451_v58 = vadd.f32 %v5319_v24, %v450_v55 }
  0xab   : > { %v630_v61 = vor.u32 %v628_v57, %v627_v56  ;;  %v526_v62 = vmax.f32 %v451_v58, 0.0  ;;  %v632_v10 = vrot.slane %v627_v56, 4 }
  0xad   : > { %v631_v63 = vsel %vm5332_vm8, %v623_v60, %v630_v61  ;;  %v558_v0 = vpack.c.bf16 %v526_v62, %v526_v62  ;;  %v5348_v1 = vld [vmem:[#allocation2 + $0x8] sm:$0xff]  ;;  %v1768_v61 = vor.u32 %v1767_v51, %v1763_v50 }
  0xae   : > { %931 = vst.msk [vmem:[#allocation2 + $0x10] sm:$0xf] %vm587_vm4, %v631_v63  ;;  %4603 = vmatmul.msk.bf16.vlgmr.msra.gmra.mxu1 %vm385_vm0, %v5348_v1  ;;  %4628 = vmatmul.msk.bf16.gmra.mxu2 %vm385_vm0, %v5348_v1  ;;  %v6914_v31 = vrot.slane %v5348_v1, 1  ;;  %v1769_v52 = vshll.u32 %v5348_v1, 16 }
  0xaf   : > { %v634_v3 = vshrl.u32 %v558_v0, 16  ;;  %v637_v7 = vshll.u32 %v558_v0, 16 }
  0xb0   : > { %v453_v5 = vpop.f32.mrf.mxu0  ;;  %v1771_v62 = vrot.slane %v1769_v52, 1 }
  0xb1   : > { %v636_v6 = vrot.slane %v634_v3, 7  ;;  %v454_v8 = vadd.f32 %v5319_v24, %v453_v5 }
  0xb3   : > { %v639_v11 = vor.u32 %v637_v7, %v636_v6  ;;  %v527_v12 = vmax.f32 %v454_v8, 0.0  ;;  %4513 = vmatmul.msk.bf16.gmra.mxu0 %vm385_vm0, %v5053_v4  ;;  %v641_v21 = vrot.slane %v636_v6, 4  ;;  %v1772_v7 = vsel %vm1478_vm10, %v1768_v61, %v1771_v62 }
  0xb5   : > { %v640_v13 = vsel %vm5332_vm8, %v632_v10, %v639_v11  ;;  %v559_v14 = vpack.c.bf16 %v527_v12, %v527_v12 }
  0xb6   : > { %932 = vst.msk [vmem:[#allocation2 + $0x14] sm:$0xf] %vm587_vm4, %v640_v13 }
  0xb7   : > { %v643_v15 = vshrl.u32 %v559_v14, 16  ;;  %v646_v18 = vshll.u32 %v559_v14, 16 }
  0xb8   : > { %v455_v16 = vpop.f32.mrf.mxu0 }
  0xb9   : > { %v645_v17 = vrot.slane %v643_v15, 7  ;;  %v456_v20 = vadd.f32 %v5319_v24, %v455_v16 }
  0xbb   : > { %v648_v22 = vor.u32 %v646_v18, %v645_v17  ;;  %v528_v23 = vmax.f32 %v456_v20, 0.0  ;;  %v650_v37 = vrot.slane %v645_v17, 4 }
  0xbd   : > { %v649_v25 = vsel %vm5332_vm8, %v641_v21, %v648_v22  ;;  %v560_v26 = vpack.c.bf16 %v528_v23, %v528_v23  ;;  %v5367_v27 = vld [vmem:[#allocation2 + $0x10] sm:$0xff] }
  0xbe   : > { %933 = vst.msk [vmem:[#allocation2 + $0x18] sm:$0xf] %vm587_vm4, %v649_v25  ;;  %4604 = vmatmul.msk.bf16.gmra.mxu1 %vm385_vm0, %v5367_v27  ;;  %4629 = vmatmul.msk.bf16.gmra.mxu2 %vm385_vm0, %v5367_v27  ;;  %v2226_v32 = vrot.slane %v5367_v27, 1  ;;  %v5085_v45 = vld [vmem:[#allocation2 + $0x10] sm:$0xff] }
  0xbf   : > { %v652_v28 = vshrl.u32 %v560_v26, 16  ;;  %v655_v34 = vshll.u32 %v560_v26, 16  ;;  %v1487_v56 = vshll.u32 %v5085_v45, 16  ;;  %v1491_v10 = vshrl.u32 %v5085_v45, 16 }
  0xc0   : > { %v458_v30 = vpop.f32.mrf.mxu0  ;;  %v5381_v36 = vsel %vm2037_vm9, %v6914_v31, %v2226_v32  ;;  %v1776_v26 = vshll.u32 %v5367_v27, 16 }
  0xc1   : > { %v654_v33 = vrot.slane %v652_v28, 7  ;;  %v459_v35 = vadd.f32 %v5319_v24, %v458_v30  ;;  %v5403_v2 = vrot.slane %v1487_v56, 1 }
  0xc3   : > { %v657_v38 = vor.u32 %v655_v34, %v654_v33  ;;  %v529_v39 = vmax.f32 %v459_v35, 0.0  ;;  %4514 = vmatmul.msk.bf16.gmra.mxu0 %vm385_vm0, %v5054_v29  ;;  %v659_v53 = vrot.slane %v654_v33, 4  ;;  %v1493_v14 = vor.u32 %v1491_v10, %v5403_v2 }
  0xc5   : > { %v658_v40 = vsel %vm5332_vm8, %v650_v37, %v657_v38  ;;  %v561_v41 = vpack.c.bf16 %v529_v39, %v529_v39  ;;  %v1773_v37 = vshrl.u32 %v5348_v1, 16  ;;  %v1778_v38 = vrot.slane %v1776_v26, 1 }
  0xc6   : > { %934 = vst.msk [vmem:[#allocation2 + $0x1c] sm:$0xf] %vm587_vm4, %v658_v40 }
  0xc7   : > { %v661_v43 = vshrl.u32 %v561_v41, 16  ;;  %v664_v48 = vshll.u32 %v561_v41, 16  ;;  %v1775_v41 = vor.u32 %v1773_v37, %v1771_v62 }
  0xc8   : > { %v460_v44 = vpop.f32.mrf.mxu0 }
  0xc9   : > { %v663_v46 = vrot.slane %v661_v43, 7  ;;  %v461_v49 = vadd.f32 %v5319_v24, %v460_v44  ;;  %v1779_v50 = vsel %vm1478_vm10, %v1775_v41, %v1778_v38 }
  0xcb   : > { %v666_v54 = vor.u32 %v664_v48, %v663_v46  ;;  %v530_v55 = vmax.f32 %v461_v49, 0.0  ;;  %v668_v11 = vrot.slane %v663_v46, 4 }
  0xcd   : > { %v667_v57 = vsel %vm5332_vm8, %v659_v53, %v666_v54  ;;  %v562_v58 = vpack.c.bf16 %v530_v55, %v530_v55  ;;  %v5393_v59 = vld [vmem:[#allocation2 + $0x18] sm:$0xff] }
  0xce   : > { %v5395_v60 = vld [vmem:[#allocation2 + $0x18] sm:$0xff]  ;;  %935 = vst.msk [vmem:[#allocation2 + $0x20] sm:$0xf] %vm587_vm4, %v667_v57  ;;  %4605 = vmatmul.msk.bf16.gmra.mxu1 %vm385_vm0, %v5393_v59  ;;  %4630 = vmatmul.msk.bf16.gmra.mxu2 %vm385_vm0, %v5393_v59  ;;  %v2228_v0 = vrot.slane %v5393_v59, 1 }
  0xcf   : > { %v670_v19 = vshrl.u32 %v562_v58, 16  ;;  %v673_v4 = vshll.u32 %v562_v58, 16  ;;  %v1495_v6 = vshll.u32 %v5395_v60, 16  ;;  %v5435_v46 = vld [vmem:[#allocation2 + $0x18] sm:$0xff]  ;;  %v1499_v52 = vshrl.u32 %v5395_v60, 16 }
  0xd0   : > { %v463_v63 = vpop.f32.mrf.mxu0  ;;  %v5409_v8 = vsel %vm2037_vm9, %v2226_v32, %v2228_v0  ;;  %6931 = vst [vmem:[#allocation3_spill] sm:$0xff] %v5435_v46  ;;  %v6913_v62 = vrot.slane %v5435_v46, 1 }
  0xd1   : > { %v672_v3 = vrot.slane %v670_v19, 7  ;;  %v464_v5 = vadd.f32 %v5319_v24, %v463_v63  ;;  %v1497_v15 = vrot.slane %v1495_v6, 1 }
  0xd3   : > { %v675_v12 = vor.u32 %v673_v4, %v672_v3  ;;  %v531_v13 = vmax.f32 %v464_v5, 0.0  ;;  %4739 = vmatmul.msk.bf16.vlgmr.msrb.gmra.mxu0 %vm385_vm0, %v1772_v7  ;;  %v5417_v18 = vsel %vm1478_vm10, %v1493_v14, %v1497_v15  ;;  %v677_v28 = vrot.slane %v672_v3, 4 }
  0xd4   : > { %v1501_v56 = vor.u32 %v1499_v52, %v1497_v15  ;;  %v1783_v7 = vshll.u32 %v5393_v59, 16 }
  0xd5   : > { %v676_v16 = vsel %vm5332_vm8, %v668_v11, %v675_v12  ;;  %v563_v17 = vpack.c.bf16 %v531_v13, %v531_v13 }
  0xd6   : > { %936 = vst.msk [vmem:[#allocation2 + $0x24] sm:$0xf] %vm587_vm4, %v676_v16 }
  0xd7   : > { %v679_v20 = vshrl.u32 %v563_v17, 16  ;;  %v682_v23 = vshll.u32 %v563_v17, 16  ;;  %v1780_v17 = vshrl.u32 %v5367_v27, 16 }
  0xd8   : > { %v465_v21 = vpop.f32.mrf.mxu0 }
  0xd9   : > { %v681_v22 = vrot.slane %v679_v20, 7  ;;  %v466_v25 = vadd.f32 %v5319_v24, %v465_v21  ;;  %v1785_v20 = vrot.slane %v1783_v7, 1 }
  0xdb   : > { %v684_v29 = vor.u32 %v682_v23, %v681_v22  ;;  %v532_v30 = vmax.f32 %v466_v25, 0.0  ;;  %v686_v53 = vrot.slane %v681_v22, 4  ;;  %v1782_v23 = vor.u32 %v1780_v17, %v1778_v38 }
  0xdd   : > { %v685_v32 = vsel %vm5332_vm8, %v677_v28, %v684_v29  ;;  %v564_v33 = vpack.c.bf16 %v532_v30, %v532_v30  ;;  %v5423_v34 = vld [vmem:[#allocation2 + $0x20] sm:$0xff] }
  0xde   : > { %v5425_v35 = vld [vmem:[#allocation2 + $0x20] sm:$0xff]  ;;  %937 = vst.msk [vmem:[#allocation2 + $0x28] sm:$0xf] %vm587_vm4, %v685_v32  ;;  %4606 = vmatmul.msk.bf16.gmra.mxu1 %vm385_vm0, %v5423_v34  ;;  %4631 = vmatmul.msk.bf16.gmra.mxu2 %vm385_vm0, %v5423_v34  ;;  %v2230_v42 = vrot.slane %v5423_v34, 1  ;;  %v1786_v32 = vsel %vm1478_vm10, %v1782_v23, %v1785_v20 }
  0xdf   : > { %v688_v39 = vshrl.u32 %v564_v33, 16  ;;  %v691_v44 = vshll.u32 %v564_v33, 16  ;;  %v5123_v48 = vld [vmem:[#allocation2 + $0x20] sm:$0xff]  ;;  %v1503_v49 = vshll.u32 %v5425_v35, 16  ;;  %v1507_v37 = vshrl.u32 %v5425_v35, 16 }
  0xe0   : > { %v468_v40 = vpop.f32.mrf.mxu0  ;;  %v5440_v51 = vsel %vm2037_vm9, %v2228_v0, %v2230_v42  ;;  %v3149_v19 = vrot.slane %v5123_v48, 1 }
  0xe1   : > { %v690_v43 = vrot.slane %v688_v39, 7  ;;  %v469_v45 = vadd.f32 %v5319_v24, %v468_v40  ;;  %v1505_v57 = vrot.slane %v1503_v49, 1 }
  0xe2   : > { %v5454_v0 = vsel %vm2037_vm9, %v6913_v62, %v3149_v19  ;;  %v961_v62 = vld [vmem:[#allocation2 + $0x88] sm:$0x1] }
  0xe3   : > { %v693_v54 = vor.u32 %v691_v44, %v690_v43  ;;  %v533_v55 = vmax.f32 %v469_v45, 0.0  ;;  %4740 = vmatmul.msk.bf16.gmra.mxu0 %vm385_vm0, %v1779_v50  ;;  %v5449_v63 = vsel %vm1478_vm10, %v1501_v56, %v1505_v57  ;;  %6932 = vst [vmem:[#allocation4_spill] sm:$0xff] %v5454_v0  ;;  %v695_v10 = vrot.slane %v690_v43, 4 }
  0xe4   : > { %v1509_v41 = vor.u32 %v1507_v37, %v1505_v57  ;;  %v1790_v56 = vshll.u32 %v5423_v34, 16 }
  0xe5   : > { %v694_v58 = vsel %vm5332_vm8, %v686_v53, %v693_v54  ;;  %v565_v61 = vpack.c.bf16 %v533_v55, %v533_v55  ;;  %v503_v55 = vpop.f32.mrf.mxu3 }
  0xe6   : > { %938 = vst.msk [vmem:[#allocation2 + $0x2c] sm:$0xf] %vm587_vm4, %v694_v58 }
  0xe7   : > { %v697_v60 = vshrl.u32 %v565_v61, 16  ;;  %v700_v5 = vshll.u32 %v565_v61, 16 }
  0xe8   : > { %v470_v3 = vpop.f32.mrf.mxu0 }
  0xe9   : > { %v699_v4 = vrot.slane %v697_v60, 7  ;;  %v471_v6 = vadd.f32 %v5319_v24, %v470_v3 }
  0xeb   : > { %v702_v11 = vor.u32 %v700_v5, %v699_v4  ;;  %v534_v12 = vmax.f32 %v471_v6, 0.0  ;;  %v704_v39 = vrot.slane %v699_v4, 4  ;;  %v1792_v6 = vrot.slane %v1790_v56, 1 }
  0xed   : > { %v703_v13 = vsel %vm5332_vm8, %v695_v10, %v702_v11  ;;  %v566_v14 = vpack.c.bf16 %v534_v12, %v534_v12  ;;  %v5460_v15 = vld [vmem:[#allocation2 + $0x28] sm:$0xff] }
  0xee   : > { %v5462_v16 = vld [vmem:[#allocation2 + $0x28] sm:$0xff]  ;;  %939 = vst.msk [vmem:[#allocation2 + $0x30] sm:$0xf] %vm587_vm4, %v703_v13  ;;  %4607 = vmatmul.msk.bf16.gmra.mxu1 %vm385_vm0, %v5460_v15  ;;  %4632 = vmatmul.msk.bf16.gmra.mxu2 %vm385_vm0, %v5460_v15  ;;  %v2232_v25 = vrot.slane %v5460_v15, 1 }
  0xef   : > { %v706_v21 = vshrl.u32 %v566_v14, 16  ;;  %v709_v28 = vshll.u32 %v566_v14, 16  ;;  %v5472_v30 = vld [vmem:[#allocation2 + $0x28] sm:$0xff]  ;;  %v1511_v27 = vshll.u32 %v5462_v16, 16 }
  0xf0   : > { %v473_v22 = vpop.f32.mrf.mxu0  ;;  %v5477_v33 = vsel %vm2037_vm9, %v2230_v42, %v2232_v25  ;;  %v3151_v48 = vrot.slane %v5472_v30, 1 }
  0xf1   : > { %v708_v26 = vrot.slane %v706_v21, 7  ;;  %v474_v29 = vadd.f32 %v5319_v24, %v473_v22  ;;  %v1513_v43 = vrot.slane %v1511_v27, 1  ;;  %v505_v21 = vpop.f32.mrf.mxu3 }
  0xf2   : > { %v5489_v35 = vsel %vm2037_vm9, %v3149_v19, %v3151_v48  ;;  %v1787_v19 = vshrl.u32 %v5393_v59, 16 }
  0xf3   : > { %v711_v40 = vor.u32 %v709_v28, %v708_v26  ;;  %v535_v38 = vmax.f32 %v474_v29, 0.0  ;;  %4741 = vmatmul.msk.bf16.gmra.mxu0 %vm385_vm0, %v1786_v32  ;;  %v5486_v42 = vsel %vm1478_vm10, %v1509_v41, %v1513_v43  ;;  %6933 = vst [vmem:[#allocation5_spill] sm:$0xff] %v5489_v35  ;;  %v713_v57 = vrot.slane %v708_v26, 4 }
  0xf4   : > { %v1789_v11 = vor.u32 %v1787_v19, %v1785_v20  ;;  %v1515_v20 = vshrl.u32 %v5462_v16, 16 }
  0xf5   : > { %v712_v44 = vsel %vm5332_vm8, %v704_v39, %v711_v40  ;;  %v567_v45 = vpack.c.bf16 %v535_v38, %v535_v38 }
  0xf6   : > { %940 = vst.msk [vmem:[#allocation2 + $0x34] sm:$0xf] %vm587_vm4, %v712_v44  ;;  %v1793_v23 = vsel %vm1478_vm10, %v1789_v11, %v1792_v6  ;;  %v1517_v27 = vor.u32 %v1515_v20, %v1513_v43 }
  0xf7   : > { %v715_v49 = vshrl.u32 %v567_v45, 16  ;;  %v718_v53 = vshll.u32 %v567_v45, 16 }
  0xf8   : > { %v475_v50 = vpop.f32.mrf.mxu0 }
  0xf9   : > { %v717_v52 = vrot.slane %v715_v49, 7  ;;  %v476_v54 = vadd.f32 %v5319_v24, %v475_v50 }
  0xfb   : > { %v720_v58 = vor.u32 %v718_v53, %v717_v52  ;;  %v536_v61 = vmax.f32 %v476_v54, 0.0  ;;  %v722_v28 = vrot.slane %v717_v52, 4  ;;  %v508_v52 = vpop.f32.mrf.mxu3  ;;  %v1797_v53 = vshll.u32 %v5460_v15, 16 }
  0xfd   : > { %v721_v60 = vsel %vm5332_vm8, %v713_v57, %v720_v58  ;;  %v568_v3 = vpack.c.bf16 %v536_v61, %v536_v61  ;;  %v5495_v4 = vld [vmem:[#allocation2 + $0x30] sm:$0xff] }
  0xfe   : > { %v5497_v5 = vld [vmem:[#allocation2 + $0x30] sm:$0xff]  ;;  %941 = vst.msk [vmem:[#allocation2 + $0x38] sm:$0xf] %vm587_vm4, %v721_v60  ;;  %4608 = vmatmul.msk.bf16.gmra.mxu1 %vm385_vm0, %v5495_v4  ;;  %4633 = vmatmul.msk.bf16.gmra.mxu2 %vm385_vm0, %v5495_v4  ;;  %v2234_v12 = vrot.slane %v5495_v4, 1  ;;  %v1794_v60 = vshrl.u32 %v5423_v34, 16 }
  0xff   : > { %v724_v7 = vshrl.u32 %v568_v3, 16  ;;  %v727_v14 = vshll.u32 %v568_v3, 16  ;;  %v5507_v22 = vld [vmem:[#allocation2 + $0x30] sm:$0xff]  ;;  %v1519_v59 = vshll.u32 %v5497_v5, 16  ;;  %v5544_v3 = vrot.slane %v1797_v53, 1 }
 0x100   : > { %v478_v10 = vpop.f32.mrf.mxu0  ;;  %v5514_v26 = vsel %vm2037_vm9, %v2232_v25, %v2234_v12  ;;  %v3153_v40 = vrot.slane %v5507_v22, 1  ;;  %v504_v25 = vadd.f32 %v5319_v24, %v503_v55  ;;  %v1523_v53 = vshrl.u32 %v5497_v5, 16 }
 0x101   : > { %v726_v13 = vrot.slane %v724_v7, 7  ;;  %v479_v17 = vadd.f32 %v5319_v24, %v478_v10  ;;  %v5518_v32 = vrot.slane %v1519_v59, 1  ;;  %v506_v7 = vadd.f32 %v5319_v24, %v505_v21  ;;  %v5103_v10 = vld [vmem:[%s6909_s3 + $0x58] sm:$0xff] }
 0x102   : > { %v5532_v41 = vsel %vm2037_vm9, %v3151_v48, %v3153_v40  ;;  %v547_v44 = vmax.f32 %v504_v25, 0.0  ;;  %2137 = vmatpush.bf16.msrb.mxu1 %v5103_v10 }
 0x103   : > { %v729_v29 = vor.u32 %v727_v14, %v726_v13  ;;  %v537_v30 = vmax.f32 %v479_v17, 0.0  ;;  %4742 = vmatmul.msk.bf16.gmra.mxu0 %vm385_vm0, %v1793_v23  ;;  %v5527_v16 = vsel %vm1478_vm10, %v1517_v27, %v5518_v32  ;;  %6934 = vst [vmem:[#allocation6_spill] sm:$0xff] %v5532_v41  ;;  %v731_v55 = vrot.slane %v726_v13, 4  ;;  %v510_v21 = vpop.f32.mrf.mxu3 }
 0x104   : > { %v5536_v54 = vpack.c.bf16 %v547_v44, %v547_v44  ;;  %v1796_v14 = vor.u32 %v1794_v60, %v1792_v6  ;;  %v548_v34 = vmax.f32 %v506_v7, 0.0  ;;  %v1525_v10 = vor.u32 %v1523_v53, %v5518_v32 }
 0x105   : > { %v730_v37 = vsel %vm5332_vm8, %v722_v28, %v729_v29  ;;  %v569_v39 = vpack.c.bf16 %v537_v30, %v537_v30 }
 0x106   : > { %942 = vst.msk [vmem:[#allocation2 + $0x3c] sm:$0xf] %vm587_vm4, %v730_v37  ;;  %v823_v19 = vshrl.u32 %v5536_v54, 16  ;;  %v1800_v29 = vsel %vm1478_vm10, %v1796_v14, %v5544_v3  ;;  %v580_v27 = vpack.c.bf16 %v548_v34, %v548_v34 }
 0x107   : > { %v733_v38 = vshrl.u32 %v569_v39, 16  ;;  %v736_v49 = vshll.u32 %v569_v39, 16 }
 0x108   : > { %v480_v43 = vpop.f32.mrf.mxu0  ;;  %v5561_v30 = vrot.slane %v823_v19, 7 }
 0x109   : > { %v735_v45 = vrot.slane %v733_v38, 7  ;;  %v481_v50 = vadd.f32 %v5319_v24, %v480_v43  ;;  %v832_v38 = vshrl.u32 %v580_v27, 16  ;;  %v835_v43 = vshll.u32 %v580_v27, 16 }
 0x10b   : > { %v738_v56 = vor.u32 %v736_v49, %v735_v45  ;;  %v538_v57 = vmax.f32 %v481_v50, 0.0  ;;  %v740_v6 = vrot.slane %v735_v45, 4  ;;  %v513_v34 = vpop.f32.mrf.mxu3 }
 0x10d   : > { %v739_v58 = vsel %vm5332_vm8, %v731_v55, %v738_v56  ;;  %v570_v61 = vpack.c.bf16 %v538_v57, %v538_v57  ;;  %v5540_v48 = vld [vmem:[#allocation2 + $0x38] sm:$0xff]  ;;  %v830_v55 = vrot.slane %v5561_v30, 4  ;;  %v834_v56 = vrot.slane %v832_v38, 7 }
 0x10e   : > { %943 = vst.msk [vmem:[#allocation2 + $0x40] sm:$0xf] %vm587_vm4, %v739_v58  ;;  %4609 = vmatmul.msk.bf16.gmra.mxu1 %vm385_vm0, %v5540_v48  ;;  %4634 = vmatmul.msk.bf16.gmra.mxu2 %vm385_vm0, %v5540_v48  ;;  %v5556_v20 = vld [vmem:[#allocation2 + $0x38] sm:$0xff]  ;;  %v2236_v28 = vrot.slane %v5540_v48, 1  ;;  %v509_v57 = vadd.f32 %v5319_v24, %v508_v52 }
 0x10f   : > { %v742_v11 = vshrl.u32 %v570_v61, 16  ;;  %v745_v59 = vshll.u32 %v570_v61, 16  ;;  %v5563_v37 = vld [vmem:[#allocation2 + $0x38] sm:$0xff]  ;;  %v1527_v45 = vshll.u32 %v5556_v20, 16  ;;  %v837_v19 = vor.u32 %v835_v43, %v834_v56 }
 0x110   : > { %v483_v13 = vpop.f32.mrf.mxu0  ;;  %v5571_v44 = vsel %vm2037_vm9, %v2234_v12, %v2236_v28  ;;  %v3155_v58 = vrot.slane %v5563_v37, 1  ;;  %v1804_v12 = vshll.u32 %v5495_v4, 16  ;;  %v549_v7 = vmax.f32 %v509_v57, 0.0 }
 0x111   : > { %v744_v17 = vrot.slane %v742_v11, 7  ;;  %v484_v23 = vadd.f32 %v5319_v24, %v483_v13  ;;  %v5583_v5 = vrot.slane %v1527_v45, 1  ;;  %v826_v37 = vshll.u32 %v5536_v54, 16 }
 0x112   : > { %v5591_v52 = vsel %vm2037_vm9, %v3153_v40, %v3155_v58 }
 0x113   : > { %v747_v39 = vor.u32 %v745_v59, %v744_v17  ;;  %v539_v25 = vmax.f32 %v484_v23, 0.0  ;;  %4743 = vmatmul.msk.bf16.gmra.mxu0 %vm385_vm0, %v1800_v29  ;;  %6935 = vst [vmem:[#allocation7_spill] sm:$0xff] %v5591_v52  ;;  %v838_v59 = vsel %vm5332_vm8, %v830_v55, %v837_v19  ;;  %v581_v23 = vpack.c.bf16 %v549_v7, %v549_v7  ;;  %v515_v7 = vpop.f32.mrf.mxu3  ;;  %v5184_v52 = vld [vmem:[#allocation2 + $0x10] sm:$0xff] }
 0x114   : > { %v5597_v32 = vsel %vm1478_vm10, %v1525_v10, %v5583_v5  ;;  %v749_v29 = vrot.slane %v744_v17, 4  ;;  %954 = vst.msk [vmem:[#allocation2 + $0x6c] sm:$0xf] %vm587_vm4, %v838_v59  ;;  %v5608_v17 = vpop.f32.mrf.mxu2  ;;  %v516_v59 = vadd.f32 %v5319_v24, %v515_v7  ;;  %v2039_v41 = vrot.slane %v5184_v52, 1 }
 0x115   : > { %v748_v49 = vsel %vm5332_vm8, %v740_v6, %v747_v39  ;;  %v571_v50 = vpack.c.bf16 %v539_v25, %v539_v25  ;;  %v1801_v39 = vshrl.u32 %v5460_v15, 16  ;;  %v5601_v25 = vrot.slane %v1804_v12, 1 }
 0x116   : > { %944 = vst.msk [vmem:[#allocation2 + $0x44] sm:$0xf] %vm587_vm4, %v748_v49  ;;  %v841_v22 = vshrl.u32 %v581_v23, 16  ;;  %v844_v40 = vshll.u32 %v581_v23, 16  ;;  %v511_v15 = vadd.f32 %v5319_v24, %v510_v21 }
 0x117   : > { %v751_v61 = vshrl.u32 %v571_v50, 16  ;;  %v754_v13 = vshll.u32 %v571_v50, 16  ;;  %v839_v50 = vrot.slane %v834_v56, 4  ;;  %v1803_v53 = vor.u32 %v1801_v39, %v5544_v3 }
 0x118   : > { %v485_v60 = vpop.f32.mrf.mxu0  ;;  %v843_v45 = vrot.slane %v841_v22, 7  ;;  %v550_v56 = vmax.f32 %v511_v15, 0.0 }
 0x119   : > { %v753_v11 = vrot.slane %v751_v61, 7  ;;  %v486_v14 = vadd.f32 %v5319_v24, %v485_v60  ;;  %v1807_v61 = vsel %vm1478_vm10, %v1803_v53, %v5601_v25 }
 0x11a   : > { %v846_v12 = vor.u32 %v844_v40, %v843_v45  ;;  %v552_v40 = vmax.f32 %v516_v59, 0.0 }
 0x11b   : > { %v756_v27 = vor.u32 %v754_v13, %v753_v11  ;;  %v540_v6 = vmax.f32 %v486_v14, 0.0  ;;  %v582_v13 = vpack.c.bf16 %v550_v56, %v550_v56  ;;  %v514_v14 = vadd.f32 %v5319_v24, %v513_v34 }
 0x11c   : > { %v847_v10 = vsel %vm5332_vm8, %v839_v50, %v846_v12  ;;  %v758_v23 = vrot.slane %v753_v11, 4  ;;  %v848_v50 = vrot.slane %v843_v45, 4  ;;  %v584_v11 = vpack.c.bf16 %v552_v40, %v552_v40 }
 0x11d   : > { %v757_v38 = vsel %vm5332_vm8, %v749_v29, %v756_v27  ;;  %v572_v43 = vpack.c.bf16 %v540_v6, %v540_v6  ;;  %v5605_v49 = vld [vmem:[#allocation2 + $0x40] sm:$0xff]  ;;  %955 = vst.msk [vmem:[#allocation2 + $0x70] sm:$0xf] %vm587_vm4, %v847_v10  ;;  %v850_v6 = vshrl.u32 %v582_v13, 16  ;;  %v853_v39 = vshll.u32 %v582_v13, 16 }
 0x11e   : > { %945 = vst.msk [vmem:[#allocation2 + $0x48] sm:$0xf] %vm587_vm4, %v757_v38  ;;  %4610 = vmatmul.msk.bf16.gmra.mxu1 %vm385_vm0, %v5605_v49  ;;  %4635 = vmatmul.msk.bf16.gmra.mxu2 %vm385_vm0, %v5605_v49  ;;  %v2238_v21 = vrot.slane %v5605_v49, 1  ;;  %v551_v22 = vmax.f32 %v514_v14, 0.0  ;;  %v1811_v56 = vshll.u32 %v5540_v48, 16  ;;  %v868_v13 = vshrl.u32 %v584_v11, 16  ;;  %v518_v14 = vpop.f32.mrf.mxu3 }
 0x11f   : > { %v760_v55 = vshrl.u32 %v572_v43, 16  ;;  %v763_v19 = vshll.u32 %v572_v43, 16  ;;  %v852_v34 = vrot.slane %v850_v6, 7 }
 0x120   : > { %v488_v57 = vpop.f32.mrf.mxu0  ;;  %v583_v53 = vpack.c.bf16 %v551_v22, %v551_v22  ;;  %v5634_v15 = vsel %vm2037_vm9, %v2236_v28, %v2238_v21  ;;  %v5645_v40 = vrot.slane %v868_v13, 7 }
 0x121   : > { %v762_v60 = vrot.slane %v760_v55, 7  ;;  %v489_v3 = vadd.f32 %v5319_v24, %v488_v57  ;;  %v855_v12 = vor.u32 %v853_v39, %v852_v34  ;;  %v857_v28 = vrot.slane %v852_v34, 4 }
 0x122   : > { %v859_v45 = vshrl.u32 %v583_v53, 16 }
 0x123   : > { %v765_v29 = vor.u32 %v763_v19, %v762_v60  ;;  %v541_v27 = vmax.f32 %v489_v3, 0.0  ;;  %4744 = vmatmul.msk.bf16.gmra.mxu0 %vm385_vm0, %v1807_v61  ;;  %v5636_v61 = vpop.f32.mrf.mxu2  ;;  %v862_v19 = vshll.u32 %v583_v53, 16  ;;  %v856_v59 = vsel %vm5332_vm8, %v848_v50, %v855_v12 }
 0x124   : > { %v767_v6 = vrot.slane %v762_v60, 4  ;;  %956 = vst.msk [vmem:[#allocation2 + $0x74] sm:$0xf] %vm587_vm4, %v856_v59  ;;  %v5648_v53 = vrot.slane %v1811_v56, 1 }
 0x125   : > { %v766_v38 = vsel %vm5332_vm8, %v758_v23, %v765_v29  ;;  %v573_v43 = vpack.c.bf16 %v541_v27, %v541_v27  ;;  %v861_v23 = vrot.slane %v859_v45, 7  ;;  %v871_v29 = vshll.u32 %v584_v11, 16  ;;  %v5642_v27 = vld [vmem:[#allocation2 + $0x40] sm:$0xff] }
 0x126   : > { %946 = vst.msk [vmem:[#allocation2 + $0x4c] sm:$0xf] %vm587_vm4, %v766_v38  ;;  %v1535_v56 = vshll.u32 %v5642_v27, 16  ;;  %v1539_v9 = vshrl.u32 %v5642_v27, 16 }
 0x127   : > { %v769_v55 = vshrl.u32 %v573_v43, 16  ;;  %v772_v7 = vshll.u32 %v573_v43, 16  ;;  %v1808_v43 = vshrl.u32 %v5495_v4, 16  ;;  %v873_v12 = vor.u32 %v871_v29, %v5645_v40 }
 0x128   : > { %v490_v57 = vpop.f32.mrf.mxu0 }
 0x129   : > { %v771_v3 = vrot.slane %v769_v55, 7  ;;  %v491_v10 = vadd.f32 %v5319_v24, %v490_v57  ;;  %v864_v55 = vor.u32 %v862_v19, %v861_v23  ;;  %v866_v57 = vrot.slane %v861_v23, 4 }
 0x12a   : > { %v1810_v45 = vor.u32 %v1808_v43, %v5601_v25  ;;  %v5685_v43 = vrot.slane %v1535_v56, 1 }
 0x12b   : > { %v774_v39 = vor.u32 %v772_v7, %v771_v3  ;;  %v542_v22 = vmax.f32 %v491_v10, 0.0  ;;  %v1168_v38 = vpop.f32.mrf.mxu1  ;;  %v865_v4 = vsel %vm5332_vm8, %v857_v28, %v864_v55  ;;  %v519_v7 = vadd.f32 %v5319_v24, %v518_v14 }
 0x12c   : > { %v5653_v11 = vadd.f32 %v5608_v17, %v1168_v38  ;;  %957 = vst.msk [vmem:[#allocation2 + $0x78] sm:$0xf] %vm587_vm4, %v865_v4  ;;  %v874_v17 = vsel %vm5332_vm8, %v866_v57, %v873_v12  ;;  %v1814_v10 = vsel %vm1478_vm10, %v1810_v45, %v5648_v53  ;;  %v1531_v38 = vshrl.u32 %v5556_v20, 16 }
 0x12d   : > { %v775_v50 = vsel %vm5332_vm8, %v767_v6, %v774_v39  ;;  %v574_v34 = vpack.c.bf16 %v542_v22, %v542_v22  ;;  %v5655_v60 = vld [vmem:[#allocation2 + $0x48] sm:$0xff]  ;;  %958 = vst.msk [vmem:[#allocation2 + $0x7c] sm:$0xf] %vm587_vm4, %v874_v17  ;;  %v553_v29 = vmax.f32 %v519_v7, 0.0  ;;  %v520_v6 = vpop.f32.mrf.mxu3  ;;  %v776_v55 = vrot.slane %v771_v3, 4 }
 0x12e   : > { %6936 = vst [vmem:[#allocation8_spill] sm:$0xff] %v5653_v11  ;;  %4611 = vmatmul.msk.bf16.gmra.mxu1 %vm385_vm0, %v5655_v60  ;;  %4636 = vmatmul.msk.bf16.gmra.mxu2 %vm385_vm0, %v5655_v60  ;;  %v2240_v13 = vrot.slane %v5655_v60, 1  ;;  %v521_v22 = vadd.f32 %v5319_v24, %v520_v6  ;;  %v1533_v4 = vor.u32 %v1531_v38, %v5583_v5 }
 0x12f   : > { %947 = vst.msk [vmem:[#allocation2 + $0x50] sm:$0xf] %vm587_vm4, %v775_v50  ;;  %v778_v19 = vshrl.u32 %v574_v34, 16  ;;  %v781_v28 = vshll.u32 %v574_v34, 16  ;;  %v585_v34 = vpack.c.bf16 %v553_v29, %v553_v29 }
 0x130   : > { %v493_v25 = vpop.f32.mrf.mxu0  ;;  %v5682_v14 = vsel %vm2037_vm9, %v2238_v21, %v2240_v13  ;;  %v554_v45 = vmax.f32 %v521_v22, 0.0  ;;  %v5697_v56 = vsel %vm1478_vm10, %v1533_v4, %v5685_v43 }
 0x131   : > { %v780_v59 = vrot.slane %v778_v19, 7  ;;  %v494_v23 = vadd.f32 %v5319_v24, %v493_v25  ;;  %v1282_v39 = vpop.f32.mrf.mxu2  ;;  %v877_v7 = vshrl.u32 %v585_v34, 16  ;;  %v880_v5 = vshll.u32 %v585_v34, 16 }
 0x132   : > { %v586_v3 = vpack.c.bf16 %v554_v45, %v554_v45 }
 0x133   : > { %v783_v57 = vor.u32 %v781_v28, %v780_v59  ;;  %v543_v50 = vmax.f32 %v494_v23, 0.0  ;;  %4745 = vmatmul.msk.bf16.gmra.mxu0 %vm385_vm0, %v1814_v10  ;;  %v1170_v12 = vpop.f32.mrf.mxu1  ;;  %v875_v10 = vrot.slane %v5645_v40, 4  ;;  %v879_v28 = vrot.slane %v877_v7, 7  ;;  %v5705_v40 = vld [vmem:[#allocation2 + $0x48] sm:$0xff] }
 0x134   : > { %v5692_v21 = vadd.f32 %v5636_v61, %v1170_v12  ;;  %v886_v29 = vshrl.u32 %v586_v3, 16  ;;  %v889_v6 = vshll.u32 %v586_v3, 16  ;;  %v5081_v61 = vld [vmem:[%s6909_s3 + $0x28] sm:$0xff]  ;;  %v1818_v12 = vshll.u32 %v5605_v49, 16  ;;  %v5901_v52 = vld [vmem:[#allocation2 + $0x78] sm:$0xff] }
 0x135   : > { %v784_v19 = vsel %vm5332_vm8, %v776_v55, %v783_v57  ;;  %v575_v17 = vpack.c.bf16 %v543_v50, %v543_v50  ;;  %v882_v57 = vor.u32 %v880_v5, %v879_v28  ;;  %v884_v45 = vrot.slane %v879_v28, 4  ;;  %2322 = vmatpush.bf16.msrb.mxu2 %v5081_v61  ;;  %v5080_v28 = vld [vmem:[%s6909_s3 + $0x20] sm:$0xff]  ;;  %6957 = vst [vmem:[#allocation27_spill] sm:$0xff] %v5901_v52 }
 0x136   : > { %6937 = vst [vmem:[#allocation9_spill] sm:$0xff] %v5692_v21  ;;  %v888_v4 = vrot.slane %v886_v29, 7  ;;  %v785_v34 = vrot.slane %v780_v59, 4  ;;  %v5721_v61 = vrot.slane %v1818_v12, 1 }
 0x137   : > { %948 = vst.msk [vmem:[#allocation2 + $0x54] sm:$0xf] %vm587_vm4, %v784_v19  ;;  %v787_v25 = vshrl.u32 %v575_v17, 16  ;;  %v790_v38 = vshll.u32 %v575_v17, 16  ;;  %v883_v3 = vsel %vm5332_vm8, %v875_v10, %v882_v57  ;;  %v1815_v10 = vshrl.u32 %v5540_v48, 16 }
 0x138   : > { %v495_v23 = vpop.f32.mrf.mxu0  ;;  %959 = vst.msk [vmem:[#allocation2 + $0x80] sm:$0xf] %vm587_vm4, %v883_v3  ;;  %v893_v17 = vrot.slane %v888_v4, 4 }
 0x139   : > { %v789_v22 = vrot.slane %v787_v25, 7  ;;  %v496_v55 = vadd.f32 %v5319_v24, %v495_v23  ;;  %v1284_v50 = vpop.f32.mrf.mxu2  ;;  %v891_v24 = vor.u32 %v889_v6, %v888_v4  ;;  %2323 = vmatpush.bf16.msrb.mxu2 %v5080_v28  ;;  %v5183_v4 = vld [vmem:[%s6908_s2] ss:$0 sm:$0xff] }
 0x13b   : > { %v792_v19 = vor.u32 %v790_v38, %v789_v22  ;;  %v544_v7 = vmax.f32 %v496_v55, 0.0  ;;  %v1173_v25 = vpop.f32.mrf.mxu1  ;;  %v892_v6 = vsel %vm5332_vm8, %v884_v45, %v891_v24  ;;  %v962_v38 = vsel %vm5277_vm3, %v893_v17, %v961_v62 }
 0x13c   : > { %v5715_v59 = vadd.f32 %v1282_v39, %v1173_v25  ;;  %v1543_v55 = vshll.u32 %v5705_v40, 16  ;;  %960 = vst.msk [vmem:[#allocation2 + $0x84] sm:$0xf] %vm587_vm4, %v892_v6  ;;  %v1817_v39 = vor.u32 %v1815_v10, %v5648_v53  ;;  %v1541_v25 = vor.u32 %v1539_v9, %v5685_v43  ;;  %v5752_v10 = vld [vmem:[#allocation2 + $0x40] sm:$0xff]  ;;  %v5762_v43 = vld [vmem:[#allocation2 + $0x48] sm:$0xff] }
 0x13d   : > { %v793_v5 = vsel %vm5332_vm8, %v785_v34, %v792_v19  ;;  %v576_v23 = vpack.c.bf16 %v544_v7, %v544_v7  ;;  %963 = vst [vmem:[#allocation2 + $0x88] sm:$0x1] %v962_v38  ;;  %v794_v17 = vrot.slane %v789_v22, 4  ;;  %v1547_v38 = vshrl.u32 %v5705_v40, 16 }
 0x13e   : > { %6938 = vst [vmem:[#allocation10_spill] sm:$0xff] %v5715_v59  ;;  %v5717_v29 = vld [vmem:[#allocation2 + $0x50] sm:$0xff]  ;;  %v1821_v3 = vsel %vm1478_vm10, %v1817_v39, %v5721_v61  ;;  %v1545_v24 = vrot.slane %v1543_v55, 1 }
 0x13f   : > { %949 = vst.msk [vmem:[#allocation2 + $0x58] sm:$0xf] %vm587_vm4, %v793_v5  ;;  %v796_v57 = vshrl.u32 %v576_v23, 16  ;;  %4612 = vmatmul.msk.bf16.gmra.mxu1 %vm385_vm0, %v5717_v29  ;;  %4637 = vmatmul.msk.bf16.gmra.mxu2 %vm385_vm0, %v5717_v29  ;;  %v6915_v12 = vrot.slane %v5717_v29, 1  ;;  %v799_v45 = vshll.u32 %v576_v23, 16  ;;  %v5739_v19 = vld [vmem:[#allocation2 + $0x50] sm:$0xff] }
 0x140   : > { %v498_v48 = vpop.f32.mrf.mxu0  ;;  %v5755_v6 = vsel %vm1478_vm10, %v1541_v25, %v1545_v24  ;;  %v1551_v22 = vshll.u32 %v5739_v19, 16  ;;  %v1549_v39 = vor.u32 %v1547_v38, %v1545_v24 }
 0x141   : > { %v798_v62 = vrot.slane %v796_v57, 7  ;;  %v499_v34 = vadd.f32 %v5183_v4, %v498_v48  ;;  %v1287_v7 = vpop.f32.mrf.mxu2  ;;  %v5748_v53 = vsel %vm2037_vm9, %v2240_v13, %v6915_v12 }
 0x142   : > { %v1553_v9 = vrot.slane %v1551_v22, 1 }
 0x143   : > { %v801_v28 = vor.u32 %v799_v45, %v798_v62  ;;  %v545_v5 = vmax.f32 %v499_v34, 0.0  ;;  %4746 = vmatmul.msk.bf16.gmra.mxu0 %vm385_vm0, %v1821_v3  ;;  %v1175_v23 = vpop.f32.mrf.mxu1  ;;  %v3157_v3 = vrot.slane %v5752_v10, 1 }
 0x144   : > { %v5760_v48 = vadd.f32 %v1284_v50, %v1175_v23  ;;  %v3159_v50 = vrot.slane %v5762_v43, 1  ;;  %v803_v23 = vrot.slane %v798_v62, 4 }
 0x145   : > { %v802_v13 = vsel %vm5332_vm8, %v794_v17, %v801_v28  ;;  %v577_v57 = vpack.c.bf16 %v545_v5, %v545_v5  ;;  %v5768_v17 = vsel %vm1478_vm10, %v1549_v39, %v1553_v9  ;;  %v1825_v5 = vshll.u32 %v5655_v60, 16 }
 0x146   : > { %6939 = vst [vmem:[#allocation11_spill] sm:$0xff] %v5760_v48  ;;  %v5775_v24 = vsel %vm2037_vm9, %v3155_v58, %v3157_v3  ;;  %v1822_v58 = vshrl.u32 %v5605_v49, 16 }
 0x147   : > { %950 = vst.msk [vmem:[#allocation2 + $0x5c] sm:$0xf] %vm587_vm4, %v802_v13  ;;  %v805_v55 = vshrl.u32 %v577_v57, 16  ;;  %v808_v45 = vshll.u32 %v577_v57, 16 }
 0x148   : > { %v500_v34 = vpop.f32.mrf.mxu0  ;;  %6940 = vst [vmem:[#allocation12_spill] sm:$0xff] %v5775_v24 }
 0x149   : > { %v807_v25 = vrot.slane %v805_v55, 7  ;;  %v501_v31 = vadd.f32 %v5183_v4, %v500_v34  ;;  %v1289_v28 = vpop.f32.mrf.mxu2  ;;  %v5102_v4 = vld [vmem:[%s6909_s3 + $0x50] sm:$0xff] }
 0x14a   : > { %2138 = vmatpush.bf16.msrb.mxu1 %v5102_v4 }
 0x14b   : > { %v810_v12 = vor.u32 %v808_v45, %v807_v25  ;;  %v546_v13 = vmax.f32 %v501_v31, 0.0  ;;  %v1178_v38 = vpop.f32.mrf.mxu1  ;;  %v5789_v31 = vsel %vm2037_vm9, %v3157_v3, %v3159_v50  ;;  %v1827_v45 = vrot.slane %v1825_v5, 1 }
 0x14c   : > { %v5782_v55 = vadd.f32 %v1287_v7, %v1178_v38  ;;  %6942 = vst [vmem:[#allocation14_spill] sm:$0xff] %v5789_v31  ;;  %v1824_v3 = vor.u32 %v1822_v58, %v5721_v61  ;;  %v828_v5 = vor.u32 %v826_v37, %v5561_v30  ;;  %v5814_v61 = vld [vmem:[#allocation2 + $0x70] sm:$0xff]  ;;  %v1555_v58 = vshrl.u32 %v5739_v19, 16  ;;  %v5160_v30 = vld [vmem:[#allocation2] sm:$0xe]  ;;  %v5818_v37 = vld [vmem:[#allocation2 + $0x78] sm:$0xff] }
 0x14d   : > { %v811_v57 = vsel %vm5332_vm8, %v803_v23, %v810_v12  ;;  %v578_v22 = vpack.c.bf16 %v546_v13, %v546_v13  ;;  %v5798_v12 = vld [vmem:[#allocation2 + $0x50] sm:$0xff]  ;;  %v1595_v0 = vshrl.u32 %v5818_v37, 16 }
 0x14e   : > { %6941 = vst [vmem:[#allocation13_spill] sm:$0xff] %v5782_v55  ;;  %v5784_v39 = vld [vmem:[#allocation2 + $0x58] sm:$0xff]  ;;  %v1828_v4 = vsel %vm1478_vm10, %v1824_v3, %v1827_v45  ;;  %v6943_v55 = vrot.slane %v5717_v29, 1  ;;  %v3161_v3 = vrot.slane %v5798_v12, 1  ;;  %v1557_v11 = vor.u32 %v1555_v58, %v1553_v9 }
 0x14f   : > { %v5786_v62 = vld [vmem:[#allocation2 + $0x58] sm:$0xff]  ;;  %951 = vst.msk [vmem:[#allocation2 + $0x60] sm:$0xf] %vm587_vm4, %v811_v57  ;;  %v814_v34 = vshrl.u32 %v578_v22, 16  ;;  %4613 = vmatmul.msk.bf16.gmra.mxu1 %vm385_vm0, %v5784_v39  ;;  %4638 = vmatmul.msk.bf16.gmra.mxu2 %vm385_vm0, %v5784_v39  ;;  %v6916_v54 = vrot.slane %v5784_v39, 1  ;;  %v817_v13 = vshll.u32 %v578_v22, 16 }
 0x150   : > { %v5800_v7 = vpop.f32.mrf.mxu0  ;;  %v1559_v49 = vshll.u32 %v5786_v62, 16  ;;  %v5159_v57 = vld [vmem:[#allocation2] sm:$0xf0]  ;;  %v812_v22 = vrot.slane %v807_v25, 4  ;;  %v5827_v25 = vld [vmem:[#allocation2 + $0x58] sm:$0xff]  ;;  %v1587_v9 = vshrl.u32 %v5814_v61, 16  ;;  %v5838_v47 = vsel %vm2037_vm9, %v3159_v50, %v3161_v3 }
 0x151   : > { %v816_v23 = vrot.slane %v814_v34, 7  ;;  %v1292_v38 = vpop.f32.mrf.mxu2  ;;  %v5812_v48 = vsel %vm2037_vm9, %v6943_v55, %v6916_v54  ;;  %6946 = vst [vmem:[#allocation17_spill] sm:$0xff] %v5838_v47  ;;  %v1832_v58 = vshll.u32 %v5717_v29, 16  ;;  %v1839_v35 = vshll.u32 %v5784_v39, 16 }
 0x152   : > { %v1561_v31 = vrot.slane %v1559_v49, 1  ;;  %v1591_v49 = vshll.u32 %v5818_v37, 16 }
 0x153   : > { %v819_v34 = vor.u32 %v817_v13, %v816_v23  ;;  %v821_v59 = vrot.slane %v816_v23, 4  ;;  %4747 = vmatmul.msk.bf16.gmra.mxu0 %vm385_vm0, %v1828_v4  ;;  %v1180_v21 = vpop.f32.mrf.mxu1  ;;  %v5161_v23 = vor.u32 %v5160_v30, %v5159_v57  ;;  %v1583_v4 = vshll.u32 %v5814_v61, 16 }
 0x154   : > { %v5825_v24 = vadd.f32 %v1289_v28, %v1180_v21  ;;  %v5831_v13 = vsel %vm1478_vm10, %v1557_v11, %v1561_v31  ;;  %v1593_v28 = vrot.slane %v1591_v49, 1 }
 0x155   : > { %v820_v55 = vsel %vm5332_vm8, %v812_v22, %v819_v34  ;;  %v829_v54 = vsel %vm5332_vm8, %v821_v59, %v828_v5  ;;  %6945 = vst [vmem:[#allocation16_spill] sm:$0xff] %v5831_v13  ;;  %v5842_v59 = vrot.slane %v1583_v4, 1  ;;  %v6917_v5 = vrot.slane %v5827_v25, 1 }
 0x156   : > { %6944 = vst [vmem:[#allocation15_spill] sm:$0xff] %v5825_v24  ;;  %v2223_v57 = vrot.slane %v5161_v23, 1  ;;  %v6951_v23 = vrot.slane %v5348_v1, 1  ;;  %v1834_v24 = vrot.slane %v1832_v58, 1 }
 0x157   : > { %952 = vst.msk [vmem:[#allocation2 + $0x64] sm:$0xf] %vm587_vm4, %v820_v55  ;;  %v5850_v22 = vsel %vm2037_vm9, %v3161_v3, %v6917_v5  ;;  %v1563_v5 = vshrl.u32 %v5786_v62, 16 }
 0x158   : > { %953 = vst.msk [vmem:[#allocation2 + $0x68] sm:$0xf] %vm587_vm4, %v829_v54  ;;  %v5840_v21 = vpop.f32.mrf.mxu0  ;;  %v1589_v54 = vor.u32 %v1587_v9, %v5842_v59  ;;  %v2225_v49 = vsel %vm2037_vm9, %v2223_v57, %v6951_v23  ;;  %v1829_v9 = vshrl.u32 %v5655_v60, 16  ;;  %v5156_v60 = vld [vmem:[#allocation2 + $0x8] sm:$0xf0] }
 0x159   : > { %6947 = vst [vmem:[#allocation18_spill] sm:$0xff] %v5840_v21  ;;  %v1294_v11 = vpop.f32.mrf.mxu2  ;;  %v1841_v21 = vrot.slane %v1839_v35, 1  ;;  %v3171_v35 = vrot.slane %v5901_v52, 1 }
 0x15a   : > { %6948 = vst [vmem:[#allocation19_spill] sm:$0xff] %v5850_v22  ;;  %v5853_v34 = vsel %vm1478_vm10, %v1589_v54, %v1593_v28  ;;  %v1831_v3 = vor.u32 %v1829_v9, %v1827_v45  ;;  %v5882_v45 = vld [vmem:[#allocation2 + $0x80] sm:$0xff]  ;;  %v1565_v9 = vor.u32 %v1563_v5, %v1561_v31 }
 0x15b   : > { %v1183_v50 = vpop.f32.mrf.mxu1  ;;  %6949 = vst [vmem:[#allocation20_spill] sm:$0xff] %v5853_v34  ;;  %v1599_v13 = vshll.u32 %v5882_v45, 16 }
 0x15c   : > { %v5855_v30 = vadd.f32 %v1292_v38, %v1183_v50  ;;  %v1835_v1 = vsel %vm1478_vm10, %v1831_v3, %v1834_v24 }
 0x15e   : > { %6950 = vst [vmem:[#allocation21_spill] sm:$0xff] %v5855_v30  ;;  %v5857_v55 = vld [vmem:[#allocation2 + $0x60] sm:$0xff] }
 0x15f   : > { %v5859_v4 = vld [vmem:[#allocation2 + $0x68] sm:$0xff]  ;;  %4614 = vmatmul.msk.bf16.gmra.mxu1 %vm385_vm0, %v5857_v55  ;;  %4791 = vmatmul.msk.bf16.vlgmr.msrb.gmra.mxu2 %vm385_vm0, %v2225_v49  ;;  %v5872_v54 = vld [vmem:[#allocation2 + $0x60] sm:$0xff] }
 0x160   : > { %4615 = vmatmul.msk.bf16.vlgmr.msrb.gmra.mxu3 %vm385_vm0, %v5859_v4  ;;  %v5870_v38 = vpop.f32.mrf.mxu0  ;;  %v5876_v57 = vld [vmem:[#allocation2 + $0x68] sm:$0xff]  ;;  %v1567_v30 = vshll.u32 %v5872_v54, 16  ;;  %v1571_v3 = vshrl.u32 %v5872_v54, 16 }
 0x161   : > { %6952 = vst [vmem:[#allocation22_spill] sm:$0xff] %v5870_v38  ;;  %v1297_v50 = vpop.f32.mrf.mxu2  ;;  %v5157_v49 = vld [vmem:[#allocation2 + $0x8] sm:$0xe]  ;;  %v1579_v31 = vshrl.u32 %v5876_v57, 16 }
 0x162   : > { %v5158_v22 = vor.u32 %v5157_v49, %v5156_v60  ;;  %v1569_v47 = vrot.slane %v1567_v30, 1 }
 0x163   : > { %4748 = vmatmul.msk.bf16.gmra.mxu0 %vm385_vm0, %v1835_v1  ;;  %v1185_v58 = vpop.f32.mrf.mxu1  ;;  %v1575_v1 = vshll.u32 %v5876_v57, 16 }
 0x164   : > { %v5878_v23 = vadd.f32 %v1294_v11, %v1185_v58  ;;  %v5888_v11 = vld [vmem:[#allocation2 + $0x60] sm:$0xff]  ;;  %v5890_v58 = vld [vmem:[#allocation2 + $0x68] sm:$0xff]  ;;  %v1573_v60 = vor.u32 %v1571_v3, %v1569_v47  ;;  %v2038_v30 = vrot.slane %v5158_v22, 1  ;;  %v5905_v3 = vld [vmem:[#allocation2 + $0x70] sm:$0xff] }
 0x165   : > { %v1577_v49 = vrot.slane %v1575_v1, 1  ;;  %v1597_v1 = vor.u32 %v1595_v0, %v1593_v28  ;;  %v3165_v22 = vrot.slane %v5888_v11, 1  ;;  %v6961_v0 = vrot.slane %v5827_v25, 1 }
 0x166   : > { %6953 = vst [vmem:[#allocation23_spill] sm:$0xff] %v5878_v23  ;;  %v5893_v23 = vsel %vm1478_vm10, %v1565_v9, %v1569_v47  ;;  %v2040_v47 = vsel %vm2037_vm9, %v2038_v30, %v2039_v41  ;;  %v5918_v30 = vld [vmem:[#allocation2 + $0x80] sm:$0xff] }
 0x167   : > { %6955 = vst [vmem:[#allocation25_spill] sm:$0xff] %v5893_v23  ;;  %v1581_v38 = vor.u32 %v1579_v31, %v1577_v49  ;;  %v3167_v23 = vrot.slane %v5890_v58, 1  ;;  %v5916_v31 = vld [vmem:[#allocation2 + $0x70] sm:$0xff]  ;;  %v5923_v28 = vsel %vm2037_vm9, %v6961_v0, %v3165_v22 }
 0x168   : > { %v5886_v34 = vpop.f32.mrf.mxu0  ;;  %6960 = vst [vmem:[#allocation30_spill] sm:$0xff] %v5918_v30 }
 0x169   : > { %6954 = vst [vmem:[#allocation24_spill] sm:$0xff] %v5886_v34  ;;  %v1299_v5 = vpop.f32.mrf.mxu2  ;;  %v5899_v34 = vsel %vm1478_vm10, %v1573_v60, %v1577_v49  ;;  %v1836_v60 = vshrl.u32 %v5717_v29, 16  ;;  %v1601_v49 = vrot.slane %v1599_v13, 1  ;;  %v3169_v29 = vrot.slane %v5905_v3, 1 }
 0x16a   : > { %6956 = vst [vmem:[#allocation26_spill] sm:$0xff] %v5899_v34  ;;  %v5914_v34 = vsel %vm1478_vm10, %v1581_v38, %v5842_v59 }
 0x16b   : > { %v1188_v9 = vpop.f32.mrf.mxu1  ;;  %6959 = vst [vmem:[#allocation29_spill] sm:$0xff] %v5914_v34  ;;  %v5933_v13 = vsel %vm1478_vm10, %v1597_v1, %v1601_v49  ;;  %v1838_v38 = vor.u32 %v1836_v60, %v1834_v24  ;;  %v3173_v1 = vrot.slane %v5918_v30, 1  ;;  %v1389_v24 = vld [vmem:[#allocation2 + $0x88] sm:$0x1] }
 0x16c   : > { %v5909_v46 = vadd.f32 %v1297_v50, %v1188_v9  ;;  %6962 = vst [vmem:[#allocation31_spill] sm:$0xff] %v5923_v28  ;;  %v5926_v50 = vsel %vm2037_vm9, %v3165_v22, %v3167_v23  ;;  %v5941_v9 = vsel %vm2037_vm9, %v3167_v23, %v3169_v29  ;;  %v5944_v22 = vsel %vm2037_vm9, %v3169_v29, %v3171_v35  ;;  %v5185_v29 = vld [vmem:[#allocation2 + $0x18] sm:$0xff] }
 0x16d   : > { %6963 = vst [vmem:[#allocation32_spill] sm:$0xff] %v5926_v50  ;;  %v1460_v23 = vunpack.c.l.b16 %v1389_v24  ;;  %v1846_v28 = vshll.u32 %v5857_v55, 16 }
 0x16e   : > { %6958 = vst [vmem:[#allocation28_spill] sm:$0xff] %v5909_v46  ;;  %v5950_v46 = vsel %vm2037_vm9, %v3171_v35, %v3173_v1  ;;  %v5963_v35 = vld [vmem:[#allocation2 + $0x78] sm:$0xff] }
 0x16f   : > { %4767 = vmatmul.msk.bf16.vlgmr.msrb.gmra.mxu1 %vm385_vm0, %v2040_v47  ;;  %4792 = vmatmul.msk.bf16.gmra.mxu2 %vm385_vm0, %v5381_v36  ;;  %6964 = vst [vmem:[#allocation33_spill] sm:$0xff] %v5933_v13  ;;  %v1842_v36 = vsel %vm1478_vm10, %v1838_v38, %v1841_v21  ;;  %v5959_v34 = vpack.c.b16 %v1460_v23, %v1460_v23  ;;  %v5101_v23 = vld [vmem:[%s6909_s3 + $0x48] sm:$0xff] }
 0x170   : > { %4616 = vmatmul.msk.bf16.gmra.mxu3 %vm385_vm0, %v5916_v31  ;;  %v5938_v59 = vpop.f32.mrf.mxu0  ;;  %6965 = vst [vmem:[#allocation34_spill] sm:$0xff] %v5941_v9 }
 0x171   : > { %6966 = vst [vmem:[#allocation35_spill] sm:$0xff] %v5944_v22  ;;  %v1302_v47 = vpop.f32.mrf.mxu2  ;;  %v2041_v22 = vrot.slane %v5185_v29, 1  ;;  %v1607_v29 = vshll.u32 %v5959_v34, 16  ;;  %1677 = vmatpush.bf16.msrb.mxu3 %v5101_v23  ;;  %v1850_v23 = vshrl.u32 %v5857_v55, 16 }
 0x172   : > { %6967 = vst [vmem:[#allocation36_spill] sm:$0xff] %v5950_v46 }
 0x173   : > { %4749 = vmatmul.msk.bf16.gmra.mxu0 %vm385_vm0, %v1842_v36  ;;  %v1190_v0 = vpop.f32.mrf.mxu1  ;;  %v5961_v36 = vld [vmem:[#allocation2 + $0x88] sm:$0xff] }
 0x174   : > { %v5952_v50 = vadd.f32 %v1299_v5, %v1190_v0  ;;  %6971 = vst [vmem:[#allocation40_spill] sm:$0xff] %v5961_v36  ;;  %v2042_v5 = vsel %vm2037_vm9, %v2039_v41, %v2041_v22  ;;  %v1843_v0 = vshrl.u32 %v5784_v39, 16  ;;  %v1603_v41 = vshrl.u32 %v5882_v45, 16 }
 0x176   : > { %6968 = vst [vmem:[#allocation37_spill] sm:$0xff] %v5952_v50  ;;  %v1848_v50 = vrot.slane %v1846_v28, 1  ;;  %v1845_v24 = vor.u32 %v1843_v0, %v1841_v21  ;;  %v3175_v28 = vrot.slane %v5961_v36, 1 }
 0x178   : > { %v5954_v60 = vpop.f32.mrf.mxu0  ;;  %v5983_v21 = vsel %vm2037_vm9, %v3173_v1, %v3175_v28 }
 0x179   : > { %6969 = vst [vmem:[#allocation38_spill] sm:$0xff] %v5954_v60  ;;  %v1304_v9 = vpop.f32.mrf.mxu2  ;;  %v5186_v60 = vld [vmem:[#allocation2 + $0x20] sm:$0xff] }
 0x17a   : > { %v2043_v52 = vrot.slane %v5186_v60, 1 }
 0x17b   : > { %v1193_v38 = vpop.f32.mrf.mxu1 }
 0x17c   : > { %v5957_v13 = vadd.f32 %v1302_v47, %v1193_v38 }
 0x17e   : > { %6970 = vst [vmem:[#allocation39_spill] sm:$0xff] %v5957_v13  ;;  %v1609_v13 = vrot.slane %v1607_v29, 1 }
 0x17f   : > { %4768 = vmatmul.msk.bf16.gmra.mxu1 %vm385_vm0, %v2042_v5  ;;  %4793 = vmatmul.msk.bf16.gmra.mxu2 %vm385_vm0, %v5409_v8  ;;  %v1849_v5 = vsel %vm1478_vm10, %v1845_v24, %v1848_v50  ;;  %v1605_v8 = vor.u32 %v1603_v41, %v1601_v49  ;;  %v1853_v49 = vshll.u32 %v5859_v4, 16  ;;  %v2735_v41 = vld [vmem:[#allocation2 + $0x90] sm:$0x1] }
 0x180   : > { %4617 = vmatmul.msk.bf16.gmra.mxu3 %vm385_vm0, %v5963_v35  ;;  %v5972_v47 = vpop.f32.mrf.mxu0  ;;  %v2806_v1 = vunpack.c.l.b16 %v2735_v41 }
 0x181   : > { %6972 = vst [vmem:[#allocation41_spill] sm:$0xff] %v5972_v47  ;;  %v1307_v38 = vpop.f32.mrf.mxu2  ;;  %v5988_v30 = vsel %vm1478_vm10, %v1605_v8, %v1609_v13  ;;  %v1855_v8 = vrot.slane %v1853_v49, 1  ;;  %v1857_v49 = vshrl.u32 %v5859_v4, 16 }
 0x182   : > { %v6000_v13 = vpack.c.b16 %v2806_v1, %v2806_v1 }
 0x183   : > { %4750 = vmatmul.msk.bf16.gmra.mxu0 %vm385_vm0, %v1849_v5  ;;  %v1195_v0 = vpop.f32.mrf.mxu1  ;;  %v5082_v5 = vld [vmem:[#allocation2 + $0x80] sm:$0xff] }
 0x184   : > { %v5985_v46 = vadd.f32 %v1304_v9, %v1195_v0  ;;  %v2044_v9 = vsel %vm2037_vm9, %v2041_v22, %v2043_v52  ;;  %v1852_v0 = vor.u32 %v1850_v23, %v1848_v50 }
 0x186   : > { %6973 = vst [vmem:[#allocation42_spill] sm:$0xff] %v5985_v46  ;;  %v1856_v41 = vsel %vm1478_vm10, %v1852_v0, %v1855_v8  ;;  %v1860_v46 = vshll.u32 %v5916_v31, 16 }
 0x188   : > { %v5990_v47 = vpop.f32.mrf.mxu0 }
 0x189   : > { %v1309_v36 = vpop.f32.mrf.mxu2 }
 0x18b   : > { %v1198_v24 = vpop.f32.mrf.mxu1 }
 0x18c   : > { %v5994_v29 = vadd.f32 %v1307_v38, %v1198_v24  ;;  %v3177_v38 = vrot.slane %v6000_v13, 1 }
 0x18e   : > { %6974 = vst [vmem:[#allocation43_spill] sm:$0xff] %v5994_v29  ;;  %v6009_v50 = vsel %vm2037_vm9, %v3175_v28, %v3177_v38  ;;  %v1862_v28 = vrot.slane %v1860_v46, 1  ;;  %v5100_v38 = vld [vmem:[%s6909_s3 + $0x40] sm:$0xff]  ;;  %v1864_v46 = vshrl.u32 %v5916_v31, 16 }
 0x18f   : > { %4769 = vmatmul.msk.bf16.gmra.mxu1 %vm385_vm0, %v2044_v9  ;;  %4794 = vmatmul.msk.bf16.gmra.mxu2 %vm385_vm0, %v5440_v51 }
 0x190   : > { %4618 = vmatmul.msk.bf16.gmra.mxu3 %vm385_vm0, %v5082_v5  ;;  %v6003_v60 = vpop.f32.mrf.mxu0  ;;  %v5187_v5 = vld [vmem:[#allocation2 + $0x28] sm:$0xff] }
 0x191   : > { %6975 = vst [vmem:[#allocation44_spill] sm:$0xff] %v6003_v60  ;;  %v1312_v24 = vpop.f32.mrf.mxu2  ;;  %v2045_v9 = vrot.slane %v5187_v5, 1  ;;  %1678 = vmatpush.bf16.msrb.mxu3 %v5100_v38  ;;  %v5188_v5 = vld [vmem:[#allocation2 + $0x30] sm:$0xff] }
 0x193   : > { %4751 = vmatmul.msk.bf16.gmra.mxu0 %vm385_vm0, %v1856_v41  ;;  %v1200_v22 = vpop.f32.mrf.mxu1  ;;  %v2046_v0 = vsel %vm2037_vm9, %v2043_v52, %v2045_v9  ;;  %v1859_v41 = vor.u32 %v1857_v49, %v1855_v8  ;;  %v2047_v49 = vrot.slane %v5188_v5, 1  ;;  %v1000_v5 = vld [vmem:[#allocation2 + $0x80] sm:$0x1] }
 0x194   : > { %v6011_v23 = vadd.f32 %v1309_v36, %v1200_v22 }
 0x196   : > { %6976 = vst [vmem:[#allocation45_spill] sm:$0xff] %v6011_v23  ;;  %v1871_v23 = vshrl.u32 %v5963_v35, 16 }
 0x198   : > { %v6013_v51 = vpop.f32.mrf.mxu0 }
 0x199   : > { %v1314_v1 = vpop.f32.mrf.mxu2 }
 0x19b   : > { %v1203_v29 = vpop.f32.mrf.mxu1 }
 0x19c   : > { %v6017_v60 = vadd.f32 %v1312_v24, %v1203_v29  ;;  %v1863_v24 = vsel %vm1478_vm10, %v1859_v41, %v1862_v28 }
 0x19e   : > { %6977 = vst [vmem:[#allocation46_spill] sm:$0xff] %v6017_v60  ;;  %v5138_v60 = vld [vmem:[%s6909_s3 + $0x78] sm:$0xff] }
 0x19f   : > { %4770 = vmatmul.msk.bf16.gmra.mxu1 %vm385_vm0, %v2046_v0  ;;  %4795 = vmatmul.msk.bf16.gmra.mxu2 %vm385_vm0, %v5477_v33  ;;  %v1867_v0 = vshll.u32 %v5963_v35, 16 }
 0x1a0   : > { %4639 = vmatmul.msk.bf16.vlgmr.msra.gmra.mxu3 %vm385_vm0, %v5857_v55  ;;  %v6025_v36 = vpop.f32.mrf.mxu0  ;;  %3022 = vmatpush.bf16.msra.mxu0 %v5138_v60  ;;  %v5137_v60 = vld [vmem:[%s6909_s3 + $0x70] sm:$0xff] }
 0x1a1   : > { %6978 = vst [vmem:[#allocation47_spill] sm:$0xff] %v6025_v36  ;;  %v1317_v29 = vpop.f32.mrf.mxu2 }
 0x1a3   : > { %4752 = vmatmul.msk.bf16.gmra.mxu0 %vm385_vm0, %v1863_v24  ;;  %v1205_v52 = vpop.f32.mrf.mxu1  ;;  %v1866_v24 = vor.u32 %v1864_v46, %v1862_v28  ;;  %v1761_v28 = vunpack.c.l.b16 %v1000_v5 }
 0x1a4   : > { %v6032_v8 = vadd.f32 %v1314_v1, %v1205_v52  ;;  %v2048_v1 = vsel %vm2037_vm9, %v2045_v9, %v2047_v49  ;;  %v1869_v52 = vrot.slane %v1867_v0, 1  ;;  %3023 = vmatpush.bf16.msra.mxu0 %v5137_v60 }
 0x1a6   : > { %6979 = vst [vmem:[#allocation48_spill] sm:$0xff] %v6032_v8  ;;  %v1870_v9 = vsel %vm1478_vm10, %v1866_v24, %v1869_v52  ;;  %v1873_v60 = vor.u32 %v1871_v23, %v1869_v52 }
 0x1a8   : > { %v6034_v33 = vpop.f32.mrf.mxu0 }
 0x1a9   : > { %6980 = vst [vmem:[#allocation49_spill] sm:$0xff] %v6034_v33  ;;  %v1319_v22 = vpop.f32.mrf.mxu2 }
 0x1ab   : > { %v1208_v41 = vpop.f32.mrf.mxu1 }
 0x1ac   : > { %v6041_v38 = vadd.f32 %v1317_v29, %v1208_v41 }
 0x1ae   : > { %6981 = vst [vmem:[#allocation50_spill] sm:$0xff] %v6041_v38  ;;  %v2049_v38 = vrot.slane %v5556_v20, 1 }
 0x1af   : > { %4771 = vmatmul.msk.bf16.gmra.mxu1 %vm385_vm0, %v2048_v1  ;;  %4796 = vmatmul.msk.bf16.gmra.mxu2 %vm385_vm0, %v5514_v26  ;;  %v6058_v26 = vpack.c.b16 %v1761_v28, %v1761_v28 }
 0x1b0   : > { %4640 = vmatmul.msk.bf16.gmra.mxu3 %vm385_vm0, %v5859_v4  ;;  %v6049_v8 = vpop.f32.mrf.mxu0  ;;  %v2050_v5 = vsel %vm2037_vm9, %v2047_v49, %v2049_v38  ;;  %v5162_v49 = vld [vmem:[#allocation2 + $0x10] sm:$0xff]  }
 0x1b1   : > { %6982 = vst [vmem:[#allocation51_spill] sm:$0xff] %v6049_v8  ;;  %v1322_v29 = vpop.f32.mrf.mxu2  ;;  %v1875_v8 = vshll.u32 %v6058_v26, 16  ;;  %v2827_v28 = vshll.u32 %v5162_v49, 16 }
 0x1b3   : > { %4753 = vmatmul.msk.bf16.gmra.mxu0 %vm385_vm0, %v1870_v9  ;;  %v1210_v46 = vpop.f32.mrf.mxu1  ;;  %v1877_v9 = vrot.slane %v1875_v8, 1 }
 0x1b4   : > { %v6056_v0 = vadd.f32 %v1319_v22, %v1210_v46  ;;  %v5121_v22 = vld [vmem:[%s6909_s3 + $0x68] sm:$0xff] }
 0x1b5   : > { %2588 = vmatpush.bf16.msra.mxu3 %v5121_v22  ;;  %v2829_v22 = vrot.slane %v2827_v28, 1 }
 0x1b6   : > { %6983 = vst [vmem:[#allocation52_spill] sm:$0xff] %v6056_v0 }
 0x1b8   : > { %v6060_v41 = vpop.f32.mrf.mxu0 }
 0x1b9   : > { %6984 = vst [vmem:[#allocation53_spill] sm:$0xff] %v6060_v41  ;;  %v1324_v1 = vpop.f32.mrf.mxu2 }
 0x1bc   : > { %v1213_v33 = vpop.f32.mrf.mxu1 }
 0x1bd   : > { %v6065_v24 = vadd.f32 %v1322_v29, %v1213_v33  ;;  %v1878_v29 = vsel %vm1478_vm10, %v1873_v60, %v1877_v9 }
 0x1bf   : > { %6985 = vst [vmem:[#allocation54_spill] sm:$0xff] %v6065_v24  ;;  %4772 = vmatmul.msk.bf16.gmra.mxu1 %vm385_vm0, %v2050_v5  ;;  %4797 = vmatmul.msk.bf16.gmra.mxu2 %vm385_vm0, %v5571_v44  ;;  %v5140_v44 = vld [vmem:[%s6909_s3 + $0x88] sm:$0xff]  ;;  %v2051_v5 = vrot.slane %v5642_v27, 1  ;;  %v5189_v24 = vld [vmem:[#allocation2 + $0x18] sm:$0xff] }
 0x1c0   : > { %4641 = vmatmul.msk.bf16.gmra.mxu3 %vm385_vm0, %v5916_v31  ;;  %v6073_v20 = vpop.f32.mrf.mxu0  ;;  %3245 = vmatpush.bf16.msra.mxu1 %v5140_v44  ;;  %v2832_v60 = vshll.u32 %v5189_v24, 16 }
 0x1c1   : > { %6986 = vst [vmem:[#allocation55_spill] sm:$0xff] %v6073_v20 }
 0x1c2   : > { %v1327_v33 = vpop.f32.mrf.mxu2 }
 0x1c3   : > { %4754 = vmatmul.msk.bf16.gmra.mxu0 %vm385_vm0, %v1878_v29 }
 0x1c4   : > { %v1215_v23 = vpop.f32.mrf.mxu1 }
 0x1c5   : > { %v6080_v8 = vadd.f32 %v1324_v1, %v1215_v23  ;;  %v2052_v1 = vsel %vm2037_vm9, %v2049_v38, %v2051_v5  ;;  %v2825_v23 = vshrl.u32 %v5162_v49, 16 }
 0x1c7   : > { %6987 = vst [vmem:[#allocation56_spill] sm:$0xff] %v6080_v8  ;;  %v2834_v8 = vrot.slane %v2832_v60, 1  ;;  %v2830_v27 = vor.u32 %v2829_v22, %v2825_v23 }
 0x1c8   : > { %v6085_v52 = vpop.f32.mrf.mxu0 }
 0x1c9   : > { %6988 = vst [vmem:[#allocation57_spill] sm:$0xff] %v6085_v52  ;;  %v2835_v28 = vsel %vm1478_vm10, %v2830_v27, %v2834_v8  ;;  %v5190_v52 = vld [vmem:[#allocation2 + $0x20] sm:$0xff] }
 0x1ca   : > { %v1329_v46 = vpop.f32.mrf.mxu2  ;;  %v2840_v20 = vshll.u32 %v5190_v52, 16 }
 0x1cc   : > { %v1218_v9 = vpop.f32.mrf.mxu1  ;;  %v2842_v36 = vrot.slane %v2840_v20, 1 }
 0x1cd   : > { %v6088_v29 = vadd.f32 %v1327_v33, %v1218_v9  ;;  %v5155_v33 = vld [vmem:[#allocation2 + $0x8] sm:$0xff]  }
 0x1ce   : > { %v1482_v60 = vshll.u32 %v5155_v33, 16 }
 0x1cf   : > { %6989 = vst [vmem:[#allocation58_spill] sm:$0xff] %v6088_v29  ;;  %4773 = vmatmul.msk.bf16.gmra.mxu1 %vm385_vm0, %v2052_v1  ;;  %4798 = vmatmul.msk.bf16.gmra.mxu2 %vm385_vm0, %v5634_v15  ;;  %v2053_v29 = vrot.slane %v5705_v40, 1 }
 0x1d0   : > { %4642 = vmatmul.msk.bf16.gmra.mxu3 %vm385_vm0, %v5963_v35  ;;  %v6096_v44 = vpop.f32.mrf.mxu0  ;;  %v1484_v1 = vrot.slane %v1482_v60, 1 }
 0x1d1   : > { %6990 = vst [vmem:[#allocation59_spill] sm:$0xff] %v6096_v44  ;;  %v1480_v44 = vshrl.u32 %v5155_v33, 16  ;;  %v2054_v41 = vsel %vm2037_vm9, %v2051_v5, %v2053_v29  ;;  %v5191_v5 = vld [vmem:[#allocation2 + $0x28] sm:$0xff] }
 0x1d2   : > { %v1332_v0 = vpop.f32.mrf.mxu2  ;;  %v2848_v60 = vshll.u32 %v5191_v5, 16 }
 0x1d3   : > { %4971 = vmatmul.msk.bf16.vlgmr.msra.gmra.mxu0 %vm385_vm0, %v2835_v28  ;;  %v1485_v27 = vor.u32 %v1484_v1, %v1480_v44  ;;  %v2836_v28 = vshrl.u32 %v5189_v24, 16 }
 0x1d4   : > { %v1220_v38 = vpop.f32.mrf.mxu1 }
 0x1d5   : > { %v6100_v49 = vadd.f32 %v1329_v46, %v1220_v38  ;;  %v1490_v46 = vsel %vm1478_vm10, %v1485_v27, %v5403_v2  ;;  %v2838_v33 = vor.u32 %v2836_v28, %v2834_v8  ;;  %v2844_v28 = vshrl.u32 %v5190_v52, 16 }
 0x1d7   : > { %6991 = vst [vmem:[#allocation60_spill] sm:$0xff] %v6100_v49  ;;  %v2843_v44 = vsel %vm1478_vm10, %v2838_v33, %v2842_v36 }
 0x1d8   : > { %v6102_v9 = vpop.f32.mrf.mxu0 }
 0x1da   : > { %v1334_v15 = vpop.f32.mrf.mxu2 }
 0x1dc   : > { %v1223_v22 = vpop.f32.mrf.mxu1 }
 0x1dd   : > { %v6105_v23 = vadd.f32 %v1332_v0, %v1223_v22 }
 0x1df   : > { %6992 = vst [vmem:[#allocation61_spill] sm:$0xff] %v6105_v23  ;;  %4774 = vmatmul.msk.bf16.gmra.mxu1 %vm385_vm0, %v2054_v41  ;;  %4799 = vmatmul.msk.bf16.gmra.mxu2 %vm385_vm0, %v5682_v14  ;;  %v2055_v14 = vrot.slane %v5739_v19, 1 }
 0x1e0   : > { %4715 = vmatmul.msk.bf16.vlgmr.msrb.gmra.mxu3 %vm385_vm0, %v1490_v46  ;;  %v6114_v40 = vpop.f32.mrf.mxu0  ;;  %v2850_v46 = vrot.slane %v2848_v60, 1 }
 0x1e1   : > { %v2056_v27 = vsel %vm2037_vm9, %v2053_v29, %v2055_v14 }
 0x1e2   : > { %v2325_v0 = vpop.f32.mrf.mxu2 }
 0x1e3   : > { %v6117_v38 = vpop.f32.mrf.mxu3  ;;  %4972 = vmatmul.msk.bf16.gmra.mxu0 %vm385_vm0, %v2843_v44 }
 0x1e4   : > { %v1225_v24 = vpop.f32.mrf.mxu1 }
 0x1e5   : > { %v6120_v20 = vadd.f32 %v1334_v15, %v1225_v24  ;;  %v2846_v15 = vor.u32 %v2844_v28, %v2842_v36 }
 0x1e7   : > { %6993 = vst [vmem:[#allocation62_spill] sm:$0xff] %v6120_v20  ;;  %v2851_v44 = vsel %vm1478_vm10, %v2846_v15, %v2850_v46  ;;  %v2852_v20 = vshrl.u32 %v5191_v5, 16 }
 0x1e8   : > { %v6122_v2 = vpop.f32.mrf.mxu0 }
 0x1e9   : > { %6994 = vst [vmem:[#allocation63_spill] sm:$0xff] %v6122_v2 }
 0x1ea   : > { %v2327_v41 = vpop.f32.mrf.mxu2 }
 0x1eb   : > { %v6125_v1 = vpop.f32.mrf.mxu3 }
 0x1ec   : > { %v2140_v8 = vpop.f32.mrf.mxu1 }
 0x1ed   : > { %v6127_v22 = vadd.f32 %v2325_v0, %v2140_v8  ;;  %v5192_v8 = vld [vmem:[#allocation2 + $0x30] sm:$0xff] }
 0x1ef   : > { %4775 = vmatmul.msk.bf16.gmra.mxu1 %vm385_vm0, %v2056_v27  ;;  %4800 = vmatmul.msk.bf16.gmra.mxu2 %vm385_vm0, %v5748_v53  ;;  %v2057_v53 = vrot.slane %v5786_v62, 1 }
 0x1f0   : > { %4716 = vmatmul.msk.bf16.gmra.mxu3 %vm385_vm0, %v5417_v18  ;;  %v6135_v19 = vpop.f32.mrf.mxu0  ;;  %v2856_v18 = vshll.u32 %v5192_v8, 16 }
 0x1f1   : > { %6995 = vst [vmem:[#allocation64_spill] sm:$0xff] %v6135_v19  ;;  %v2058_v15 = vsel %vm2037_vm9, %v2055_v14, %v2057_v53  ;;  %v7064_v19 = vld [vmem:[#allocation32_spill] sm:$0xff] }
 0x1f2   : > { %v2330_v33 = vpop.f32.mrf.mxu2  ;;  %v2858_v23 = vrot.slane %v2856_v18, 1 }
 0x1f3   : > { %v6138_v0 = vpop.f32.mrf.mxu3  ;;  %4973 = vmatmul.msk.bf16.gmra.mxu0 %vm385_vm0, %v2851_v44 }
 0x1f4   : > { %v2142_v52 = vpop.f32.mrf.mxu1 }
 0x1f5   : > { %v6141_v29 = vadd.f32 %v2327_v41, %v2142_v52  ;;  %v2854_v41 = vor.u32 %v2852_v20, %v2850_v46 }
 0x1f7   : > { %v2859_v52 = vsel %vm1478_vm10, %v2854_v41, %v2858_v23 }
 0x1f8   : > { %v6143_v24 = vpop.f32.mrf.mxu0 }
 0x1f9   : > { %6996 = vst [vmem:[#allocation65_spill] sm:$0xff] %v6143_v24 }
 0x1fa   : > { %v2332_v60 = vpop.f32.mrf.mxu2 }
 0x1fb   : > { %v6146_v27 = vpop.f32.mrf.mxu3 }
 0x1fc   : > { %v2145_v36 = vpop.f32.mrf.mxu1 }
 0x1fd   : > { %v6148_v28 = vadd.f32 %v2330_v33, %v2145_v36 }
 0x1ff   : > { %4776 = vmatmul.msk.bf16.gmra.mxu1 %vm385_vm0, %v2058_v15  ;;  %4801 = vmatmul.msk.bf16.gmra.mxu2 %vm385_vm0, %v5812_v48  ;;  %v2059_v48 = vrot.slane %v5872_v54, 1  ;;  %v5193_v15 = vld [vmem:[#allocation2 + $0x38] sm:$0xff] }
 0x200   : > { %4717 = vmatmul.msk.bf16.gmra.mxu3 %vm385_vm0, %v5449_v63  ;;  %v6156_v62 = vpop.f32.mrf.mxu0  ;;  %v2246_v63 = vrot.slane %v5857_v55, 1 }
 0x201   : > { %6997 = vst [vmem:[#allocation66_spill] sm:$0xff] %v6156_v62  ;;  %v2864_v62 = vshll.u32 %v5193_v15, 16  ;;  %v2060_v49 = vsel %vm2037_vm9, %v2057_v53, %v2059_v48 }
 0x202   : > { %v2335_v44 = vpop.f32.mrf.mxu2 }
 0x203   : > { %v6159_v33 = vpop.f32.mrf.mxu3  ;;  %4974 = vmatmul.msk.bf16.gmra.mxu0 %vm385_vm0, %v2859_v52  ;;  %v6999_v52 = vrot.slane %v5784_v39, 1 }
 0x204   : > { %v2147_v14 = vpop.f32.mrf.mxu1 }
 0x205   : > { %v6162_v5 = vadd.f32 %v2332_v60, %v2147_v14  ;;  %v2247_v60 = vsel %vm2037_vm9, %v6999_v52, %v2246_v63  ;;  %v2860_v14 = vshrl.u32 %v5192_v8, 16  ;;  %v2061_v52 = vrot.slane %v5876_v57, 1 }
 0x207   : > { %v2862_v54 = vor.u32 %v2860_v14, %v2858_v23 }
 0x208   : > { %v6164_v18 = vpop.f32.mrf.mxu0 }
 0x209   : > { %6998 = vst [vmem:[#allocation67_spill] sm:$0xff] %v6164_v18  ;;  %v2866_v18 = vrot.slane %v2864_v62, 1 }
 0x20a   : > { %v2337_v36 = vpop.f32.mrf.mxu2 }
 0x20b   : > { %v6168_v20 = vpop.f32.mrf.mxu3 }
 0x20c   : > { %v2150_v46 = vpop.f32.mrf.mxu1 }
 0x20d   : > { %v6170_v41 = vadd.f32 %v2335_v44, %v2150_v46  ;;  %v2867_v46 = vsel %vm1478_vm10, %v2862_v54, %v2866_v18 }
 0x20f   : > { %4777 = vmatmul.msk.bf16.gmra.mxu1 %vm385_vm0, %v2060_v49  ;;  %4802 = vmatmul.msk.bf16.gmra.mxu2 %vm385_vm0, %v2247_v60  ;;  %v2872_v60 = vshll.u32 %v5752_v10, 16 }
 0x210   : > { %4718 = vmatmul.msk.bf16.gmra.mxu3 %vm385_vm0, %v5486_v42  ;;  %v6180_v55 = vpop.f32.mrf.mxu0  ;;  %v2248_v42 = vrot.slane %v5859_v4, 1 }
 0x211   : > { %7000 = vst [vmem:[#allocation68_spill] sm:$0xff] %v6180_v55  ;;  %v2062_v55 = vsel %vm2037_vm9, %v2059_v48, %v2061_v52 }
 0x212   : > { %v2340_v44 = vpop.f32.mrf.mxu2 }
 0x213   : > { %v6183_v53 = vpop.f32.mrf.mxu3  ;;  %4975 = vmatmul.msk.bf16.gmra.mxu0 %vm385_vm0, %v2867_v46  ;;  %v2249_v46 = vsel %vm2037_vm9, %v2246_v63, %v2248_v42 }
 0x214   : > { %v2152_v39 = vpop.f32.mrf.mxu1 }
 0x215   : > { %v6186_v8 = vadd.f32 %v2337_v36, %v2152_v39  ;;  %v2868_v36 = vshrl.u32 %v5193_v15, 16  ;;  %v2874_v39 = vrot.slane %v2872_v60, 1 }
 0x217   : > { %v2870_v57 = vor.u32 %v2868_v36, %v2866_v18 }
 0x218   : > { %v6188_v62 = vpop.f32.mrf.mxu0 }
 0x219   : > { %7001 = vst [vmem:[#allocation69_spill] sm:$0xff] %v6188_v62 }
 0x21a   : > { %v2342_v49 = vpop.f32.mrf.mxu2 }
 0x21b   : > { %v6193_v23 = vpop.f32.mrf.mxu3 }
 0x21c   : > { %v2155_v14 = vpop.f32.mrf.mxu1 }
 0x21d   : > { %v6195_v54 = vadd.f32 %v2340_v44, %v2155_v14  ;;  %v2875_v44 = vsel %vm1478_vm10, %v2870_v57, %v2874_v39  ;;  %v2063_v57 = vrot.slane %v5814_v61, 1 }
 0x21f   : > { %4778 = vmatmul.msk.bf16.gmra.mxu1 %vm385_vm0, %v2062_v55  ;;  %4803 = vmatmul.msk.bf16.gmra.mxu2 %vm385_vm0, %v2249_v46 }
 0x220   : > { %4719 = vmatmul.msk.bf16.gmra.mxu3 %vm385_vm0, %v5527_v16  ;;  %v6203_v4 = vpop.f32.mrf.mxu0  ;;  %v2880_v16 = vshll.u32 %v5762_v43, 16 }
 0x221   : > { %7002 = vst [vmem:[#allocation70_spill] sm:$0xff] %v6203_v4 }
 0x222   : > { %v2345_v62 = vpop.f32.mrf.mxu2 }
 0x223   : > { %v1337_v14 = vpop.f32.mrf.mxu3  ;;  %4976 = vmatmul.msk.bf16.gmra.mxu0 %vm385_vm0, %v2875_v44  ;;  %v2250_v44 = vrot.slane %v5916_v31, 1 }
 0x224   : > { %v6208_v48 = vadd.f32 %v1337_v14, %v6117_v38  ;;  %v2157_v63 = vpop.f32.mrf.mxu1 }
 0x225   : > { %v6210_v15 = vadd.f32 %v2342_v49, %v2157_v63  ;;  %v2064_v49 = vsel %vm2037_vm9, %v2061_v52, %v2063_v57  ;;  %v2251_v14 = vsel %vm2037_vm9, %v2248_v42, %v2250_v44  ;;  %v2876_v63 = vshrl.u32 %v5752_v10, 16 }
 0x226   : > { %7003 = vst [vmem:[#allocation71_spill] sm:$0xff] %v6208_v48 }
 0x227   : > { %v2878_v61 = vor.u32 %v2876_v63, %v2874_v39  ;;  %v2888_v39 = vshll.u32 %v5798_v12, 16 }
 0x228   : > { %v6212_v55 = vpop.f32.mrf.mxu0 }
 0x229   : > { %7004 = vst [vmem:[#allocation72_spill] sm:$0xff] %v6212_v55  ;;  %v2882_v55 = vrot.slane %v2880_v16, 1 }
 0x22a   : > { %v6214_v60 = vpop.f32.mrf.mxu2 }
 0x22b   : > { %v1339_v46 = vpop.f32.mrf.mxu3 }
 0x22c   : > { %v6218_v18 = vadd.f32 %v1339_v46, %v6125_v1  ;;  %v2160_v36 = vpop.f32.mrf.mxu1 }
 0x22d   : > { %v6222_v38 = vadd.f32 %v2345_v62, %v2160_v36  ;;  %v2883_v62 = vsel %vm1478_vm10, %v2878_v61, %v2882_v55  ;;  %v2252_v36 = vrot.slane %v5963_v35, 1  ;;  %v5120_v35 = vld [vmem:[%s6909_s3 + $0x60] sm:$0xff] }
 0x22e   : > { %7005 = vst [vmem:[#allocation73_spill] sm:$0xff] %v6218_v18  ;;  %2589 = vmatpush.bf16.msra.mxu3 %v5120_v35 }
 0x22f   : > { %4779 = vmatmul.msk.bf16.gmra.mxu1 %vm385_vm0, %v2064_v49  ;;  %4804 = vmatmul.msk.bf16.gmra.mxu2 %vm385_vm0, %v2251_v14 }
 0x230   : > { %4720 = vmatmul.msk.bf16.gmra.mxu3 %vm385_vm0, %v5597_v32  ;;  %v6231_v1 = vpop.f32.mrf.mxu0  ;;  %v2065_v32 = vrot.slane %v5818_v37, 1 }
 0x231   : > { %7006 = vst [vmem:[#allocation74_spill] sm:$0xff] %v6231_v1 }
 0x232   : > { %v2350_v31 = vpop.f32.mrf.mxu2 }
 0x233   : > { %v1342_v46 = vpop.f32.mrf.mxu3  ;;  %4977 = vmatmul.msk.bf16.gmra.mxu0 %vm385_vm0, %v2883_v62  ;;  %v2253_v62 = vsel %vm2037_vm9, %v2250_v44, %v2252_v36 }
 0x234   : > { %v6236_v52 = vadd.f32 %v1342_v46, %v6138_v0  ;;  %v6238_v10 = vpop.f32.mrf.mxu1  ;;  %v2066_v0 = vsel %vm2037_vm9, %v2063_v57, %v2065_v32  ;;  %v2884_v46 = vshrl.u32 %v5762_v43, 16 }
 0x236   : > { %7007 = vst [vmem:[#allocation75_spill] sm:$0xff] %v6236_v52  ;;  %v2886_v37 = vor.u32 %v2884_v46, %v2882_v55  ;;  %v7031_v52 = vld [vmem:[#allocation5_spill] sm:$0xff] }
 0x238   : > { %v6240_v42 = vpop.f32.mrf.mxu0 }
 0x239   : > { %7008 = vst [vmem:[#allocation76_spill] sm:$0xff] %v6240_v42  ;;  %v2890_v42 = vrot.slane %v2888_v39, 1 }
 0x23a   : > { %v6242_v16 = vpop.f32.mrf.mxu2 }
 0x23b   : > { %v1344_v49 = vpop.f32.mrf.mxu3  ;;  %v2891_v57 = vsel %vm1478_vm10, %v2886_v37, %v2890_v42 }
 0x23c   : > { %v6248_v14 = vadd.f32 %v1344_v49, %v6146_v27  ;;  %v2165_v63 = vpop.f32.mrf.mxu1  ;;  %v2067_v49 = vrot.slane %v5882_v45, 1 }
 0x23d   : > { %v6250_v61 = vadd.f32 %v2350_v31, %v2165_v63  ;;  %v2254_v63 = vrot.slane %v6058_v26, 1 }
 0x23e   : > { %7009 = vst [vmem:[#allocation77_spill] sm:$0xff] %v6248_v14 }
 0x23f   : > { %4780 = vmatmul.msk.bf16.gmra.mxu1 %vm385_vm0, %v2066_v0  ;;  %4805 = vmatmul.msk.bf16.gmra.mxu2 %vm385_vm0, %v2253_v62  ;;  %v2896_v0 = vshll.u32 %v5827_v25, 16 }
 0x240   : > { %4721 = vmatmul.msk.bf16.gmra.mxu3 %vm385_vm0, %v5697_v56  ;;  %v6263_v44 = vpop.f32.mrf.mxu0  ;;  %v5139_v56 = vld [vmem:[%s6909_s3 + $0x80] sm:$0xff] }
 0x241   : > { %7010 = vst [vmem:[#allocation78_spill] sm:$0xff] %v6263_v44  ;;  %3246 = vmatpush.bf16.msra.mxu1 %v5139_v56  ;;  %v2892_v56 = vshrl.u32 %v5798_v12, 16  ;;  %v2898_v45 = vrot.slane %v2896_v0, 1  ;;  %v7019_v44 = vld [vmem:[#allocation16_spill] sm:$0xff] }
 0x242   : > { %v2355_v27 = vpop.f32.mrf.mxu2 }
 0x243   : > { %v1347_v43 = vpop.f32.mrf.mxu3  ;;  %4978 = vmatmul.msk.bf16.gmra.mxu0 %vm385_vm0, %v2891_v57  ;;  %v2068_v57 = vsel %vm2037_vm9, %v2065_v32, %v2067_v49  ;;  %v2894_v26 = vor.u32 %v2892_v56, %v2890_v42  ;;  %v2904_v42 = vshll.u32 %v5888_v11, 16 }
 0x244   : > { %v6267_v31 = vadd.f32 %v1347_v43, %v6159_v33  ;;  %v6269_v39 = vpop.f32.mrf.mxu1  ;;  %v2255_v43 = vsel %vm2037_vm9, %v2252_v36, %v2254_v63  ;;  %v5142_v63 = vld [vmem:[%s6911_s5 + $0x8] sm:$0xff] }
 0x245   : > { %4251 = vmatpush.bf16.msra.mxu2 %v5142_v63 }
 0x246   : > { %7011 = vst [vmem:[#allocation79_spill] sm:$0xff] %v6267_v31 }
 0x248   : > { %v6282_v37 = vpop.f32.mrf.mxu0 }
 0x249   : > { %7013 = vst [vmem:[#allocation81_spill] sm:$0xff] %v6282_v37 }
 0x24a   : > { %v6274_v55 = vpop.f32.mrf.mxu2 }
 0x24b   : > { %v1349_v62 = vpop.f32.mrf.mxu3 }
 0x24c   : > { %v6280_v46 = vadd.f32 %v1349_v62, %v6168_v20  ;;  %v2170_v33 = vpop.f32.mrf.mxu1  ;;  %v2899_v62 = vsel %vm1478_vm10, %v2894_v26, %v2898_v45  ;;  %v2900_v26 = vshrl.u32 %v5827_v25, 16 }
 0x24d   : > { %v6284_v35 = vadd.f32 %v2355_v27, %v2170_v33 }
 0x24e   : > { %7012 = vst [vmem:[#allocation80_spill] sm:$0xff] %v6280_v46  ;;  %v7024_v46 = vld [vmem:[#allocation4_spill] sm:$0xff] }
 0x24f   : > { %4781 = vmatmul.msk.bf16.gmra.mxu1 %vm385_vm0, %v2068_v57  ;;  %4806 = vmatmul.msk.bf16.gmra.mxu2 %vm385_vm0, %v2255_v43 }
 0x250   : > { %4722 = vmatmul.msk.bf16.gmra.mxu3 %vm385_vm0, %v5755_v6  ;;  %v3025_v12 = vpop.f32.mrf.mxu0  ;;  %v2069_v6 = vrot.slane %v5959_v34, 1  ;;  %v2902_v34 = vor.u32 %v2900_v26, %v2898_v45 }
 0x252   : > { %v2360_v20 = vpop.f32.mrf.mxu2  ;;  %v2070_v56 = vsel %vm2037_vm9, %v2067_v49, %v2069_v6  ;;  %v5163_v49 = vld [vmem:[#allocation2 + $0x10] sm:$0xf0]  ;;  %v5164_v6 = vld [vmem:[#allocation2 + $0x10] sm:$0xe] }
 0x253   : > { %v1352_v27 = vpop.f32.mrf.mxu3  ;;  %4979 = vmatmul.msk.bf16.gmra.mxu0 %vm385_vm0, %v2899_v62  ;;  %v2906_v62 = vrot.slane %v2904_v42, 1  ;;  %v5165_v42 = vor.u32 %v5164_v6, %v5163_v49 }
 0x254   : > { %v6296_v32 = vadd.f32 %v1352_v27, %v6183_v53  ;;  %v6298_v36 = vpop.f32.mrf.mxu1 }
 0x255   : > { %v2907_v37 = vsel %vm1478_vm10, %v2902_v34, %v2906_v62  ;;  %v3146_v34 = vrot.slane %v5165_v42, 1 }
 0x256   : > { %7014 = vst [vmem:[#allocation82_spill] sm:$0xff] %v6296_v32  ;;  %v2908_v32 = vshrl.u32 %v5888_v11, 16 }
 0x258   : > { %v3027_v27 = vpop.f32.mrf.mxu0  ;;  %v2910_v6 = vor.u32 %v2908_v32, %v2906_v62 }
 0x25a   : > { %v6303_v0 = vpop.f32.mrf.mxu2 }
 0x25b   : > { %v1354_v33 = vpop.f32.mrf.mxu3 }
 0x25c   : > { %v6308_v57 = vadd.f32 %v1354_v33, %v6193_v23  ;;  %v2175_v53 = vpop.f32.mrf.mxu1 }
 0x25d   : > { %v6310_v43 = vadd.f32 %v2360_v20, %v2175_v53 }
 0x25e   : > { %7015 = vst [vmem:[#allocation83_spill] sm:$0xff] %v6308_v57 }
 0x25f   : > { %4782 = vmatmul.msk.bf16.gmra.mxu1 %vm385_vm0, %v2070_v56  ;;  %v7016_v56 = vld [vmem:[#allocation18_spill] sm:$0xff] }
 0x260   : > { %4723 = vmatmul.msk.bf16.gmra.mxu3 %vm385_vm0, %v5768_v17  ;;  %v3030_v17 = vpop.f32.mrf.mxu0 }
 0x262   : > { %v2365_v63 = vpop.f32.mrf.mxu2 }
 0x263   : > { %v1680_v23 = vpop.f32.mrf.mxu3  ;;  %4980 = vmatmul.msk.bf16.gmra.mxu0 %vm385_vm0, %v2907_v37  ;;  %v2912_v37 = vshll.u32 %v5890_v58, 16 }
 0x264   : > { %v1949_v20 = vadd.f32 %v5800_v7, %v1680_v23  ;;  %v6320_v33 = vpop.f32.mrf.mxu1 }
 0x266   : > { %v6322_v25 = vadd.f32 %v3025_v12, %v1949_v20  ;;  %v7017_v12 = vld [vmem:[#allocation3_spill] sm:$0xff] }
 0x267   : > { %v7018_v20 = vrot.slane %v7017_v12, 1 }
 0x269   : > { %v3148_v49 = vsel %vm2037_vm9, %v3146_v34, %v7018_v20  ;;  %v7022_v34 = vld [vmem:[#allocation24_spill] sm:$0xff] }
 0x26a   : > { %v6324_v53 = vpop.f32.mrf.mxu2 }
 0x26b   : > { %v1682_v45 = vpop.f32.mrf.mxu3 }
 0x26c   : > { %v1951_v26 = vadd.f32 %v7016_v56, %v1682_v45  ;;  %v2180_v57 = vpop.f32.mrf.mxu1  ;;  %v2914_v45 = vrot.slane %v2912_v37, 1  ;;  %v2916_v37 = vshrl.u32 %v5890_v58, 16 }
 0x26d   : > { %v6329_v7 = vadd.f32 %v2365_v63, %v2180_v57  ;;  %v7020_v57 = vld [vmem:[#allocation22_spill] sm:$0xff] }
 0x26e   : > { %v6331_v23 = vadd.f32 %v3027_v27, %v1951_v26  ;;  %v2915_v11 = vsel %vm1478_vm10, %v2910_v6, %v2914_v45  ;;  %v3032_v26 = vpop.f32.mrf.mxu0 }
 0x26f   : > { %4999 = vmatmul.msk.bf16.vlgmr.msra.gmra.mxu1 %vm385_vm0, %v3148_v49  ;;  %v2920_v49 = vshll.u32 %v5905_v3, 16 }
 0x270   : > { %4724 = vmatmul.msk.bf16.gmra.mxu3 %vm385_vm0, %v7019_v44 }
 0x272   : > { %v2370_v42 = vpop.f32.mrf.mxu2 }
 0x273   : > { %v1685_v56 = vpop.f32.mrf.mxu3  ;;  %4981 = vmatmul.msk.bf16.gmra.mxu0 %vm385_vm0, %v2915_v11 }
 0x274   : > { %v1954_v27 = vadd.f32 %v7020_v57, %v1685_v56  ;;  %v6342_v63 = vpop.f32.mrf.mxu1  ;;  %v2918_v56 = vor.u32 %v2916_v37, %v2914_v45 }
 0x276   : > { %v6344_v12 = vadd.f32 %v3030_v17, %v1954_v27  ;;  %v3035_v57 = vpop.f32.mrf.mxu0  ;;  %v7025_v17 = vld [vmem:[#allocation25_spill] sm:$0xff]  ;;  %v2922_v27 = vrot.slane %v2920_v49, 1 }
 0x27a   : > { %v6346_v32 = vpop.f32.mrf.mxu2 }
 0x27b   : > { %7021 = vst [vmem:[#allocation18_spill] sm:$0xff] %v6346_v32  ;;  %v1687_v62 = vpop.f32.mrf.mxu3  ;;  %v7067_v32 = vld [vmem:[#allocation34_spill] sm:$0xff] }
 0x27c   : > { %v1956_v20 = vadd.f32 %v7022_v34, %v1687_v62  ;;  %v2185_v44 = vpop.f32.mrf.mxu1  ;;  %v2923_v62 = vsel %vm1478_vm10, %v2918_v56, %v2922_v27 }
 0x27d   : > { %v6351_v6 = vadd.f32 %v2370_v42, %v2185_v44  ;;  %v7028_v44 = vld [vmem:[#allocation27_spill] sm:$0xff] }
 0x27e   : > { %v6353_v11 = vadd.f32 %v3032_v26, %v1956_v20  ;;  %v3037_v45 = vpop.f32.mrf.mxu0  ;;  %v2928_v37 = vshll.u32 %v7028_v44, 16 }
 0x27f   : > { %7023 = vst [vmem:[#allocation3_spill] sm:$0xff] %v6351_v6  ;;  %5000 = vmatmul.msk.bf16.gmra.mxu1 %vm385_vm0, %v7024_v46  ;;  %v2924_v46 = vshrl.u32 %v5905_v3, 16 }
 0x280   : > { %4725 = vmatmul.msk.bf16.gmra.mxu3 %vm385_vm0, %v7025_v17  ;;  %v7029_v17 = vld [vmem:[#allocation38_spill] sm:$0xff] }
 0x282   : > { %v2375_v31 = vpop.f32.mrf.mxu2 }
 0x283   : > { %v1690_v34 = vpop.f32.mrf.mxu3  ;;  %4982 = vmatmul.msk.bf16.gmra.mxu0 %vm385_vm0, %v2923_v62 }
 0x284   : > { %v1959_v58 = vadd.f32 %v5938_v59, %v1690_v34  ;;  %v6362_v42 = vpop.f32.mrf.mxu1  ;;  %v2926_v59 = vor.u32 %v2924_v46, %v2922_v27  ;;  %v2930_v34 = vrot.slane %v2928_v37, 1 }
 0x285   : > { %7026 = vst [vmem:[#allocation16_spill] sm:$0xff] %v6362_v42 }
 0x286   : > { %v6364_v26 = vadd.f32 %v3035_v57, %v1959_v58  ;;  %v7032_v57 = vld [vmem:[#allocation26_spill] sm:$0xff]  ;;  %v2931_v3 = vsel %vm1478_vm10, %v2926_v59, %v2930_v34  ;;  %v3040_v4 = vpop.f32.mrf.mxu0 }
 0x28a   : > { %v6366_v20 = vpop.f32.mrf.mxu2 }
 0x28b   : > { %7027 = vst [vmem:[#allocation22_spill] sm:$0xff] %v6366_v20  ;;  %v1692_v49 = vpop.f32.mrf.mxu3  ;;  %v7038_v20 = vld [vmem:[#allocation6_spill] sm:$0xff] }
 0x28c   : > { %v1961_v1 = vadd.f32 %v7029_v17, %v1692_v49  ;;  %v2190_v56 = vpop.f32.mrf.mxu1  ;;  %v7033_v49 = vld [vmem:[#allocation41_spill] sm:$0xff] }
 0x28d   : > { %v6371_v14 = vadd.f32 %v2375_v31, %v2190_v56 }
 0x28e   : > { %v6373_v62 = vadd.f32 %v3037_v45, %v1961_v1  ;;  %v7036_v45 = vld [vmem:[#allocation30_spill] sm:$0xff] }
 0x28f   : > { %7030 = vst [vmem:[#allocation24_spill] sm:$0xff] %v6371_v14  ;;  %5001 = vmatmul.msk.bf16.gmra.mxu1 %vm385_vm0, %v7031_v52  ;;  %v2932_v52 = vshrl.u32 %v7028_v44, 16  ;;  %v2936_v46 = vshll.u32 %v7036_v45, 16  ;;  %v5107_v14 = vld [vmem:[#allocation2 + $0x28] sm:$0xff] }
 0x290   : > { %4726 = vmatmul.msk.bf16.gmra.mxu3 %vm385_vm0, %v7032_v57  ;;  %v3042_v57 = vpop.f32.mrf.mxu0 }
 0x292   : > { %v2380_v58 = vpop.f32.mrf.mxu2 }
 0x293   : > { %v1695_v18 = vpop.f32.mrf.mxu3  ;;  %4983 = vmatmul.msk.bf16.gmra.mxu0 %vm385_vm0, %v2931_v3 }
 0x294   : > { %v1964_v31 = vadd.f32 %v7033_v49, %v1695_v18  ;;  %v6382_v17 = vpop.f32.mrf.mxu1  ;;  %v2934_v18 = vor.u32 %v2932_v52, %v2930_v34  ;;  %v2938_v49 = vrot.slane %v2936_v46, 1  ;;  %v2940_v34 = vshrl.u32 %v7036_v45, 16  ;;  %v7042_v52 = vld [vmem:[#allocation40_spill] sm:$0xff] }
 0x295   : > { %7034 = vst [vmem:[#allocation4_spill] sm:$0xff] %v6382_v17  ;;  %v2944_v46 = vshll.u32 %v7042_v52, 16  ;;  %v7061_v17 = vld [vmem:[#allocation31_spill] sm:$0xff] }
 0x296   : > { %v6384_v1 = vadd.f32 %v3040_v4, %v1964_v31  ;;  %v7039_v4 = vld [vmem:[#allocation29_spill] sm:$0xff]  ;;  %v2939_v31 = vsel %vm1478_vm10, %v2934_v18, %v2938_v49  ;;  %v7044_v18 = vld [vmem:[#allocation7_spill] sm:$0xff] }
 0x29a   : > { %v6386_v27 = vpop.f32.mrf.mxu2 }
 0x29b   : > { %7035 = vst [vmem:[#allocation25_spill] sm:$0xff] %v6386_v27  ;;  %v1697_v37 = vpop.f32.mrf.mxu3 }
 0x29c   : > { %v1966_v56 = vadd.f32 %v5990_v47, %v1697_v37  ;;  %v2195_v59 = vpop.f32.mrf.mxu1 }
 0x29d   : > { %v6391_v48 = vadd.f32 %v2380_v58, %v2195_v59  ;;  %v2942_v59 = vor.u32 %v2940_v34, %v2938_v49  ;;  %v2952_v49 = vshll.u32 %v6000_v13, 16 }
 0x29e   : > { %v6393_v3 = vadd.f32 %v3042_v57, %v1966_v56  ;;  %v2946_v57 = vrot.slane %v2944_v46, 1 }
 0x29f   : > { %7037 = vst [vmem:[#allocation27_spill] sm:$0xff] %v6391_v48  ;;  %5002 = vmatmul.msk.bf16.gmra.mxu1 %vm385_vm0, %v7038_v20  ;;  %v7059_v48 = vld [vmem:[#allocation19_spill] sm:$0xff] }
 0x2a0   : > { %4727 = vmatmul.msk.bf16.gmra.mxu3 %vm385_vm0, %v7039_v4  ;;  %v7045_v4 = vld [vmem:[#allocation20_spill] sm:$0xff] }
 0x2a2   : > { %v2385_v44 = vpop.f32.mrf.mxu2 }
 0x2a3   : > { %v6400_v27 = vpop.f32.mrf.mxu3  ;;  %4984 = vmatmul.msk.bf16.gmra.mxu0 %vm385_vm0, %v2939_v31  ;;  %v2947_v31 = vsel %vm1478_vm10, %v2942_v59, %v2946_v57  ;;  %v2954_v59 = vrot.slane %v2952_v49, 1 }
 0x2a4   : > { %v6403_v47 = vpop.f32.mrf.mxu1 }
 0x2a5   : > { %7040 = vst [vmem:[#allocation38_spill] sm:$0xff] %v6403_v47 }
 0x2aa   : > { %v6405_v58 = vpop.f32.mrf.mxu2 }
 0x2ab   : > { %7041 = vst [vmem:[#allocation5_spill] sm:$0xff] %v6405_v58  ;;  %v6409_v37 = vpop.f32.mrf.mxu3 }
 0x2ac   : > { %v2200_v20 = vpop.f32.mrf.mxu1 }
 0x2ad   : > { %v6411_v56 = vadd.f32 %v2385_v44, %v2200_v20  ;;  %v2948_v44 = vshrl.u32 %v7042_v52, 16 }
 0x2af   : > { %7043 = vst [vmem:[#allocation26_spill] sm:$0xff] %v6411_v56  ;;  %5003 = vmatmul.msk.bf16.gmra.mxu1 %vm385_vm0, %v7044_v18  ;;  %v7049_v56 = vld [vmem:[#allocation12_spill] sm:$0xff] }
 0x2b0   : > { %4728 = vmatmul.msk.bf16.gmra.mxu3 %vm385_vm0, %v7045_v4  ;;  %v2950_v4 = vor.u32 %v2948_v44, %v2946_v57  ;;  %v7053_v44 = vld [vmem:[#allocation14_spill] sm:$0xff] }
 0x2b2   : > { %v2390_v45 = vpop.f32.mrf.mxu2 }
 0x2b3   : > { %v6418_v58 = vpop.f32.mrf.mxu3  ;;  %4985 = vmatmul.msk.bf16.gmra.mxu0 %vm385_vm0, %v2947_v31  ;;  %v7050_v31 = vld [vmem:[#allocation33_spill] sm:$0xff] }
 0x2b4   : > { %v6421_v47 = vpop.f32.mrf.mxu1 }
 0x2b5   : > { %7046 = vst [vmem:[#allocation41_spill] sm:$0xff] %v6421_v47  ;;  %v2955_v47 = vsel %vm1478_vm10, %v2950_v4, %v2954_v59 }
 0x2ba   : > { %v6429_v18 = vpop.f32.mrf.mxu2 }
 0x2bb   : > { %v6425_v34 = vpop.f32.mrf.mxu3  ;;  %7048 = vst [vmem:[#allocation6_spill] sm:$0xff] %v6429_v18 }
 0x2bc   : > { %v2205_v46 = vpop.f32.mrf.mxu1 }
 0x2bd   : > { %v6427_v20 = vadd.f32 %v2390_v45, %v2205_v46 }
 0x2bf   : > { %7047 = vst [vmem:[#allocation30_spill] sm:$0xff] %v6427_v20  ;;  %5004 = vmatmul.msk.bf16.gmra.mxu1 %vm385_vm0, %v7049_v56  ;;  %v5105_v20 = vld [vmem:[#allocation2 + $0x18] sm:$0xff] }
 0x2c0   : > { %4729 = vmatmul.msk.bf16.gmra.mxu3 %vm385_vm0, %v7050_v31 }
 0x2c2   : > { %v2395_v45 = vpop.f32.mrf.mxu2 }
 0x2c3   : > { %v6436_v52 = vpop.f32.mrf.mxu3  ;;  %4986 = vmatmul.msk.bf16.gmra.mxu0 %vm385_vm0, %v2955_v47  ;;  %v5141_v47 = vld [vmem:[%s6911_s5] sm:$0xff] }
 0x2c4   : > { %v6439_v13 = vpop.f32.mrf.mxu1  ;;  %4252 = vmatpush.bf16.msra.mxu2 %v5141_v47 }
 0x2c5   : > { %7051 = vst [vmem:[#allocation29_spill] sm:$0xff] %v6439_v13 }
 0x2ca   : > { %v6449_v56 = vpop.f32.mrf.mxu2 }
 0x2cb   : > { %v6441_v46 = vpop.f32.mrf.mxu3  ;;  %7054 = vst [vmem:[#allocation7_spill] sm:$0xff] %v6449_v56 }
 0x2cc   : > { %v2210_v18 = vpop.f32.mrf.mxu1 }
 0x2cd   : > { %v6443_v57 = vadd.f32 %v2395_v45, %v2210_v18 }
 0x2cf   : > { %7052 = vst [vmem:[#allocation40_spill] sm:$0xff] %v6443_v57  ;;  %5005 = vmatmul.msk.bf16.gmra.mxu1 %vm385_vm0, %v7053_v44  ;;  %v5104_v44 = vld [vmem:[#allocation2 + $0x10] sm:$0xff]  ;;  %v7057_v57 = vld [vmem:[#allocation17_spill] sm:$0xff] }
 0x2d0   : > { %4730 = vmatmul.msk.bf16.gmra.mxu3 %vm385_vm0, %v5988_v30 }
 0x2d2   : > { %v2400_v18 = vpop.f32.mrf.mxu2 }
 0x2d3   : > { %v6451_v49 = vpop.f32.mrf.mxu3 }
 0x2d4   : > { %v6453_v4 = vpop.f32.mrf.mxu1 }
 0x2d5   : > { %7055 = vst [vmem:[#allocation20_spill] sm:$0xff] %v6453_v4 }
 0x2db   : > { %v6458_v59 = vpop.f32.mrf.mxu3 }
 0x2dc   : > { %v2215_v31 = vpop.f32.mrf.mxu1 }
 0x2dd   : > { %v6460_v45 = vadd.f32 %v2400_v18, %v2215_v31 }
 0x2df   : > { %7056 = vst [vmem:[#allocation12_spill] sm:$0xff] %v6460_v45  ;;  %5006 = vmatmul.msk.bf16.gmra.mxu1 %vm385_vm0, %v7057_v57 }
 0x2e0   : > { %4883 = vmatmul.msk.bf16.vlgmr.msra.gmra.mxu3 %vm385_vm0, %v5104_v44 }
 0x2e3   : > { %v6465_v30 = vpop.f32.mrf.mxu3 }
 0x2e4   : > { %v6467_v56 = vpop.f32.mrf.mxu1 }
 0x2e5   : > { %7058 = vst [vmem:[#allocation33_spill] sm:$0xff] %v6467_v56  ;;  %v5106_v56 = vld [vmem:[#allocation2 + $0x20] sm:$0xff] }
 0x2eb   : > { %v6469_v4 = vpop.f32.mrf.mxu3 }
 0x2ec   : > { %v3248_v13 = vpop.f32.mrf.mxu1 }
 0x2ed   : > { %v3328_v47 = vadd.f32 %v3248_v13, %v6127_v22 }
 0x2ef   : > { %5007 = vmatmul.msk.bf16.gmra.mxu1 %vm385_vm0, %v7059_v48 }
 0x2f0   : > { %4884 = vmatmul.msk.bf16.gmra.mxu3 %vm385_vm0, %v5105_v20 }
 0x2f3   : > { %v6475_v18 = vpop.f32.mrf.mxu3 }
 0x2f4   : > { %v3250_v57 = vpop.f32.mrf.mxu1 }
 0x2f5   : > { %v3329_v2 = vadd.f32 %v3250_v57, %v6141_v29 }
 0x2fb   : > { %v6477_v31 = vpop.f32.mrf.mxu3 }
 0x2fc   : > { %7060 = vst [vmem:[#allocation14_spill] sm:$0xff] %v6477_v31  ;;  %v3253_v44 = vpop.f32.mrf.mxu1 }
 0x2fd   : > { %v6480_v45 = vadd.f32 %v3253_v44, %v6148_v28 }
 0x2ff   : > { %5008 = vmatmul.msk.bf16.gmra.mxu1 %vm385_vm0, %v7061_v17 }
 0x300   : > { %4885 = vmatmul.msk.bf16.gmra.mxu3 %vm385_vm0, %v5106_v56 }
 0x303   : > { %v6485_v22 = vpop.f32.mrf.mxu3 }
 0x304   : > { %7062 = vst [vmem:[#allocation17_spill] sm:$0xff] %v6485_v22  ;;  %v6487_v48 = vpop.f32.mrf.mxu1 }
 0x30b   : > { %v6489_v20 = vpop.f32.mrf.mxu3 }
 0x30c   : > { %7063 = vst [vmem:[#allocation19_spill] sm:$0xff] %v6489_v20  ;;  %v3258_v13 = vpop.f32.mrf.mxu1  ;;  %v5108_v20 = vld [vmem:[#allocation2 + $0x30] sm:$0xff] }
 0x30d   : > { %v6492_v24 = vadd.f32 %v3258_v13, %v6170_v41  ;;  %v7070_v13 = vld [vmem:[#allocation35_spill] sm:$0xff] }
 0x30f   : > { %5009 = vmatmul.msk.bf16.gmra.mxu1 %vm385_vm0, %v7064_v19 }
 0x310   : > { %4886 = vmatmul.msk.bf16.gmra.mxu3 %vm385_vm0, %v5107_v14  ;;  %v5109_v14 = vld [vmem:[#allocation2 + $0x38] sm:$0xff] }
 0x313   : > { %v6497_v28 = vpop.f32.mrf.mxu3 }
 0x314   : > { %7065 = vst [vmem:[#allocation31_spill] sm:$0xff] %v6497_v28  ;;  %v6499_v17 = vpop.f32.mrf.mxu1  ;;  %v7073_v28 = vld [vmem:[#allocation36_spill] sm:$0xff] }
 0x31b   : > { %v6501_v56 = vpop.f32.mrf.mxu3 }
 0x31c   : > { %7066 = vst [vmem:[#allocation32_spill] sm:$0xff] %v6501_v56  ;;  %v3263_v44 = vpop.f32.mrf.mxu1 }
 0x31d   : > { %v6504_v22 = vadd.f32 %v3263_v44, %v6195_v54  ;;  %v5110_v44 = vld [vmem:[#allocation2 + $0x40] sm:$0xff] }
 0x31f   : > { %5010 = vmatmul.msk.bf16.gmra.mxu1 %vm385_vm0, %v7067_v32 }
 0x320   : > { %4887 = vmatmul.msk.bf16.gmra.mxu3 %vm385_vm0, %v5108_v20 }
 0x323   : > { %v6509_v41 = vpop.f32.mrf.mxu3 }
 0x324   : > { %7068 = vst [vmem:[#allocation34_spill] sm:$0xff] %v6509_v41  ;;  %v6536_v41 = vpop.f32.mrf.mxu1 }
 0x32b   : > { %v6511_v19 = vpop.f32.mrf.mxu3 }
 0x32c   : > { %7069 = vst [vmem:[#allocation84_spill] sm:$0xff] %v6511_v19  ;;  %v5111_v19 = vld [vmem:[#allocation2 + $0x48] sm:$0xff]  ;;  %v6556_v29 = vpop.f32.mrf.mxu1 }
 0x32f   : > { %5011 = vmatmul.msk.bf16.gmra.mxu1 %vm385_vm0, %v7070_v13  ;;  %v3360_v13 = vlaneseq }
 0x330   : > { %4888 = vmatmul.msk.bf16.gmra.mxu3 %vm385_vm0, %v5109_v14 }
 0x333   : > { %v6516_v56 = vpop.f32.mrf.mxu3 }
 0x334   : > { %7071 = vst [vmem:[#allocation35_spill] sm:$0xff] %v6516_v56  ;;  %v6534_v56 = vshrl.u32 %v3360_v13, 7 }
 0x33b   : > { %v6518_v54 = vpop.f32.mrf.mxu3 }
 0x33c   : > { %7072 = vst [vmem:[#allocation85_spill] sm:$0xff] %v6518_v54 }
 0x33f   : > { %5012 = vmatmul.msk.bf16.gmra.mxu1 %vm385_vm0, %v7073_v28  ;;  %v5112_v28 = vld [vmem:[#allocation2 + $0x50] sm:$0xff] }
 0x340   : > { %4889 = vmatmul.msk.bf16.gmra.mxu3 %vm385_vm0, %v5110_v44  ;;  %v3397_v44 = vand.u32 15, %v6534_v56 }
 0x342   : > { %vm3777_vm11 = vcmp.ne.s32.totalorder %v3397_v44, 0  ;;  %v7079_v44 = vld [vmem:[#allocation9_spill] sm:$0xff] }
 0x343   : > { %v6523_v32 = vpop.f32.mrf.mxu3 }
 0x344   : > { %7074 = vst [vmem:[#allocation36_spill] sm:$0xff] %v6523_v32 }
 0x34b   : > { %v6525_v20 = vpop.f32.mrf.mxu3 }
 0x34c   : > { %7075 = vst [vmem:[#allocation86_spill] sm:$0xff] %v6525_v20 }
 0x34f   : > { %5013 = vmatmul.msk.bf16.gmra.mxu1 %vm385_vm0, %v5983_v21 }
 0x350   : > { %4890 = vmatmul.msk.bf16.gmra.mxu3 %vm385_vm0, %v5111_v19  ;;  %v3362_v19 = vadd.s32 8, %v6534_v56 }
 0x353   : > { %v6530_v14 = vpop.f32.mrf.mxu3 }
 0x354   : > { %7076 = vst [vmem:[#allocation87_spill] sm:$0xff] %v6530_v14  ;;  %v7078_v14 = vld [vmem:[#allocation8_spill] sm:$0xff] }
 0x35b   : > { %v6532_v54 = vpop.f32.mrf.mxu3 }
 0x35c   : > { %7077 = vst [vmem:[#allocation88_spill] sm:$0xff] %v6532_v54  ;;  %v3404_v54 = vand.u32 15, %v3362_v19  ;;  %v6559_v19 = vpop.f32.mrf.mxu0 }
 0x35e   : > { %vm3938_vm12 = vcmp.ne.s32.totalorder %v3404_v54, 15 }
 0x35f   : > { %5014 = vmatmul.msk.bf16.gmra.mxu1 %vm385_vm0, %v6009_v50  ;;  %v3363_v50 = vadd.s32 16, %v6534_v56 }
 0x360   : > { %4891 = vmatmul.msk.bf16.gmra.mxu3 %vm385_vm0, %v5112_v28  ;;  %v6550_v28 = vld [vmem:[%s6910_s4] ss:$0 sm:$0xff] }
 0x363   : > { %v2591_v21 = vpop.f32.mrf.mxu3 }
 0x364   : > { %v2671_v20 = vadd.f32 %v2591_v21, %v7078_v14  ;;  %v4034_v21 = vsel %vm3938_vm12, %v3329_v2, 0.0 }
 0x366   : > { %v3873_v32 = vsel %vm3777_vm11, %v2671_v20, 0.0  ;;  %v5113_v20 = vld [vmem:[#allocation2 + $0x58] sm:$0xff] }
 0x367   : > { %v3905_v13 = vadd.f32 %v3873_v32, %v6322_v25  ;;  %v3411_v25 = vand.u32 15, %v3363_v50 }
 0x369   : > { %v4065_v42 = vadd.f32 %v3905_v13, %v3328_v47  ;;  %vm3779_vm13 = vcmp.ne.s32.totalorder %v3411_v25, 0 }
 0x36b   : > { %v2593_v31 = vpop.f32.mrf.mxu3  ;;  %v4101_v47 = vadd.f32 %v6550_v28, %v4065_v42 }
 0x36c   : > { %v2672_v6 = vadd.f32 %v2593_v31, %v7079_v44  ;;  %v3364_v31 = vadd.s32 24, %v6534_v56 }
 0x36d   : > { %v4133_v13 = vmax.f32 %v4101_v47, 0.0  ;;  %v6569_v47 = vpop.f32.mrf.mxu1 }
 0x36e   : > { %v3906_v14 = vadd.f32 %v6331_v23, %v2672_v6  ;;  %v7080_v6 = vld [vmem:[#allocation10_spill] sm:$0xff] }
 0x370   : > { %v4066_v32 = vadd.f32 %v4034_v21, %v3906_v14  ;;  %4892 = vmatmul.msk.bf16.gmra.mxu3 %vm385_vm0, %v5113_v20  ;;  %v3418_v14 = vand.u32 15, %v3364_v31  ;;  %v3331_v21 = vadd.f32 %v6487_v48, %v6162_v5  ;;  %v5114_v31 = vld [vmem:[#allocation2 + $0x60] sm:$0xff] }
 0x372   : > { %v4102_v57 = vadd.f32 %v6550_v28, %v4066_v32  ;;  %v3365_v32 = vadd.s32 32, %v6534_v56  ;;  %vm3940_vm14 = vcmp.ne.s32.totalorder %v3418_v14, 15  ;;  %v7082_v14 = vld [vmem:[#allocation13_spill] sm:$0xff] }
 0x373   : > { %v2596_v54 = vpop.f32.mrf.mxu3 }
 0x374   : > { %v4134_v23 = vmax.f32 %v4102_v57, 0.0  ;;  %v2673_v2 = vadd.f32 %v2596_v54, %v7080_v6  ;;  %v7081_v57 = vld [vmem:[#allocation11_spill] sm:$0xff]  ;;  %v3425_v6 = vand.u32 15, %v3365_v32 }
 0x376   : > { %v4165_v50 = vpack.c.bf16 %v4134_v23, %v4133_v13  ;;  %v3875_v44 = vsel %vm3779_vm13, %v2673_v2, 0.0  ;;  %v6572_v13 = vpop.f32.mrf.mxu0  ;;  %v4036_v23 = vsel %vm3940_vm14, %v3331_v21, 0.0  ;;  %vm3781_vm15 = vcmp.ne.s32.totalorder %v3425_v6, 0 }
 0x377   : > { %v3907_v42 = vadd.f32 %v3875_v44, %v6344_v12  ;;  %v3367_v6 = vadd.s32 48, %v6534_v56 }
 0x378   : > { %5023 = vmatmul.msk.bf16.vlgmr.msra.gmra.mxu2 %vm385_vm0, %v4165_v50  ;;  %v3366_v50 = vadd.s32 40, %v6534_v56 }
 0x379   : > { %v4067_v20 = vadd.f32 %v3907_v42, %v6480_v45 }
 0x37b   : > { %v2598_v25 = vpop.f32.mrf.mxu3  ;;  %v4103_v45 = vadd.f32 %v6550_v28, %v4067_v20 }
 0x37c   : > { %v2674_v54 = vadd.f32 %v2598_v25, %v7081_v57  ;;  %v6580_v57 = vpop.f32.mrf.mxu1 }
 0x37d   : > { %v4135_v44 = vmax.f32 %v4103_v45, 0.0  ;;  %v7083_v45 = vld [vmem:[#allocation15_spill] sm:$0xff] }
 0x37e   : > { %v3908_v12 = vadd.f32 %v6353_v11, %v2674_v54  ;;  %v6583_v20 = vpop.f32.mrf.mxu0  ;;  %v3432_v54 = vand.u32 15, %v3366_v50 }
 0x380   : > { %v4068_v2 = vadd.f32 %v4036_v23, %v3908_v12  ;;  %4893 = vmatmul.msk.bf16.gmra.mxu3 %vm385_vm0, %v5114_v31  ;;  %v3333_v31 = vadd.f32 %v6499_v17, %v6186_v8  ;;  %vm3942_vm1 = vcmp.ne.s32.totalorder %v3432_v54, 15 }
 0x382   : > { %v4104_v5 = vadd.f32 %v6550_v28, %v4068_v2 }
 0x383   : > { %v2601_v48 = vpop.f32.mrf.mxu3 }
 0x384   : > { %v4136_v42 = vmax.f32 %v4104_v5, 0.0  ;;  %v2675_v25 = vadd.f32 %v2601_v48, %v7082_v14  ;;  %v5115_v48 = vld [vmem:[#allocation2 + $0x68] sm:$0xff] }
 0x386   : > { %v3877_v11 = vsel %vm3781_vm15, %v2675_v25, 0.0  ;;  %v4166_v21 = vpack.c.bf16 %v4136_v42, %v4135_v44  ;;  %v3439_v44 = vand.u32 15, %v3367_v6  ;;  %v6592_v42 = vpop.f32.mrf.mxu1  ;;  %v3368_v25 = vadd.s32 56, %v6534_v56 }
 0x387   : > { %v3909_v32 = vadd.f32 %v3877_v11, %v6364_v26  ;;  %v4038_v26 = vsel %vm3942_vm1, %v3333_v31, 0.0  ;;  %vm4334_vm15 = vcmask 130048  }
 0x388   : > { %5024 = vmatmul.msk.bf16.gmra.mxu2 %vm385_vm0, %v4166_v21  ;;  %vm3783_vm2 = vcmp.ne.s32.totalorder %v3439_v44, 0  ;;  %v7084_v21 = vld [vmem:[#allocation21_spill] sm:$0xff]  ;;  %v7085_v44 = vld [vmem:[#allocation23_spill] sm:$0xff] }
 0x389   : > { %v4069_v12 = vadd.f32 %v3909_v32, %v6492_v24  ;;  %v6596_v24 = vpop.f32.mrf.mxu0 }
 0x38b   : > { %v2603_v23 = vpop.f32.mrf.mxu3  ;;  %v4105_v50 = vadd.f32 %v6550_v28, %v4069_v12  ;;  %v3446_v12 = vand.u32 15, %v3368_v25 }
 0x38c   : > { %v2676_v2 = vadd.f32 %v2603_v23, %v7083_v45 }
 0x38d   : > { %v4137_v11 = vmax.f32 %v4105_v50, 0.0  ;;  %vm3944_vm3 = vcmp.ne.s32.totalorder %v3446_v12, 15 }
 0x38e   : > { %v3910_v5 = vadd.f32 %v6373_v62, %v2676_v2  ;;  %v6604_v45 = vpop.f32.mrf.mxu1  ;;  %v3335_v2 = vadd.f32 %v6536_v41, %v6210_v15  ;;  %v7086_v15 = vld [vmem:[#allocation44_spill] sm:$0xff] }
 0x38f   : > { %v1969_v41 = vadd.f32 %v7086_v15, %v6400_v27  ;;  %v3336_v27 = vadd.f32 %v6556_v29, %v6222_v38  ;;  %v7088_v38 = vld [vmem:[#allocation37_spill] sm:$0xff] }
 0x390   : > { %v4070_v14 = vadd.f32 %v4038_v26, %v3910_v5  ;;  %4894 = vmatmul.msk.bf16.gmra.mxu3 %vm385_vm0, %v5115_v48  ;;  %v3369_v48 = vadd.s32 64, %v6534_v56 }
 0x391   : > { %v6609_v26 = vpop.f32.mrf.mxu0  ;;  %v3113_v12 = vadd.f32 %v6559_v19, %v1969_v41 }
 0x392   : > { %v4106_v8 = vadd.f32 %v6550_v28, %v4070_v14  ;;  %v5116_v14 = vld [vmem:[#allocation2 + $0x70] sm:$0xff] }
 0x393   : > { %v2606_v17 = vpop.f32.mrf.mxu3 }
 0x394   : > { %v4138_v62 = vmax.f32 %v4106_v8, 0.0  ;;  %v2677_v32 = vadd.f32 %v2606_v17, %v7084_v21  ;;  %v4040_v8 = vsel %vm3944_vm3, %v3335_v2, 0.0  ;;  %v3453_v17 = vand.u32 15, %v3369_v48 }
 0x395   : > { %v3370_v21 = vadd.s32 72, %v6534_v56 }
 0x396   : > { %v3879_v54 = vsel %vm3783_vm2, %v2677_v32, 0.0  ;;  %v4167_v31 = vpack.c.bf16 %v4138_v62, %v4137_v11  ;;  %vm3785_vm4 = vcmp.ne.s32.totalorder %v3453_v17, 0  ;;  %v6619_v32 = vpop.f32.mrf.mxu1  ;;  %v3371_v17 = vadd.s32 80, %v6534_v56 }
 0x397   : > { %v3911_v23 = vadd.f32 %v3879_v54, %v6384_v1 }
 0x398   : > { %5025 = vmatmul.msk.bf16.gmra.mxu2 %vm385_vm0, %v4167_v31  ;;  %v7087_v31 = vld [vmem:[#allocation28_spill] sm:$0xff]  ;;  %v3467_v41 = vand.u32 15, %v3371_v17 }
 0x399   : > { %v4071_v6 = vadd.f32 %v3911_v23, %v6504_v22 }
 0x39a   : > { %vm3787_vm6 = vcmp.ne.s32.totalorder %v3467_v41, 0 }
 0x39b   : > { %v2608_v5 = vpop.f32.mrf.mxu3  ;;  %v4107_v22 = vadd.f32 %v6550_v28, %v4071_v6  ;;  %v6623_v6 = vpop.f32.mrf.mxu0 }
 0x39c   : > { %v2678_v50 = vadd.f32 %v2608_v5, %v7085_v44  ;;  %v1971_v44 = vadd.f32 %v6013_v51, %v6409_v37  ;;  %v5117_v37 = vld [vmem:[#allocation2 + $0x78] sm:$0xff] }
 0x39e   : > { %v3912_v1 = vadd.f32 %v6393_v3, %v2678_v50  ;;  %v4139_v3 = vmax.f32 %v4107_v22, 0.0  ;;  %v3460_v50 = vand.u32 15, %v3370_v21  ;;  %v3114_v22 = vadd.f32 %v6572_v13, %v1971_v44 }
 0x3a0   : > { %v4072_v25 = vadd.f32 %v4040_v8, %v3912_v1  ;;  %4895 = vmatmul.msk.bf16.gmra.mxu3 %vm385_vm0, %v5116_v14  ;;  %v2348_v1 = vadd.f32 %v6214_v60, %v6238_v10  ;;  %vm3946_vm5 = vcmp.ne.s32.totalorder %v3460_v50, 15 }
 0x3a2   : > { %v4108_v11 = vadd.f32 %v6550_v28, %v4072_v25  ;;  %v3337_v19 = vadd.f32 %v6569_v47, %v2348_v1  ;;  %v6636_v25 = vpop.f32.mrf.mxu1  ;;  %v7089_v47 = vld [vmem:[#allocation47_spill] sm:$0xff] }
 0x3a3   : > { %v2611_v62 = vpop.f32.mrf.mxu3 }
 0x3a4   : > { %v4140_v54 = vmax.f32 %v4108_v11, 0.0  ;;  %v2679_v23 = vadd.f32 %v2611_v62, %v7087_v31  ;;  %v4042_v15 = vsel %vm3946_vm5, %v3337_v19, 0.0  ;;  %v6638_v11 = vpop.f32.mrf.mxu0  ;;  %v1974_v62 = vadd.f32 %v7089_v47, %v6418_v58  ;;  %v7091_v58 = vld [vmem:[#allocation49_spill] sm:$0xff] }
 0x3a5   : > { %v1976_v50 = vadd.f32 %v7091_v58, %v6425_v34  ;;  %v2353_v19 = vadd.f32 %v6242_v16, %v6269_v39  ;;  %v7092_v34 = vld [vmem:[#allocation42_spill] sm:$0xff]  ;;  %v7093_v39 = vld [vmem:[#allocation51_spill] sm:$0xff] }
 0x3a6   : > { %v3881_v2 = vsel %vm3785_vm4, %v2679_v23, 0.0  ;;  %v4168_v5 = vpack.c.bf16 %v4140_v54, %v4139_v3  ;;  %v3372_v3 = vadd.s32 88, %v6534_v56  ;;  %v7090_v23 = vld [vmem:[#allocation39_spill] sm:$0xff] }
 0x3a7   : > { %v3913_v48 = vadd.f32 %v3881_v2, %v3113_v12  ;;  %v3115_v2 = vadd.f32 %v6583_v20, %v1974_v62  ;;  %v3339_v20 = vadd.f32 %v6592_v42, %v2353_v19  ;;  %v1979_v42 = vadd.f32 %v7093_v39, %v6436_v52 }
 0x3a8   : > { %5026 = vmatmul.msk.bf16.gmra.mxu2 %vm385_vm0, %v4168_v5  ;;  %v3474_v1 = vand.u32 15, %v3372_v3  ;;  %v3374_v62 = vadd.s32 104, %v6534_v56  ;;  %v7094_v3 = vld [vmem:[#allocation43_spill] sm:$0xff]  ;;  %v3340_v52 = vadd.f32 %v6604_v45, %v6284_v35  ;;  %v7096_v45 = vld [vmem:[#allocation45_spill] sm:$0xff] }
 0x3a9   : > { %v4073_v14 = vadd.f32 %v3913_v48, %v3336_v27  ;;  %v3338_v48 = vadd.f32 %v6580_v57, %v6250_v61  ;;  %v3373_v61 = vadd.s32 96, %v6534_v56  ;;  %v3116_v57 = vadd.f32 %v6596_v24, %v1976_v50 }
 0x3aa   : > { %vm3948_vm7 = vcmp.ne.s32.totalorder %v3474_v1, 15 }
 0x3ab   : > { %v2613_v8 = vpop.f32.mrf.mxu3  ;;  %v4109_v60 = vadd.f32 %v6550_v28, %v4073_v14  ;;  %v6652_v14 = vpop.f32.mrf.mxu1 }
 0x3ac   : > { %v2680_v29 = vadd.f32 %v2613_v8, %v7088_v38  ;;  %v6657_v17 = vpop.f32.mrf.mxu0 }
 0x3ad   : > { %v4141_v54 = vmax.f32 %v4109_v60, 0.0 }
 0x3ae   : > { %v3914_v51 = vadd.f32 %v3114_v22, %v2680_v29 }
 0x3b0   : > { %v4074_v10 = vadd.f32 %v4042_v15, %v3914_v51  ;;  %4896 = vmatmul.msk.bf16.gmra.mxu3 %vm385_vm0, %v5117_v37  ;;  %v5118_v51 = vld [vmem:[#allocation2 + $0x80] sm:$0xff]  ;;  %v4044_v37 = vsel %vm3948_vm7, %v3339_v20, 0.0  ;;  %v3481_v15 = vand.u32 15, %v3373_v61 }
 0x3b2   : > { %v4110_v13 = vadd.f32 %v6550_v28, %v4074_v10  ;;  %vm3789_vm8 = vcmp.ne.s32.totalorder %v3481_v15, 0  ;;  %v7098_v15 = vld [vmem:[#allocation46_spill] sm:$0xff] }
 0x3b3   : > { %v2616_v21 = vpop.f32.mrf.mxu3  ;;  %v6667_v60 = vpop.f32.mrf.mxu1 }
 0x3b4   : > { %v4142_v31 = vmax.f32 %v4110_v13, 0.0  ;;  %v2681_v12 = vadd.f32 %v2616_v21, %v7090_v23  ;;  %v6670_v47 = vpop.f32.mrf.mxu0 }
 0x3b6   : > { %v3883_v5 = vsel %vm3787_vm6, %v2681_v12, 0.0  ;;  %v4169_v27 = vpack.c.bf16 %v4142_v31, %v4141_v54  ;;  %v3117_v31 = vadd.f32 %v6609_v26, %v1979_v42  ;;  %v3375_v26 = vadd.s32 112, %v6534_v56 }
 0x3b7   : > { %v3915_v44 = vadd.f32 %v3883_v5, %v3115_v2  ;;  %v7095_v5 = vld [vmem:[#allocation53_spill] sm:$0xff] }
 0x3b8   : > { %5027 = vmatmul.msk.bf16.gmra.mxu2 %vm385_vm0, %v4169_v27  ;;  %v1981_v27 = vadd.f32 %v7095_v5, %v6441_v46 }
 0x3b9   : > { %v4075_v8 = vadd.f32 %v3915_v44, %v3338_v48  ;;  %v3488_v48 = vand.u32 15, %v3374_v62  ;;  %v2358_v44 = vadd.f32 %v6274_v55, %v6298_v36  ;;  %v7099_v62 = vld [vmem:[#allocation57_spill] sm:$0xff] }
 0x3ba   : > { %v3118_v19 = vadd.f32 %v6623_v6, %v1981_v27 }
 0x3bb   : > { %v2618_v22 = vpop.f32.mrf.mxu3  ;;  %v4111_v41 = vadd.f32 %v6550_v28, %v4075_v8  ;;  %v3341_v50 = vadd.f32 %v6619_v32, %v2358_v44  ;;  %vm3950_vm9 = vcmp.ne.s32.totalorder %v3488_v48, 15  ;;  %v3290_v35 = vpop.f32.mrf.mxu1  ;;  %v7097_v32 = vld [vmem:[#allocation55_spill] sm:$0xff] }
 0x3bc   : > { %v2682_v38 = vadd.f32 %v2618_v22, %v7092_v34  ;;  %v6686_v20 = vpop.f32.mrf.mxu0  ;;  %v5119_v22 = vld [vmem:[#allocation2 + $0x88] sm:$0xff]  ;;  %v1984_v34 = vadd.f32 %v7097_v32, %v6451_v49 }
 0x3bd   : > { %v4143_v13 = vmax.f32 %v4111_v41, 0.0  ;;  %v4046_v61 = vsel %vm3950_vm9, %v3341_v50, 0.0 }
 0x3be   : > { %v3916_v29 = vadd.f32 %v3116_v57, %v2682_v38  ;;  %v3495_v57 = vand.u32 15, %v3375_v26 }
 0x3c0   : > { %v4076_v16 = vadd.f32 %v4044_v37, %v3916_v29  ;;  %4897 = vmatmul.msk.bf16.gmra.mxu3 %vm385_vm0, %v5118_v51  ;;  %vm3791_vm10 = vcmp.ne.s32.totalorder %v3495_v57, 0  ;;  %v3376_v29 = vadd.s32 120, %v6534_v56 }
 0x3c2   : > { %v4112_v10 = vadd.f32 %v6550_v28, %v4076_v16  ;;  %v3119_v16 = vadd.f32 %v6638_v11, %v1984_v34 }
 0x3c3   : > { %v2621_v24 = vpop.f32.mrf.mxu3  ;;  %v6696_v39 = vpop.f32.mrf.mxu1 }
 0x3c4   : > { %v4144_v21 = vmax.f32 %v4112_v10, 0.0  ;;  %v2683_v54 = vadd.f32 %v2621_v24, %v7094_v3  ;;  %v3342_v24 = vadd.f32 %v6636_v25, %v6310_v43  ;;  %v3502_v3 = vand.u32 15, %v3376_v29  ;;  %v7100_v43 = vld [vmem:[#allocation48_spill] sm:$0xff] }
 0x3c6   : > { %v3885_v23 = vsel %vm3789_vm8, %v2683_v54, 0.0  ;;  %v4170_v12 = vpack.c.bf16 %v4144_v21, %v4143_v13  ;;  %v1986_v13 = vadd.f32 %v7099_v62, %v6458_v59  ;;  %v3070_v21 = vpop.f32.mrf.mxu0  ;;  %v2363_v54 = vadd.f32 %v6303_v0, %v6320_v33  ;;  %v7101_v0 = vld [vmem:[#allocation59_spill] sm:$0xff] }
 0x3c7   : > { %v3917_v2 = vadd.f32 %v3885_v23, %v3117_v31  ;;  %vm3952_vm11 = vcmp.ne.s32.totalorder %v3502_v3, 15  ;;  %v1989_v33 = vadd.f32 %v7101_v0, %v6465_v30  ;;  %v1991_v30 = vadd.f32 %v6102_v9, %v6469_v4 }
 0x3c8   : > { %5028 = vmatmul.msk.bf16.gmra.mxu2 %vm385_vm0, %v4170_v12  ;;  %v3343_v11 = vadd.f32 %v6652_v14, %v2363_v54  ;;  %v3377_v12 = vadd.s32 128, %v6534_v56 }
 0x3c9   : > { %v4077_v58 = vadd.f32 %v3917_v2, %v3340_v52  ;;  %v3120_v52 = vadd.f32 %v6657_v17, %v1986_v13  ;;  %v3378_v17 = vadd.s32 136, %v6534_v56  ;;  %v3122_v29 = vadd.f32 %v6686_v20, %v1991_v30 }
 0x3ca   : > { %v4048_v59 = vsel %vm3952_vm11, %v3343_v11, 0.0  ;;  %v3509_v5 = vand.u32 15, %v3377_v12  ;;  %v3380_v20 = vadd.s32 152, %v6534_v56  ;;  %v7105_v11 = vld [vmem:[#allocation3_spill] sm:$0xff]  ;;  %v3382_v30 = vadd.s32 168, %v6534_v56 }
 0x3cb   : > { %v2623_v1 = vpop.f32.mrf.mxu3  ;;  %v4113_v55 = vadd.f32 %v6550_v28, %v4077_v58  ;;  %v3295_v27 = vpop.f32.mrf.mxu1  ;;  %v7107_v12 = vld [vmem:[#allocation63_spill] sm:$0xff] }
 0x3cc   : > { %v2684_v8 = vadd.f32 %v2623_v1, %v7096_v45  ;;  %vm3793_vm12 = vcmp.ne.s32.totalorder %v3509_v5, 0 }
 0x3cd   : > { %v4145_v51 = vmax.f32 %v4113_v55, 0.0  ;;  %v3516_v55 = vand.u32 15, %v3378_v17 }
 0x3ce   : > { %v3918_v46 = vadd.f32 %v3118_v19, %v2684_v8  ;;  %v3072_v58 = vpop.f32.mrf.mxu0  ;;  %v7102_v19 = vld [vmem:[#allocation50_spill] sm:$0xff]  ;;  %v3121_v8 = vadd.f32 %v6670_v47, %v1989_v33  ;;  %v7110_v33 = vld [vmem:[#allocation56_spill] sm:$0xff] }
 0x3cf   : > { %vm3954_vm13 = vcmp.ne.s32.totalorder %v3516_v55, 15 }
 0x3d0   : > { %v4078_v36 = vadd.f32 %v4046_v61, %v3918_v46  ;;  %4898 = vmatmul.msk.bf16.gmra.mxu3 %vm385_vm0, %v5119_v22  ;;  %v3344_v61 = vadd.f32 %v6667_v60, %v6329_v7  ;;  %v7103_v60 = vld [vmem:[#allocation52_spill] sm:$0xff] }
 0x3d2   : > { %v4114_v6 = vadd.f32 %v6550_v28, %v4078_v36  ;;  %v2368_v36 = vadd.f32 %v6324_v53, %v6342_v63  ;;  %v1994_v63 = vadd.f32 %v6114_v40, %v6475_v18  ;;  %v3346_v40 = vadd.f32 %v6696_v39, %v7105_v11 }
 0x3d3   : > { %v2626_v38 = vpop.f32.mrf.mxu3  ;;  %v6723_v34 = vpop.f32.mrf.mxu1 }
 0x3d4   : > { %v4146_v37 = vmax.f32 %v4114_v6, 0.0  ;;  %v2685_v41 = vadd.f32 %v2626_v38, %v7098_v15  ;;  %v3345_v6 = vadd.f32 %v3290_v35, %v2368_v36  ;;  %v3379_v38 = vadd.s32 144, %v6534_v56 }
 0x3d5   : > { %v3123_v13 = vadd.f32 %v3070_v21, %v1994_v63 }
 0x3d6   : > { %v3887_v42 = vsel %vm3791_vm10, %v2685_v41, 0.0  ;;  %v4171_v10 = vpack.c.bf16 %v4146_v37, %v4145_v51  ;;  %v3075_v7 = vpop.f32.mrf.mxu0  ;;  %v4050_v4 = vsel %vm3954_vm13, %v3345_v6, 0.0  ;;  %v3523_v37 = vand.u32 15, %v3379_v38  ;;  %v6732_v41 = vpop.f32.mrf.mxu2 }
 0x3d7   : > { %v3919_v49 = vadd.f32 %v3887_v42, %v3119_v16 }
 0x3d8   : > { %5029 = vmatmul.msk.bf16.gmra.mxu2 %vm385_vm0, %v4171_v10  ;;  %vm3795_vm14 = vcmp.ne.s32.totalorder %v3523_v37, 0  ;;  %v7116_v37 = vld [vmem:[#allocation65_spill] sm:$0xff] }
 0x3d9   : > { %v4079_v31 = vadd.f32 %v3919_v49, %v3342_v24  ;;  %v7104_v49 = vld [vmem:[#allocation54_spill] sm:$0xff] }
 0x3db   : > { %v2628_v23 = vpop.f32.mrf.mxu3  ;;  %v4115_v48 = vadd.f32 %v6550_v28, %v4079_v31  ;;  %v3300_v42 = vpop.f32.mrf.mxu1 }
 0x3dc   : > { %v2686_v25 = vadd.f32 %v2628_v23, %v7100_v43  ;;  %v7106_v23 = vld [vmem:[#allocation14_spill] sm:$0xff]  ;;  %v3530_v43 = vand.u32 15, %v3380_v20 }
 0x3dd   : > { %v4147_v1 = vmax.f32 %v4115_v48, 0.0 }
 0x3de   : > { %v3920_v2 = vadd.f32 %v3120_v52, %v2686_v25  ;;  %v3077_v3 = vpop.f32.mrf.mxu0  ;;  %v1996_v52 = vadd.f32 %v7107_v12, %v7106_v23  ;;  %v7108_v25 = vld [vmem:[#allocation16_spill] sm:$0xff]  ;;  %vm3956_vm1 = vcmp.ne.s32.totalorder %v3530_v43, 15  ;;  %v7121_v43 = vld [vmem:[#allocation66_spill] sm:$0xff] }
 0x3e0   : > { %v4080_v44 = vadd.f32 %v4048_v59, %v3920_v2  ;;  %v7109_v2 = vld [vmem:[#allocation18_spill] sm:$0xff]  ;;  %v3124_v0 = vadd.f32 %v3072_v58, %v1996_v52  ;;  %v7120_v52 = vld [vmem:[#allocation31_spill] sm:$0xff] }
 0x3e1   : > { %v2373_v59 = vadd.f32 %v7109_v2, %v7108_v25 }
 0x3e2   : > { %v4116_v14 = vadd.f32 %v6550_v28, %v4080_v44  ;;  %v3381_v44 = vadd.s32 160, %v6534_v56 }
 0x3e3   : > { %v2631_v50 = vpop.f32.mrf.mxu3  ;;  %v3347_v21 = vadd.f32 %v3295_v27, %v2373_v59  ;;  %v7111_v27 = vld [vmem:[#allocation17_spill] sm:$0xff] }
 0x3e4   : > { %v4148_v26 = vmax.f32 %v4116_v14, 0.0  ;;  %v2687_v45 = vadd.f32 %v2631_v50, %v7102_v19  ;;  %v3303_v50 = vpop.f32.mrf.mxu1 }
 0x3e6   : > { %v3889_v46 = vsel %vm3793_vm12, %v2687_v45, 0.0  ;;  %v4172_v22 = vpack.c.bf16 %v4148_v26, %v4147_v1  ;;  %v4052_v1 = vsel %vm3956_vm1, %v3347_v21, 0.0  ;;  %v3537_v26 = vand.u32 15, %v3381_v44  ;;  %v3080_v19 = vpop.f32.mrf.mxu0  ;;  %v7122_v44 = vld [vmem:[#allocation61_spill] sm:$0xff] }
 0x3e7   : > { %v3921_v57 = vadd.f32 %v3889_v46, %v3121_v8  ;;  %v7112_v46 = vld [vmem:[#allocation64_spill] sm:$0xff]  ;;  %v3384_v21 = vadd.s32 184, %v6534_v56 }
 0x3e8   : > { %5030 = vmatmul.msk.bf16.gmra.mxu2 %vm385_vm0, %v4172_v22  ;;  %v1999_v22 = vadd.f32 %v7112_v46, %v7111_v27  ;;  %vm3797_vm2 = vcmp.ne.s32.totalorder %v3537_v26, 0  ;;  %v7125_v27 = vld [vmem:[#allocation67_spill] sm:$0xff] }
 0x3e9   : > { %v4081_v32 = vadd.f32 %v3921_v57, %v3344_v61 }
 0x3eb   : > { %v2633_v47 = vpop.f32.mrf.mxu3  ;;  %v4117_v15 = vadd.f32 %v6550_v28, %v4081_v32  ;;  %v7113_v32 = vld [vmem:[#allocation58_spill] sm:$0xff] }
 0x3ec   : > { %v2688_v51 = vadd.f32 %v2633_v47, %v7103_v60  ;;  %v3125_v47 = vadd.f32 %v3075_v7, %v1999_v22  ;;  %v7114_v60 = vld [vmem:[#allocation24_spill] sm:$0xff]  ;;  %v3305_v63 = vpop.f32.mrf.mxu1  ;;  %v3558_v22 = vand.u32 15, %v3384_v21 }
 0x3ed   : > { %v4149_v10 = vmax.f32 %v4117_v15, 0.0 }
 0x3ee   : > { %v3922_v9 = vadd.f32 %v3122_v29, %v2688_v51  ;;  %v3348_v51 = vadd.f32 %v6723_v34, %v7114_v60  ;;  %vm3960_vm5 = vcmp.ne.s32.totalorder %v3558_v22, 15 }
 0x3f0   : > { %v4082_v53 = vadd.f32 %v4050_v4, %v3922_v9  ;;  %v7115_v4 = vld [vmem:[#allocation19_spill] sm:$0xff] }
 0x3f1   : > { %v2001_v15 = vadd.f32 %v7116_v37, %v7115_v4 }
 0x3f2   : > { %v4118_v35 = vadd.f32 %v6550_v28, %v4082_v53  ;;  %v3544_v53 = vand.u32 15, %v3382_v30 }
 0x3f3   : > { %v2636_v16 = vpop.f32.mrf.mxu3  ;;  %v3126_v34 = vadd.f32 %v3077_v3, %v2001_v15  ;;  %v7129_v15 = vld [vmem:[#allocation34_spill] sm:$0xff] }
 0x3f4   : > { %v4150_v24 = vmax.f32 %v4118_v35, 0.0  ;;  %v2689_v62 = vadd.f32 %v2636_v16, %v7104_v49  ;;  %v7117_v35 = vld [vmem:[#allocation4_spill] sm:$0xff]  ;;  %v7118_v16 = vld [vmem:[#allocation22_spill] sm:$0xff]  ;;  %vm3958_vm3 = vcmp.ne.s32.totalorder %v3544_v53, 15  ;;  %v3308_v25 = vpop.f32.mrf.mxu1 }
 0x3f5   : > { %v2378_v20 = vadd.f32 %v7118_v16, %v7117_v35  ;;  %v7130_v53 = vld [vmem:[#allocation68_spill] sm:$0xff] }
 0x3f6   : > { %v3891_v54 = vsel %vm3795_vm14, %v2689_v62, 0.0  ;;  %v4173_v31 = vpack.c.bf16 %v4150_v24, %v4149_v10  ;;  %v3082_v24 = vpop.f32.mrf.mxu0 }
 0x3f7   : > { %v3923_v18 = vadd.f32 %v3891_v54, %v3123_v13  ;;  %v3349_v7 = vadd.f32 %v3300_v42, %v2378_v20  ;;  %v3383_v13 = vadd.s32 176, %v6534_v56  ;;  %v7119_v54 = vld [vmem:[#allocation60_spill] sm:$0xff]  ;;  %v2004_v42 = vadd.f32 %v7121_v43, %v7120_v52  ;;  %v7134_v52 = vld [vmem:[#allocation69_spill] sm:$0xff] }
 0x3f8   : > { %5031 = vmatmul.msk.bf16.gmra.mxu2 %vm385_vm0, %v4173_v31 }
 0x3f9   : > { %v4083_v5 = vadd.f32 %v3923_v18, %v3346_v40  ;;  %v4054_v40 = vsel %vm3958_vm3, %v3349_v7, 0.0  ;;  %v3551_v18 = vand.u32 15, %v3383_v13 }
 0x3fb   : > { %v2638_v39 = vpop.f32.mrf.mxu3  ;;  %v4254_v48 = vpop.f32.mrf.mxu2  ;;  %v4119_v45 = vadd.f32 %v6550_v28, %v4083_v5  ;;  %vm3799_vm4 = vcmp.ne.s32.totalorder %v3551_v18, 0 }
 0x3fc   : > { %v2690_v14 = vadd.f32 %v2638_v39, %v7110_v33  ;;  %4335 = vst.msk [vmem:[%s6747_s12] sm:$0xff] %vm4334_vm15, %v4254_v48  ;;  %v3127_v33 = vadd.f32 %v3080_v19, %v2004_v42  ;;  %v3385_v19 = vadd.s32 192, %v6534_v56 }
 0x3fd   : > { %v4151_v55 = vmax.f32 %v4119_v45, 0.0 }
 0x3fe   : > { %v3924_v17 = vadd.f32 %v3124_v0, %v2690_v14  ;;  %v3085_v5 = vpop.f32.mrf.mxu0 }
 0x400   : > { %v4084_v8 = vadd.f32 %v4052_v1, %v3924_v17  ;;  %v7123_v1 = vld [vmem:[#allocation27_spill] sm:$0xff] }
 0x401   : > { %v3350_v26 = vadd.f32 %v3303_v50, %v7123_v1  ;;  %v7128_v50 = vld [vmem:[#allocation62_spill] sm:$0xff] }
 0x402   : > { %v4120_v61 = vadd.f32 %v6550_v28, %v4084_v8  ;;  %v7124_v8 = vld [vmem:[#allocation32_spill] sm:$0xff] }
 0x403   : > { %v2641_v58 = vpop.f32.mrf.mxu3  ;;  %v4256_v57 = vpop.f32.mrf.mxu2  ;;  %v2006_v46 = vadd.f32 %v7125_v27, %v7124_v8  ;;  %v7138_v27 = vld [vmem:[#allocation35_spill] sm:$0xff] }
 0x404   : > { %v4152_v36 = vmax.f32 %v4120_v61, 0.0  ;;  %v2691_v6 = vadd.f32 %v2641_v58, %v7113_v32  ;;  %4336 = vst.msk [vmem:[%s6747_s12 + $0x8] sm:$0xff] %vm4334_vm15, %v4256_v57  ;;  %v7126_v61 = vld [vmem:[#allocation38_spill] sm:$0xff]  ;;  %v7127_v58 = vld [vmem:[#allocation25_spill] sm:$0xff] }
 0x405   : > { %v2383_v57 = vadd.f32 %v7127_v58, %v7126_v61 }
 0x406   : > { %v3893_v38 = vsel %vm3797_vm2, %v2691_v6, 0.0  ;;  %v4174_v29 = vpack.c.bf16 %v4152_v36, %v4151_v55  ;;  %v3128_v6 = vadd.f32 %v3082_v24, %v2006_v46  ;;  %v7139_v46 = vld [vmem:[#allocation70_spill] sm:$0xff] }
 0x407   : > { %v3925_v9 = vadd.f32 %v3893_v38, %v3125_v47  ;;  %v3351_v55 = vadd.f32 %v3305_v63, %v2383_v57  ;;  %v3310_v47 = vpop.f32.mrf.mxu1  ;;  %v2009_v63 = vadd.f32 %v7130_v53, %v7129_v15  ;;  %v2014_v22 = vadd.f32 %v7139_v46, %v7138_v27  ;;  %v7144_v53 = vld [vmem:[#allocation29_spill] sm:$0xff] }
 0x408   : > { %5032 = vmatmul.msk.bf16.gmra.mxu2 %vm385_vm0, %v4174_v29  ;;  %v3087_v29 = vpop.f32.mrf.mxu0 }
 0x409   : > { %v4085_v10 = vadd.f32 %v3925_v9, %v3348_v51  ;;  %v4056_v51 = vsel %vm3960_vm5, %v3351_v55, 0.0  ;;  %v3565_v9 = vand.u32 15, %v3385_v19  ;;  %v3129_v13 = vadd.f32 %v3085_v5, %v2009_v63  ;;  %v7140_v19 = vld [vmem:[#allocation75_spill] sm:$0xff]  ;;  %v7145_v63 = vld [vmem:[#allocation6_spill] sm:$0xff] }
 0x40a   : > { %v3388_v55 = vadd.s32 216, %v6534_v56 }
 0x40b   : > { %v2643_v49 = vpop.f32.mrf.mxu3  ;;  %v4259_v62 = vpop.f32.mrf.mxu2  ;;  %v4121_v23 = vadd.f32 %v6550_v28, %v4085_v10  ;;  %vm3801_vm6 = vcmp.ne.s32.totalorder %v3565_v9, 0  ;;  %v3386_v10 = vadd.s32 200, %v6534_v56  ;;  %v7142_v9 = vld [vmem:[#allocation85_spill] sm:$0xff] }
 0x40c   : > { %v2692_v31 = vadd.f32 %v2643_v49, %v7119_v54  ;;  %4337 = vst.msk [vmem:[%s6747_s12 + $0x10] sm:$0xff] %vm4334_vm15, %v4259_v62  ;;  %v7131_v49 = vld [vmem:[#allocation71_spill] sm:$0xff]  ;;  %v3586_v15 = vand.u32 15, %v3388_v55 }
 0x40d   : > { %v4153_v39 = vmax.f32 %v4121_v23, 0.0  ;;  %v3572_v42 = vand.u32 15, %v3386_v10 }
 0x40e   : > { %v3926_v11 = vadd.f32 %v3126_v34, %v2692_v31  ;;  %vm3964_vm9 = vcmp.ne.s32.totalorder %v3586_v15, 15  ;;  %v7157_v15 = vld [vmem:[#allocation78_spill] sm:$0xff] }
 0x40f   : > { %v3313_v34 = vpop.f32.mrf.mxu1  ;;  %vm3962_vm7 = vcmp.ne.s32.totalorder %v3572_v42, 15 }
 0x410   : > { %v4086_v12 = vadd.f32 %v4054_v40, %v3926_v11  ;;  %v7132_v11 = vld [vmem:[#allocation26_spill] sm:$0xff]  ;;  %v3090_v23 = vpop.f32.mrf.mxu0 }
 0x411   : > { %v3352_v40 = vadd.f32 %v3308_v25, %v7132_v11  ;;  %v7137_v25 = vld [vmem:[#allocation73_spill] sm:$0xff] }
 0x412   : > { %v4122_v2 = vadd.f32 %v6550_v28, %v4086_v12  ;;  %v7133_v12 = vld [vmem:[#allocation84_spill] sm:$0xff] }
 0x413   : > { %v2646_v59 = vpop.f32.mrf.mxu3  ;;  %v4261_v3 = vpop.f32.mrf.mxu2  ;;  %v2011_v43 = vadd.f32 %v7134_v52, %v7133_v12  ;;  %v7147_v12 = vld [vmem:[#allocation36_spill] sm:$0xff]  ;;  %v7148_v52 = vld [vmem:[#allocation74_spill] sm:$0xff] }
 0x414   : > { %v4154_v48 = vmax.f32 %v4122_v2, 0.0  ;;  %v2693_v0 = vadd.f32 %v2646_v59, %v7122_v44  ;;  %4338 = vst.msk [vmem:[%s6747_s12 + $0x18] sm:$0xff] %vm4334_vm15, %v4261_v3  ;;  %v7135_v2 = vld [vmem:[#allocation41_spill] sm:$0xff]  ;;  %v3387_v44 = vadd.s32 208, %v6534_v56 }
 0x415   : > { %v7136_v59 = vld [vmem:[#allocation5_spill] sm:$0xff] }
 0x416   : > { %v3895_v14 = vsel %vm3799_vm4, %v2693_v0, 0.0  ;;  %v4175_v17 = vpack.c.bf16 %v4154_v48, %v4153_v39  ;;  %v2388_v3 = vadd.f32 %v7136_v59, %v7135_v2  ;;  %v3130_v0 = vadd.f32 %v3087_v29, %v2011_v43  ;;  %v7141_v29 = vld [vmem:[#allocation30_spill] sm:$0xff] }
 0x417   : > { %v3927_v45 = vadd.f32 %v3895_v14, %v3127_v33  ;;  %v3579_v1 = vand.u32 15, %v3387_v44  ;;  %v2019_v43 = vadd.f32 %v7148_v52, %v7147_v12 }
 0x418   : > { %5033 = vmatmul.msk.bf16.gmra.mxu2 %vm385_vm0, %v4175_v17  ;;  %v3353_v39 = vadd.f32 %v3310_v47, %v2388_v3  ;;  %v3092_v61 = vpop.f32.mrf.mxu0  ;;  %v3131_v47 = vadd.f32 %v3090_v23, %v2014_v22  ;;  %v7153_v22 = vld [vmem:[#allocation20_spill] sm:$0xff] }
 0x419   : > { %v4087_v30 = vadd.f32 %v3927_v45, %v3350_v26  ;;  %v3315_v26 = vpop.f32.mrf.mxu1  ;;  %vm3803_vm8 = vcmp.ne.s32.totalorder %v3579_v1, 0 }
 0x41a   : > { %v4058_v17 = vsel %vm3962_vm7, %v3353_v39, 0.0 }
 0x41b   : > { %v2648_v36 = vpop.f32.mrf.mxu3  ;;  %v4264_v32 = vpop.f32.mrf.mxu2  ;;  %v4123_v4 = vadd.f32 %v6550_v28, %v4087_v30 }
 0x41c   : > { %v2694_v38 = vadd.f32 %v2648_v36, %v7128_v50  ;;  %4339 = vst.msk [vmem:[%s6747_s12 + $0x20] sm:$0xff] %vm4334_vm15, %v4264_v32 }
 0x41d   : > { %v4155_v24 = vmax.f32 %v4123_v4, 0.0  ;;  %v7143_v4 = vld [vmem:[#allocation72_spill] sm:$0xff] }
 0x41e   : > { %v3928_v60 = vadd.f32 %v3128_v6, %v2694_v38 }
 0x420   : > { %v4088_v37 = vadd.f32 %v4056_v51, %v3928_v60  ;;  %v3354_v60 = vadd.f32 %v3313_v34, %v7141_v29  ;;  %v7146_v34 = vld [vmem:[#allocation77_spill] sm:$0xff] }
 0x422   : > { %v4124_v35 = vadd.f32 %v6550_v28, %v4088_v37  ;;  %v2016_v37 = vadd.f32 %v7143_v4, %v7142_v9 }
 0x423   : > { %v2651_v16 = vpop.f32.mrf.mxu3  ;;  %v4266_v20 = vpop.f32.mrf.mxu2 }
 0x424   : > { %v4156_v7 = vmax.f32 %v4124_v35, 0.0  ;;  %v2695_v62 = vadd.f32 %v2651_v16, %v7131_v49  ;;  %4340 = vst.msk [vmem:[%s6747_s12 + $0x28] sm:$0xff] %vm4334_vm15, %v4266_v20  ;;  %v2393_v35 = vadd.f32 %v7145_v63, %v7144_v53  ;;  %v3318_v20 = vpop.f32.mrf.mxu1  ;;  %v3389_v49 = vadd.s32 224, %v6534_v56 }
 0x426   : > { %v3897_v54 = vsel %vm3801_vm6, %v2695_v62, 0.0  ;;  %v4176_v31 = vpack.c.bf16 %v4156_v7, %v4155_v24  ;;  %v3355_v10 = vadd.f32 %v3315_v26, %v2393_v35  ;;  %v3095_v62 = vpop.f32.mrf.mxu0 }
 0x427   : > { %v3929_v18 = vadd.f32 %v3897_v54, %v3129_v13  ;;  %v3132_v13 = vadd.f32 %v3092_v61, %v2016_v37  ;;  %v7154_v61 = vld [vmem:[#allocation7_spill] sm:$0xff] }
 0x428   : > { %5034 = vmatmul.msk.bf16.gmra.mxu2 %vm385_vm0, %v4176_v31  ;;  %v4060_v11 = vsel %vm3964_vm9, %v3355_v10, 0.0  ;;  %v7156_v37 = vld [vmem:[#allocation87_spill] sm:$0xff] }
 0x429   : > { %v4089_v21 = vadd.f32 %v3929_v18, %v3352_v40  ;;  %v3593_v40 = vand.u32 15, %v3389_v49  ;;  %v2024_v53 = vadd.f32 %v7157_v15, %v7156_v37 }
 0x42b   : > { %v2653_v5 = vpop.f32.mrf.mxu3  ;;  %v4269_v48 = vpop.f32.mrf.mxu2  ;;  %v4125_v45 = vadd.f32 %v6550_v28, %v4089_v21  ;;  %vm3805_vm10 = vcmp.ne.s32.totalorder %v3593_v40, 0  ;;  %v3390_v21 = vadd.s32 232, %v6534_v56  ;;  %v7160_v40 = vld [vmem:[#allocation88_spill] sm:$0xff] }
 0x42c   : > { %v2696_v33 = vadd.f32 %v2653_v5, %v7137_v25  ;;  %4341 = vst.msk [vmem:[%s6747_s12 + $0x30] sm:$0xff] %vm4334_vm15, %v4269_v48  ;;  %v3320_v3 = vpop.f32.mrf.mxu1  ;;  %v7149_v48 = vld [vmem:[#allocation79_spill] sm:$0xff] }
 0x42d   : > { %v4157_v36 = vmax.f32 %v4125_v45, 0.0  ;;  %v7151_v45 = vld [vmem:[#allocation86_spill] sm:$0xff]  ;;  %v3600_v46 = vand.u32 15, %v3390_v21 }
 0x42e   : > { %v3930_v14 = vadd.f32 %v3130_v0, %v2696_v33  ;;  %v3133_v0 = vadd.f32 %v3095_v62, %v2019_v43  ;;  %v3097_v25 = vpop.f32.mrf.mxu0 }
 0x42f   : > { %vm3966_vm11 = vcmp.ne.s32.totalorder %v3600_v46, 15 }
 0x430   : > { %v4090_v8 = vadd.f32 %v4058_v17, %v3930_v14  ;;  %v7150_v17 = vld [vmem:[#allocation40_spill] sm:$0xff] }
 0x431   : > { %v3356_v1 = vadd.f32 %v3318_v20, %v7150_v17  ;;  %v3392_v20 = vadd.s32 248, %v6534_v56 }
 0x432   : > { %v4126_v58 = vadd.f32 %v6550_v28, %v4090_v8  ;;  %v7152_v8 = vld [vmem:[#allocation76_spill] sm:$0xff] }
 0x433   : > { %v2656_v57 = vpop.f32.mrf.mxu3  ;;  %v4271_v30 = vpop.f32.mrf.mxu2  ;;  %v2021_v27 = vadd.f32 %v7152_v8, %v7151_v45  ;;  %v3614_v12 = vand.u32 15, %v3392_v20 }
 0x434   : > { %v4158_v32 = vmax.f32 %v4126_v58, 0.0  ;;  %v2697_v6 = vadd.f32 %v2656_v57, %v7140_v19  ;;  %4342 = vst.msk [vmem:[%s6747_s12 + $0x38] sm:$0xff] %vm4334_vm15, %v4271_v30  ;;  %v2398_v58 = vadd.f32 %v7154_v61, %v7153_v22 }
 0x435   : > { %v3134_v19 = vadd.f32 %v3097_v25, %v2021_v27  ;;  %vm3968_vm13 = vcmp.ne.s32.totalorder %v3614_v12, 15 }
 0x436   : > { %v3899_v50 = vsel %vm3803_vm8, %v2697_v6, 0.0  ;;  %v4177_v38 = vpack.c.bf16 %v4158_v32, %v4157_v36  ;;  %v3357_v30 = vadd.f32 %v3320_v3, %v2398_v58  ;;  %v3391_v32 = vadd.s32 240, %v6534_v56  ;;  %v7155_v6 = vld [vmem:[#allocation80_spill] sm:$0xff]  ;;  %v7162_v56 = vld [vmem:[#allocation33_spill] sm:$0xff] }
 0x437   : > { %v3931_v51 = vadd.f32 %v3899_v50, %v3131_v47  ;;  %v3323_v50 = vpop.f32.mrf.mxu1  ;;  %v2403_v52 = vadd.f32 %v6732_v41, %v7162_v56  ;;  %v5194_v41 = vld [vmem:[%s6910_s4] ss:$0 sm:$0xff] }
 0x438   : > { %5035 = vmatmul.msk.bf16.gmra.mxu2 %vm385_vm0, %v4177_v38  ;;  %v4062_v29 = vsel %vm3966_vm11, %v3357_v30, 0.0 }
 0x439   : > { %v4091_v16 = vadd.f32 %v3931_v51, %v3354_v60  ;;  %v3607_v60 = vand.u32 15, %v3391_v32  ;;  %v3100_v51 = vpop.f32.mrf.mxu0 }
 0x43a   : > { %v3135_v62 = vadd.f32 %v3100_v51, %v2024_v53 }
 0x43b   : > { %v2658_v24 = vpop.f32.mrf.mxu3  ;;  %v4274_v7 = vpop.f32.mrf.mxu2  ;;  %v4127_v18 = vadd.f32 %v6550_v28, %v4091_v16  ;;  %vm3807_vm12 = vcmp.ne.s32.totalorder %v3607_v60, 0 }
 0x43c   : > { %v2698_v54 = vadd.f32 %v2658_v24, %v7146_v34  ;;  %4343 = vst.msk [vmem:[%s6747_s12 + $0x40] sm:$0xff] %vm4334_vm15, %v4274_v7  ;;  %v7158_v7 = vld [vmem:[#allocation82_spill] sm:$0xff] }
 0x43d   : > { %v4159_v39 = vmax.f32 %v4127_v18, 0.0 }
 0x43e   : > { %v3932_v31 = vadd.f32 %v3132_v13, %v2698_v54  ;;  %v7159_v54 = vld [vmem:[#allocation12_spill] sm:$0xff] }
 0x440   : > { %v4092_v23 = vadd.f32 %v4060_v11, %v3932_v31  ;;  %v3358_v31 = vadd.f32 %v3323_v50, %v7159_v54 }
 0x442   : > { %v4128_v42 = vadd.f32 %v6550_v28, %v4092_v23  ;;  %v3325_v23 = vpop.f32.mrf.mxu1 }
 0x443   : > { %v2661_v2 = vpop.f32.mrf.mxu3  ;;  %v4276_v59 = vpop.f32.mrf.mxu2 }
 0x444   : > { %v4160_v5 = vmax.f32 %v4128_v42, 0.0  ;;  %v2699_v44 = vadd.f32 %v2661_v2, %v7149_v48  ;;  %4344 = vst.msk [vmem:[%s6747_s12 + $0x48] sm:$0xff] %vm4334_vm15, %v4276_v59  ;;  %v3102_v42 = vpop.f32.mrf.mxu0  ;;  %v3359_v2 = vadd.f32 %v3325_v23, %v2403_v52 }
 0x446   : > { %v3901_v33 = vsel %vm3805_vm10, %v2699_v44, 0.0  ;;  %v4178_v14 = vpack.c.bf16 %v4160_v5, %v4159_v39  ;;  %v7163_v39 = vld [vmem:[#allocation83_spill] sm:$0xff]  ;;  %v4064_v44 = vsel %vm3968_vm13, %v3359_v2, 0.0 }
 0x447   : > { %v3933_v26 = vadd.f32 %v3901_v33, %v3133_v0 }
 0x448   : > { %5036 = vmatmul.msk.bf16.gmra.mxu2 %vm385_vm0, %v4178_v14 }
 0x449   : > { %v4093_v57 = vadd.f32 %v3933_v26, %v3356_v1 }
 0x44b   : > { %v2663_v55 = vpop.f32.mrf.mxu3  ;;  %v4279_v36 = vpop.f32.mrf.mxu2  ;;  %v4129_v9 = vadd.f32 %v6550_v28, %v4093_v57 }
 0x44c   : > { %v2700_v47 = vadd.f32 %v2663_v55, %v7155_v6  ;;  %4345 = vst.msk [vmem:[%s6747_s12 + $0x50] sm:$0xff] %vm4334_vm15, %v4279_v36 }
 0x44d   : > { %v4161_v10 = vmax.f32 %v4129_v9, 0.0 }
 0x44e   : > { %v3934_v38 = vadd.f32 %v3134_v19, %v2700_v47 }
 0x450   : > { %v4094_v4 = vadd.f32 %v4062_v29, %v3934_v38 }
 0x452   : > { %v4130_v63 = vadd.f32 %v6550_v28, %v4094_v4  ;;  %v7161_v28 = vld [vmem:[#allocation81_spill] sm:$0xff] }
 0x453   : > { %v2666_v35 = vpop.f32.mrf.mxu3  ;;  %v4281_v16 = vpop.f32.mrf.mxu2  ;;  %v2026_v18 = vadd.f32 %v7161_v28, %v7160_v40 }
 0x454   : > { %v4162_v24 = vmax.f32 %v4130_v63, 0.0  ;;  %v2701_v49 = vadd.f32 %v2666_v35, %v7158_v7  ;;  %4346 = vst.msk [vmem:[%s6747_s12 + $0x58] sm:$0xff] %vm4334_vm15, %v4281_v16 }
 0x455   : > { %v3136_v21 = vadd.f32 %v3102_v42, %v2026_v18 }
 0x456   : > { %v3903_v13 = vsel %vm3807_vm12, %v2701_v49, 0.0  ;;  %v4179_v34 = vpack.c.bf16 %v4162_v24, %v4161_v10 }
 0x457   : > { %v3935_v11 = vadd.f32 %v3903_v13, %v3135_v62 }
 0x458   : > { %5037 = vmatmul.msk.bf16.gmra.mxu2 %vm385_vm0, %v4179_v34 }
 0x459   : > { %v4095_v43 = vadd.f32 %v3935_v11, %v3358_v31 }
 0x45b   : > { %v2668_v59 = vpop.f32.mrf.mxu3  ;;  %v4284_v3 = vpop.f32.mrf.mxu2  ;;  %v4131_v0 = vadd.f32 %v5194_v41, %v4095_v43 }
 0x45c   : > { %v2702_v5 = vadd.f32 %v2668_v59, %v7163_v39  ;;  %4347 = vst.msk [vmem:[%s6747_s12 + $0x60] sm:$0xff] %vm4334_vm15, %v4284_v3 }
 0x45d   : > { %v4163_v17 = vmax.f32 %v4131_v0, 0.0 }
 0x45e   : > { %v3936_v48 = vadd.f32 %v3136_v21, %v2702_v5 }
 0x460   : > { %v4096_v25 = vadd.f32 %v4064_v44, %v3936_v48 }
 0x462   : > { %v4132_v33 = vadd.f32 %v5194_v41, %v4096_v25 }
 0x463   : > { %v4286_v14 = vpop.f32.mrf.mxu2 }
 0x464   : > { %v4164_v1 = vmax.f32 %v4132_v33, 0.0  ;;  %4348 = vst.msk [vmem:[%s6747_s12 + $0x68] sm:$0xff] %vm4334_vm15, %v4286_v14 }
 0x466   : > { %v4180_v26 = vpack.c.bf16 %v4164_v1, %v4163_v17 }
 0x468   : > { %5038 = vmatmul.msk.bf16.gmra.mxu2 %vm385_vm0, %v4180_v26 }
 0x46b   : > { %v4289_v45 = vpop.f32.mrf.mxu2 }
 0x46c   : > { %4349 = vst.msk [vmem:[%s6747_s12 + $0x70] sm:$0xff] %vm4334_vm15, %v4289_v45 }
 0x473   : > { %v4291_v8 = vpop.f32.mrf.mxu2 }
 0x474   : > { %4350 = vst.msk [vmem:[%s6747_s12 + $0x78] sm:$0xff] %vm4334_vm15, %v4291_v8 }
 0x47b   : > { %v4294_v27 = vpop.f32.mrf.mxu2 }
 0x47c   : > { %4351 = vst.msk [vmem:[%s6747_s12 + $0x80] sm:$0xff] %vm4334_vm15, %v4294_v27 }
 0x483   : > { %v4296_v46 = vpop.f32.mrf.mxu2 }
 0x484   : > { %4352 = vst.msk [vmem:[%s6747_s12 + $0x88] sm:$0xff] %vm4334_vm15, %v4296_v46 }
 0x48b   : > { %v4299_v22 = vpop.f32.mrf.mxu2 }
 0x48c   : > { %4353 = vst.msk [vmem:[%s6747_s12 + $0x90] sm:$0xff] %vm4334_vm15, %v4299_v22 }
 0x493   : > { %v4301_v61 = vpop.f32.mrf.mxu2 }
 0x494   : > { %4354 = vst.msk [vmem:[%s6747_s12 + $0x98] sm:$0xff] %vm4334_vm15, %v4301_v61 }
 0x49b   : > { %v4304_v58 = vpop.f32.mrf.mxu2 }
 0x49c   : > { %4355 = vst.msk [vmem:[%s6747_s12 + $0xa0] sm:$0xff] %vm4334_vm15, %v4304_v58 }
 0x4a3   : > { %v4306_v57 = vpop.f32.mrf.mxu2 }
 0x4a4   : > { %4356 = vst.msk [vmem:[%s6747_s12 + $0xa8] sm:$0xff] %vm4334_vm15, %v4306_v57 }
 0x4ab   : > { %v4309_v30 = vpop.f32.mrf.mxu2 }
 0x4ac   : > { %4357 = vst.msk [vmem:[%s6747_s12 + $0xb0] sm:$0xff] %vm4334_vm15, %v4309_v30 }
 0x4b3   : > { %v4311_v55 = vpop.f32.mrf.mxu2 }
 0x4b4   : > { %4358 = vst.msk [vmem:[%s6747_s12 + $0xb8] sm:$0xff] %vm4334_vm15, %v4311_v55 }
 0x4bb   : > { %v4314_v36 = vpop.f32.mrf.mxu2 }
 0x4bc   : > { %4359 = vst.msk [vmem:[%s6747_s12 + $0xc0] sm:$0xff] %vm4334_vm15, %v4314_v36 }
 0x4c3   : > { %v4316_v32 = vpop.f32.mrf.mxu2 }
 0x4c4   : > { %4360 = vst.msk [vmem:[%s6747_s12 + $0xc8] sm:$0xff] %vm4334_vm15, %v4316_v32 }
 0x4cb   : > { %v4319_v19 = vpop.f32.mrf.mxu2 }
 0x4cc   : > { %4361 = vst.msk [vmem:[%s6747_s12 + $0xd0] sm:$0xff] %vm4334_vm15, %v4319_v19 }
 0x4d3   : > { %v4321_v6 = vpop.f32.mrf.mxu2 }
 0x4d4   : > { %4362 = vst.msk [vmem:[%s6747_s12 + $0xd8] sm:$0xff] %vm4334_vm15, %v4321_v6 }
 0x4db   : > { %v4324_v47 = vpop.f32.mrf.mxu2 }
 0x4dc   : > { %4363 = vst.msk [vmem:[%s6747_s12 + $0xe0] sm:$0xff] %vm4334_vm15, %v4324_v47 }
 0x4e3   : > { %v4326_v50 = vpop.f32.mrf.mxu2 }
 0x4e4   : > { %4364 = vst.msk [vmem:[%s6747_s12 + $0xe8] sm:$0xff] %vm4334_vm15, %v4326_v50 }
 0x4eb   : > { %v4329_v38 = vpop.f32.mrf.mxu2 }
 0x4ec   : > { %4365 = vst.msk [vmem:[%s6747_s12 + $0xf0] sm:$0xff] %vm4334_vm15, %v4329_v38 }
 0x4f3   : > { %v4331_v29 = vpop.f32.mrf.mxu2 }
 0x4f4   : > { %4366 = vst.msk [vmem:[%s6747_s12 + $0xf8] sm:$0xff] %vm4334_vm15, %v4331_v29 }
 0x4f5 PF: > { %s16_s21 = sadd.s32 1, %s5201_s21  }
 0x4f6   : > { %p13_p4 = scmp.ge.s32.totalorder %s16_s21, 4  }
 0x4f8   :  { %15 = sbr.rel (!%p13_p4) target bundleno = 1 (0x1), region = 82 }

</bundles_post_ra>
